<compile_context>
chip_gen: v7x
topology: tpu7x:2x2x1
jax: 0.10.0
libtpu: 0.0.40
codegen_flags: <defaults>
</compile_context>

<pallas_src>
import functools

import jax
import jax.numpy as jnp
from jax.experimental import pallas as pl
from jax.experimental.pallas import tpu as pltpu

BN_EPS = 1e-5
LRELU_SLOPE = 0.01      # PyTorch nn.LeakyReLU default
NORM_EPS = 1e-12


# ----------------------------------------------------------------------------
# Fused kernel.  Grid = (H1 // KB,) over the 4096-wide hidden axis of branch 1
# (reduction axis -> "arbitrary").  All other operands use constant index maps
# so they are DMA'd exactly once.
#
#   refs: x (B,D) f32 | w1a block (D,KB) i8 | w1b block (KB,H2) i8 |
#         w2 (D,H2) i8 | packed (3, H1+2*H2) f32 = [gamma; beta; scale]
#   out:  (B,H2) f32
#   scratch: acc (B,H2) f32 (branch-1 layer-2 pre-activation),
#            h2s (B,H2) f32 (branch-2 activation)
# ----------------------------------------------------------------------------
def _fused_text_tf_kernel(x_ref, w1a_ref, w1b_ref, w2_ref, pp_ref,
                          o_ref, acc_ref, h2s_ref):
    k = pl.program_id(0)
    nk = pl.num_programs(0)
    kb = w1a_ref.shape[1]
    H2 = o_ref.shape[1]
    H1 = pp_ref.shape[1] - 2 * H2

    x_bf16 = x_ref[...].astype(jnp.bfloat16)

    def bn_lrelu(y, gamma, beta):
        # Training-mode BatchNorm1d (batch mean, biased variance) + LeakyReLU.
        mean = jnp.mean(y, axis=0, keepdims=True)
        var = jnp.mean(jnp.square(y - mean), axis=0, keepdims=True)
        z = (y - mean) * jax.lax.rsqrt(var + BN_EPS) * gamma + beta
        return jnp.where(z >= 0.0, z, LRELU_SLOPE * z)

    @pl.when(k == 0)
    def _init():
        acc_ref[...] = jnp.zeros_like(acc_ref)
        # Branch 2 (D -> 1024), computed once at step 0 so its int8->bf16
        # cast + matmul hide under the step-1 weight DMA.
        g2 = pp_ref[0:1, H1 + H2:H1 + 2 * H2]
        b2 = pp_ref[1:2, H1 + H2:H1 + 2 * H2]
        s2 = pp_ref[2:3, H1 + H2:H1 + 2 * H2]
        y2 = jnp.dot(x_bf16, w2_ref[...].astype(jnp.bfloat16),
                     preferred_element_type=jnp.float32) * s2
        h2s_ref[...] = bn_lrelu(y2, g2, b2)

    # Branch 1, layer 1a: feature block [k*kb, (k+1)*kb).  BN is per-feature
    # over the batch, so it is exactly blockwise along this axis.
    col = pl.multiple_of(k * kb, kb)
    p1a = pp_ref[:, pl.ds(col, kb)]            # (3, kb): [gamma; beta; scale]
    y1a = jnp.dot(x_bf16, w1a_ref[...].astype(jnp.bfloat16),
                  preferred_element_type=jnp.float32) * p1a[2:3, :]
    h1a = bn_lrelu(y1a, p1a[0:1, :], p1a[1:2, :])

    # Accumulate layer-1b pre-activation.  w1b's per-output-channel scale is
    # constant across K blocks, so it factors out and is applied at finalize.
    acc_ref[...] += jnp.dot(h1a.astype(jnp.bfloat16),
                            w1b_ref[...].astype(jnp.bfloat16),
                            preferred_element_type=jnp.float32)

    @pl.when(k == nk - 1)
    def _finalize():
        g1b = pp_ref[0:1, H1:H1 + H2]
        b1b = pp_ref[1:2, H1:H1 + H2]
        s1b = pp_ref[2:3, H1:H1 + H2]
        h1 = bn_lrelu(acc_ref[...] * s1b, g1b, b1b)

        # cat(..., -1) + adaptive_max_pool1d(., 1) over the size-2 fusion axis
        # == elementwise max of the two branches; then per-row L2 normalize.
        m = jnp.maximum(h1, h2s_ref[...])
        ssq = jnp.sum(m * m, axis=-1, keepdims=True)
        o_ref[...] = m * jax.lax.rsqrt(ssq + NORM_EPS)


def text_simple_tf_forward(feature, params, *, kb=1024):
    # feature: (B, original_dim, 1)  ->  squeeze(-1)
    x = feature[..., 0]
    B, D = x.shape
    H1 = params["w1a_q"].shape[1]    # 4096
    H2 = params["w1b_q"].shape[1]    # 1024
    assert H1 % kb == 0
    nk = H1 // kb

    # Advisory cost: dominated by int8 weight streaming (~5.25 MiB at D=256).
    weight_bytes = D * H1 + H1 * H2 + D * H2                 # int8 -> 1 B/elem
    other_bytes = 4 * (B * D + 3 * (H1 + 2 * H2) + B * H2)
    ce = pl.CostEstimate(
        flops=2 * B * (D * H1 + H1 * H2 + D * H2),
        transcendentals=H1 + 2 * H2 + B,
        bytes_accessed=weight_bytes + other_bytes,
    )

    const = lambda k: (0, 0)
    return pl.pallas_call(
        _fused_text_tf_kernel,
        out_shape=jax.ShapeDtypeStruct((B, H2), jnp.float32),
        grid_spec=pltpu.PrefetchScalarGridSpec(
            num_scalar_prefetch=0,
            grid=(nk,),
            in_specs=[
                pl.BlockSpec((B, D), const),                  # x (loaded once)
                pl.BlockSpec((D, kb), lambda k: (0, k)),      # w1a block (i8)
                pl.BlockSpec((kb, H2), lambda k: (k, 0)),     # w1b block (i8)
                pl.BlockSpec((D, H2), const),                 # w2 (i8, once)
                pl.BlockSpec((3, H1 + 2 * H2), const),        # packed g/b/scale
            ],
            out_specs=pl.BlockSpec((B, H2), const),
            scratch_shapes=[
                pltpu.VMEM((B, H2), jnp.float32),             # branch-1 acc
                pltpu.VMEM((B, H2), jnp.float32),             # branch-2 act
            ],
        ),
        compiler_params=pltpu.CompilerParams(
            dimension_semantics=("arbitrary",),               # reduction axis
            vmem_limit_bytes=24 * 1024 * 1024,
        ),
        cost_estimate=ce,
    )(x, params["w1a_q"], params["w1b_q"], params["w2_q"], params["packed"])


# ----------------------------------------------------------------------------
# Parameter construction: int8 per-output-channel weight quantization, and all
# BN gamma/beta + weight scales packed into one (3, H1 + 2*H2) f32 array:
#   columns [0, H1)        -> layer 1a   (rows: gamma, beta, w1a scale)
#   columns [H1, H1+H2)    -> layer 1b
#   columns [H1+H2, end)   -> layer 2
# ----------------------------------------------------------------------------
def init_params(key, original_dim, h1=4096, h2=1024):
    ks = jax.random.split(key, 9)

    def lin_w(kw, din, dout):
        return jax.random.normal(kw, (din, dout), jnp.float32) * 0.02

    def quantize(w):
        amax = jnp.max(jnp.abs(w), axis=0)
        scale = jnp.maximum(amax, 1e-8) / 127.0
        wq = jnp.clip(jnp.round(w / scale[None, :]), -127, 127).astype(jnp.int8)
        return wq, scale

    def bn(kg, kb_, dout):
        g = 1.0 + 0.1 * jax.random.normal(kg, (dout,), jnp.float32)
        b = 0.1 * jax.random.normal(kb_, (dout,), jnp.float32)
        return g, b

    # Linear biases omitted on purpose: training-mode BN's batch-mean
    # subtraction cancels a constant per-feature bias exactly.
    w1a_q, s1a = quantize(lin_w(ks[0], original_dim, h1))
    w1b_q, s1b = quantize(lin_w(ks[1], h1, h2))
    w2_q, s2 = quantize(lin_w(ks[2], original_dim, h2))
    g1a, b1a = bn(ks[3], ks[4], h1)
    g1b, b1b = bn(ks[5], ks[6], h2)
    g2, b2 = bn(ks[7], ks[8], h2)

    packed = jnp.concatenate(
        [jnp.stack([g1a, b1a, s1a], axis=0),
         jnp.stack([g1b, b1b, s1b], axis=0),
         jnp.stack([g2, b2, s2], axis=0)], axis=1)   # (3, h1 + 2*h2)

    return {"w1a_q": w1a_q, "w1b_q": w1b_q, "w2_q": w2_q, "packed": packed}


# ----------------------------------------------------------------------------
# Pure-JAX reference (f32, dequantized weights) for a sanity check.
# ----------------------------------------------------------------------------
def _reference(feature, params):
    x = feature[..., 0].astype(jnp.float32)
    H1 = params["w1a_q"].shape[1]
    H2 = params["w1b_q"].shape[1]
    pp = params["packed"]

    def deq(wq, s):
        return wq.astype(jnp.float32) * s[None, :]

    def bn_lrelu(y, g, b):
        m = jnp.mean(y, axis=0, keepdims=True)
        v = jnp.var(y, axis=0, keepdims=True)
        z = (y - m) / jnp.sqrt(v + BN_EPS) * g + b
        return jnp.where(z >= 0.0, z, LRELU_SLOPE * z)

    g1a, b1a, s1a = pp[0, :H1], pp[1, :H1], pp[2, :H1]
    g1b, b1b, s1b = pp[0, H1:H1 + H2], pp[1, H1:H1 + H2], pp[2, H1:H1 + H2]
    g2, b2, s2 = pp[0, H1 + H2:], pp[1, H1 + H2:], pp[2, H1 + H2:]

    h1 = bn_lrelu(x @ deq(params["w1a_q"], s1a), g1a, b1a)
    h1 = bn_lrelu(h1 @ deq(params["w1b_q"], s1b), g1b, b1b)
    h2 = bn_lrelu(x @ deq(params["w2_q"], s2), g2, b2)
    m = jnp.maximum(h1, h2)
    return m / jnp.linalg.norm(m, axis=-1, keepdims=True)


if __name__ == "__main__":
    key = jax.random.PRNGKey(0)
    k_in, k_par = jax.random.split(key)

    B = 8
    ORIGINAL_DIM = 256
    feature = jax.random.normal(k_in, (B, ORIGINAL_DIM, 1), jnp.float32)

    params = init_params(k_par, ORIGINAL_DIM)

    out = jax.block_until_ready(text_simple_tf_forward(feature, params))

    assert out.shape == (B, 1024), out.shape
    # rows are unit-norm
    norms = jnp.linalg.norm(out, axis=-1)
    assert bool(jnp.all(jnp.abs(norms - 1.0) < 1e-3)), norms
    # matches the f32 reference (bf16 activation rounding is the only error)
    ref = _reference(feature, params)
    max_err = float(jnp.max(jnp.abs(out - ref)))
    assert max_err < 2e-2, max_err

    print("KERNEL_OK")
</pallas_src>

<mosaic_0001>
module attributes {stable_mosaic.version = 11 : i64} {
  func.func @_fused_text_tf_kernel(%arg0: i32, %arg1: memref<8x256xf32, #tpu.memory_space<vmem>>, %arg2: memref<256x1024xi8, #tpu.memory_space<vmem>>, %arg3: memref<1024x1024xi8, #tpu.memory_space<vmem>>, %arg4: memref<256x1024xi8, #tpu.memory_space<vmem>>, %arg5: memref<3x6144xf32, #tpu.memory_space<vmem>>, %arg6: memref<8x1024xf32, #tpu.memory_space<vmem>>, %arg7: memref<8x1024xf32, #tpu.memory_space<vmem>>, %arg8: memref<8x1024xf32, #tpu.memory_space<vmem>>) attributes {dimension_semantics = [#tpu.dimension_semantics<arbitrary>], iteration_bounds = array<i64: 4>, scalar_prefetch = 0 : i64, scratch_operands = 2 : i64, tpu.core_type = #tpu.core_type<tc>, window_params = [{pipeline_mode = #tpu.pipeline_mode<synchronous>, transform_indices = @transform_0, window_bounds = array<i64: 8, 256>}, {transform_indices = @transform_1, window_bounds = array<i64: 256, 1024>}, {transform_indices = @transform_2, window_bounds = array<i64: 1024, 1024>}, {pipeline_mode = #tpu.pipeline_mode<synchronous>, transform_indices = @transform_3, window_bounds = array<i64: 256, 1024>}, {pipeline_mode = #tpu.pipeline_mode<synchronous>, transform_indices = @transform_4, window_bounds = array<i64: 3, 6144>}, {pipeline_mode = #tpu.pipeline_mode<synchronous>, transform_indices = @transform_5, window_bounds = array<i64: 8, 1024>}]} {
    %c0 = arith.constant 0 : index
    %c0_0 = arith.constant 0 : index
    %0 = vector.load %arg1[%c0, %c0_0] : memref<8x256xf32, #tpu.memory_space<vmem>>, vector<8x256xf32>
    %1 = arith.truncf %0 : vector<8x256xf32> to vector<8x256xbf16>
    %c0_i32 = arith.constant 0 : i32
    %2 = arith.cmpi eq, %arg0, %c0_i32 : i32
    %3 = arith.extui %2 : i1 to i32
    %c0_i32_1 = arith.constant 0 : i32
    %4 = arith.cmpi ne, %3, %c0_i32_1 : i32
    scf.if %4 {
      %cst_20 = arith.constant 0.000000e+00 : f32
      %54 = vector.broadcast %cst_20 : f32 to vector<8x1024xf32>
      %c0_21 = arith.constant 0 : index
      %c0_22 = arith.constant 0 : index
      %55 = vector.load %arg7[%c0_21, %c0_22] : memref<8x1024xf32, #tpu.memory_space<vmem>>, vector<8x1024xf32>
      tpu.vector_store %arg7[%c0_21, %c0_22], %54 {strides = array<i32>} : memref<8x1024xf32, #tpu.memory_space<vmem>>, vector<8x1024xf32>,
      %c0_23 = arith.constant 0 : index
      %c5120 = arith.constant 5120 : index
      %56 = vector.load %arg5[%c0_23, %c5120] : memref<3x6144xf32, #tpu.memory_space<vmem>>, vector<1x1024xf32>
      %c1 = arith.constant 1 : index
      %c5120_24 = arith.constant 5120 : index
      %57 = vector.load %arg5[%c1, %c5120_24] : memref<3x6144xf32, #tpu.memory_space<vmem>>, vector<1x1024xf32>
      %c2 = arith.constant 2 : index
      %c5120_25 = arith.constant 5120 : index
      %58 = vector.load %arg5[%c2, %c5120_25] : memref<3x6144xf32, #tpu.memory_space<vmem>>, vector<1x1024xf32>
      %c0_26 = arith.constant 0 : index
      %c0_27 = arith.constant 0 : index
      %59 = vector.load %arg4[%c0_26, %c0_27] : memref<256x1024xi8, #tpu.memory_space<vmem>>, vector<256x1024xi8>
      %60 = arith.sitofp %59 : vector<256x1024xi8> to vector<256x1024xbf16>
      %cst_28 = arith.constant dense<0.000000e+00> : vector<8x1024xf32>
      %61 = tpu.matmul %1, %60, %cst_28 {dimension_numbers = #tpu.dot_dimension_numbers<[1], [0], [0], [1], [0, 0, 1, 1], [], []>} : vector<8x256xbf16>, vector<256x1024xbf16>, vector<8x1024xf32> -> vector<8x1024xf32>
      %62 = vector.broadcast %58 : vector<1x1024xf32> to vector<8x1024xf32>
      %63 = arith.mulf %61, %62 : vector<8x1024xf32>
      %cst_29 = arith.constant dense<0.000000e+00> : vector<1024xf32>
      %64 = vector.multi_reduction <add>, %63, %cst_29 [0] : vector<8x1024xf32> to vector<1024xf32>
      %65 = vector.shape_cast %64 : vector<1024xf32> to vector<1x1024xf32>
      %cst_30 = arith.constant 8.000000e+00 : f32
      %66 = vector.broadcast %cst_30 : f32 to vector<1x1024xf32>
      %67 = arith.divf %65, %66 : vector<1x1024xf32>
      %68 = vector.broadcast %67 : vector<1x1024xf32> to vector<8x1024xf32>
      %69 = arith.subf %63, %68 : vector<8x1024xf32>
      %70 = arith.mulf %69, %69 : vector<8x1024xf32>
      %cst_31 = arith.constant dense<0.000000e+00> : vector<1024xf32>
      %71 = vector.multi_reduction <add>, %70, %cst_31 [0] : vector<8x1024xf32> to vector<1024xf32>
      %72 = vector.shape_cast %71 : vector<1024xf32> to vector<1x1024xf32>
      %cst_32 = arith.constant 8.000000e+00 : f32
      %73 = vector.broadcast %cst_32 : f32 to vector<1x1024xf32>
      %74 = arith.divf %72, %73 : vector<1x1024xf32>
      %75 = vector.broadcast %67 : vector<1x1024xf32> to vector<8x1024xf32>
      %76 = arith.subf %63, %75 : vector<8x1024xf32>
      %cst_33 = arith.constant 9.99999974E-6 : f32
      %77 = vector.broadcast %cst_33 : f32 to vector<1x1024xf32>
      %78 = arith.addf %74, %77 : vector<1x1024xf32>
      %79 = math.rsqrt %78 : vector<1x1024xf32>
      %80 = vector.broadcast %79 : vector<1x1024xf32> to vector<8x1024xf32>
      %81 = arith.mulf %76, %80 : vector<8x1024xf32>
      %82 = vector.broadcast %56 : vector<1x1024xf32> to vector<8x1024xf32>
      %83 = arith.mulf %81, %82 : vector<8x1024xf32>
      %84 = vector.broadcast %57 : vector<1x1024xf32> to vector<8x1024xf32>
      %85 = arith.addf %83, %84 : vector<8x1024xf32>
      %cst_34 = arith.constant 0.000000e+00 : f32
      %86 = vector.broadcast %cst_34 : f32 to vector<8x1024xf32>
      %87 = arith.cmpf oge, %85, %86 : vector<8x1024xf32>
      %cst_35 = arith.constant 0.00999999977 : f32
      %88 = vector.broadcast %cst_35 : f32 to vector<8x1024xf32>
      %89 = arith.mulf %88, %85 : vector<8x1024xf32>
      %90 = arith.select %87, %85, %89 : vector<8x1024xi1>, vector<8x1024xf32>
      %c0_36 = arith.constant 0 : index
      %c0_37 = arith.constant 0 : index
      %91 = vector.load %arg8[%c0_36, %c0_37] : memref<8x1024xf32, #tpu.memory_space<vmem>>, vector<8x1024xf32>
      tpu.vector_store %arg8[%c0_36, %c0_37], %90 {strides = array<i32>} : memref<8x1024xf32, #tpu.memory_space<vmem>>, vector<8x1024xf32>,
    } else {
    }
    %c1024_i32 = arith.constant 1024 : i32
    %5 = arith.muli %arg0, %c1024_i32 : i32
    %6 = tpu.assume_multiple %5, 1024 : i32
    %c0_2 = arith.constant 0 : index
    %7 = arith.index_cast %6 : i32 to index
    %8 = vector.load %arg5[%c0_2, %7] : memref<3x6144xf32, #tpu.memory_space<vmem>>, vector<3x1024xf32>
    %c0_3 = arith.constant 0 : index
    %c0_4 = arith.constant 0 : index
    %9 = vector.load %arg2[%c0_3, %c0_4] : memref<256x1024xi8, #tpu.memory_space<vmem>>, vector<256x1024xi8>
    %10 = arith.sitofp %9 : vector<256x1024xi8> to vector<256x1024xbf16>
    %cst = arith.constant dense<0.000000e+00> : vector<8x1024xf32>
    %11 = tpu.matmul %1, %10, %cst {dimension_numbers = #tpu.dot_dimension_numbers<[1], [0], [0], [1], [0, 0, 1, 1], [], []>} : vector<8x256xbf16>, vector<256x1024xbf16>, vector<8x1024xf32> -> vector<8x1024xf32>
    %12 = vector.extract_strided_slice %8 {offsets = [2, 0], sizes = [1, 1024], strides = [1, 1]} : vector<3x1024xf32> to vector<1x1024xf32>
    %13 = vector.broadcast %12 : vector<1x1024xf32> to vector<8x1024xf32>
    %14 = arith.mulf %11, %13 : vector<8x1024xf32>
    %15 = vector.extract_strided_slice %8 {offsets = [0, 0], sizes = [1, 1024], strides = [1, 1]} : vector<3x1024xf32> to vector<1x1024xf32>
    %16 = vector.extract_strided_slice %8 {offsets = [1, 0], sizes = [1, 1024], strides = [1, 1]} : vector<3x1024xf32> to vector<1x1024xf32>
    %cst_5 = arith.constant dense<0.000000e+00> : vector<1024xf32>
    %17 = vector.multi_reduction <add>, %14, %cst_5 [0] : vector<8x1024xf32> to vector<1024xf32>
    %18 = vector.shape_cast %17 : vector<1024xf32> to vector<1x1024xf32>
    %cst_6 = arith.constant 8.000000e+00 : f32
    %19 = vector.broadcast %cst_6 : f32 to vector<1x1024xf32>
    %20 = arith.divf %18, %19 : vector<1x1024xf32>
    %21 = vector.broadcast %20 : vector<1x1024xf32> to vector<8x1024xf32>
    %22 = arith.subf %14, %21 : vector<8x1024xf32>
    %23 = arith.mulf %22, %22 : vector<8x1024xf32>
    %cst_7 = arith.constant dense<0.000000e+00> : vector<1024xf32>
    %24 = vector.multi_reduction <add>, %23, %cst_7 [0] : vector<8x1024xf32> to vector<1024xf32>
    %25 = vector.shape_cast %24 : vector<1024xf32> to vector<1x1024xf32>
    %cst_8 = arith.constant 8.000000e+00 : f32
    %26 = vector.broadcast %cst_8 : f32 to vector<1x1024xf32>
    %27 = arith.divf %25, %26 : vector<1x1024xf32>
    %28 = vector.broadcast %20 : vector<1x1024xf32> to vector<8x1024xf32>
    %29 = arith.subf %14, %28 : vector<8x1024xf32>
    %cst_9 = arith.constant 9.99999974E-6 : f32
    %30 = vector.broadcast %cst_9 : f32 to vector<1x1024xf32>
    %31 = arith.addf %27, %30 : vector<1x1024xf32>
    %32 = math.rsqrt %31 : vector<1x1024xf32>
    %33 = vector.broadcast %32 : vector<1x1024xf32> to vector<8x1024xf32>
    %34 = arith.mulf %29, %33 : vector<8x1024xf32>
    %35 = vector.broadcast %15 : vector<1x1024xf32> to vector<8x1024xf32>
    %36 = arith.mulf %34, %35 : vector<8x1024xf32>
    %37 = vector.broadcast %16 : vector<1x1024xf32> to vector<8x1024xf32>
    %38 = arith.addf %36, %37 : vector<8x1024xf32>
    %cst_10 = arith.constant 0.000000e+00 : f32
    %39 = vector.broadcast %cst_10 : f32 to vector<8x1024xf32>
    %40 = arith.cmpf oge, %38, %39 : vector<8x1024xf32>
    %cst_11 = arith.constant 0.00999999977 : f32
    %41 = vector.broadcast %cst_11 : f32 to vector<8x1024xf32>
    %42 = arith.mulf %41, %38 : vector<8x1024xf32>
    %43 = arith.select %40, %38, %42 : vector<8x1024xi1>, vector<8x1024xf32>
    %c0_12 = arith.constant 0 : index
    %c0_13 = arith.constant 0 : index
    %44 = vector.load %arg7[%c0_12, %c0_13] : memref<8x1024xf32, #tpu.memory_space<vmem>>, vector<8x1024xf32>
    %45 = arith.truncf %43 : vector<8x1024xf32> to vector<8x1024xbf16>
    %c0_14 = arith.constant 0 : index
    %c0_15 = arith.constant 0 : index
    %46 = vector.load %arg3[%c0_14, %c0_15] : memref<1024x1024xi8, #tpu.memory_space<vmem>>, vector<1024x1024xi8>
    %47 = arith.sitofp %46 : vector<1024x1024xi8> to vector<1024x1024xbf16>
    %cst_16 = arith.constant dense<0.000000e+00> : vector<8x1024xf32>
    %48 = tpu.matmul %45, %47, %cst_16 {dimension_numbers = #tpu.dot_dimension_numbers<[1], [0], [0], [1], [0, 0, 1, 1], [], []>} : vector<8x1024xbf16>, vector<1024x1024xbf16>, vector<8x1024xf32> -> vector<8x1024xf32>
    %49 = arith.addf %44, %48 : vector<8x1024xf32>
    %c0_17 = arith.constant 0 : index
    %c0_18 = arith.constant 0 : index
    %50 = vector.load %arg7[%c0_17, %c0_18] : memref<8x1024xf32, #tpu.memory_space<vmem>>, vector<8x1024xf32>
    tpu.vector_store %arg7[%c0_17, %c0_18], %49 {strides = array<i32>} : memref<8x1024xf32, #tpu.memory_space<vmem>>, vector<8x1024xf32>,
    %c3_i32 = arith.constant 3 : i32
    %51 = arith.cmpi eq, %arg0, %c3_i32 : i32
    %52 = arith.extui %51 : i1 to i32
    %c0_i32_19 = arith.constant 0 : i32
    %53 = arith.cmpi ne, %52, %c0_i32_19 : i32
    scf.if %53 {
      %c0_20 = arith.constant 0 : index
      %c4096 = arith.constant 4096 : index
      %54 = vector.load %arg5[%c0_20, %c4096] : memref<3x6144xf32, #tpu.memory_space<vmem>>, vector<1x1024xf32>
      %c1 = arith.constant 1 : index
      %c4096_21 = arith.constant 4096 : index
      %55 = vector.load %arg5[%c1, %c4096_21] : memref<3x6144xf32, #tpu.memory_space<vmem>>, vector<1x1024xf32>
      %c2 = arith.constant 2 : index
      %c4096_22 = arith.constant 4096 : index
      %56 = vector.load %arg5[%c2, %c4096_22] : memref<3x6144xf32, #tpu.memory_space<vmem>>, vector<1x1024xf32>
      %c0_23 = arith.constant 0 : index
      %c0_24 = arith.constant 0 : index
      %57 = vector.load %arg7[%c0_23, %c0_24] : memref<8x1024xf32, #tpu.memory_space<vmem>>, vector<8x1024xf32>
      %58 = vector.broadcast %56 : vector<1x1024xf32> to vector<8x1024xf32>
      %59 = arith.mulf %57, %58 : vector<8x1024xf32>
      %cst_25 = arith.constant dense<0.000000e+00> : vector<1024xf32>
      %60 = vector.multi_reduction <add>, %59, %cst_25 [0] : vector<8x1024xf32> to vector<1024xf32>
      %61 = vector.shape_cast %60 : vector<1024xf32> to vector<1x1024xf32>
      %cst_26 = arith.constant 8.000000e+00 : f32
      %62 = vector.broadcast %cst_26 : f32 to vector<1x1024xf32>
      %63 = arith.divf %61, %62 : vector<1x1024xf32>
      %64 = vector.broadcast %63 : vector<1x1024xf32> to vector<8x1024xf32>
      %65 = arith.subf %59, %64 : vector<8x1024xf32>
      %66 = arith.mulf %65, %65 : vector<8x1024xf32>
      %cst_27 = arith.constant dense<0.000000e+00> : vector<1024xf32>
      %67 = vector.multi_reduction <add>, %66, %cst_27 [0] : vector<8x1024xf32> to vector<1024xf32>
      %68 = vector.shape_cast %67 : vector<1024xf32> to vector<1x1024xf32>
      %cst_28 = arith.constant 8.000000e+00 : f32
      %69 = vector.broadcast %cst_28 : f32 to vector<1x1024xf32>
      %70 = arith.divf %68, %69 : vector<1x1024xf32>
      %71 = vector.broadcast %63 : vector<1x1024xf32> to vector<8x1024xf32>
      %72 = arith.subf %59, %71 : vector<8x1024xf32>
      %cst_29 = arith.constant 9.99999974E-6 : f32
      %73 = vector.broadcast %cst_29 : f32 to vector<1x1024xf32>
      %74 = arith.addf %70, %73 : vector<1x1024xf32>
      %75 = math.rsqrt %74 : vector<1x1024xf32>
      %76 = vector.broadcast %75 : vector<1x1024xf32> to vector<8x1024xf32>
      %77 = arith.mulf %72, %76 : vector<8x1024xf32>
      %78 = vector.broadcast %54 : vector<1x1024xf32> to vector<8x1024xf32>
      %79 = arith.mulf %77, %78 : vector<8x1024xf32>
      %80 = vector.broadcast %55 : vector<1x1024xf32> to vector<8x1024xf32>
      %81 = arith.addf %79, %80 : vector<8x1024xf32>
      %cst_30 = arith.constant 0.000000e+00 : f32
      %82 = vector.broadcast %cst_30 : f32 to vector<8x1024xf32>
      %83 = arith.cmpf oge, %81, %82 : vector<8x1024xf32>
      %cst_31 = arith.constant 0.00999999977 : f32
      %84 = vector.broadcast %cst_31 : f32 to vector<8x1024xf32>
      %85 = arith.mulf %84, %81 : vector<8x1024xf32>
      %86 = arith.select %83, %81, %85 : vector<8x1024xi1>, vector<8x1024xf32>
      %c0_32 = arith.constant 0 : index
      %c0_33 = arith.constant 0 : index
      %87 = vector.load %arg8[%c0_32, %c0_33] : memref<8x1024xf32, #tpu.memory_space<vmem>>, vector<8x1024xf32>
      %88 = arith.maximumf %86, %87 : vector<8x1024xf32>
      %89 = arith.mulf %88, %88 : vector<8x1024xf32>
      %cst_34 = arith.constant dense<0.000000e+00> : vector<8xf32>
      %90 = vector.multi_reduction <add>, %89, %cst_34 [1] : vector<8x1024xf32> to vector<8xf32>
      %91 = vector.shape_cast %90 : vector<8xf32> to vector<8x1xf32>
      %cst_35 = arith.constant 9.99999996E-13 : f32
      %92 = vector.broadcast %cst_35 : f32 to vector<8x1xf32>
      %93 = arith.addf %91, %92 : vector<8x1xf32>
      %94 = math.rsqrt %93 : vector<8x1xf32>
      %95 = vector.broadcast %94 : vector<8x1xf32> to vector<8x1024xf32>
      %96 = arith.mulf %88, %95 : vector<8x1024xf32>
      %c0_36 = arith.constant 0 : index
      %c0_37 = arith.constant 0 : index
      %97 = vector.load %arg6[%c0_36, %c0_37] : memref<8x1024xf32, #tpu.memory_space<vmem>>, vector<8x1024xf32>
      tpu.vector_store %arg6[%c0_36, %c0_37], %96 {strides = array<i32>} : memref<8x1024xf32, #tpu.memory_space<vmem>>, vector<8x1024xf32>,
    } else {
    }
    return
  }
  func.func @transform_0(%arg0: i32) -> (i32, i32) {
    %c0_i32 = arith.constant 0 : i32
    %c0_i32_0 = arith.constant 0 : i32
    %c0_i32_1 = arith.constant 0 : i32
    return %c0_i32, %c0_i32_0 : i32, i32
  }
  func.func @transform_1(%arg0: i32) -> (i32, i32) {
    %c0_i32 = arith.constant 0 : i32
    %c0_i32_0 = arith.constant 0 : i32
    return %c0_i32, %arg0 : i32, i32
  }
  func.func @transform_2(%arg0: i32) -> (i32, i32) {
    %c0_i32 = arith.constant 0 : i32
    %c0_i32_0 = arith.constant 0 : i32
    return %arg0, %c0_i32 : i32, i32
  }
  func.func @transform_3(%arg0: i32) -> (i32, i32) {
    %c0_i32 = arith.constant 0 : i32
    %c0_i32_0 = arith.constant 0 : i32
    %c0_i32_1 = arith.constant 0 : i32
    return %c0_i32, %c0_i32_0 : i32, i32
  }
  func.func @transform_4(%arg0: i32) -> (i32, i32) {
    %c0_i32 = arith.constant 0 : i32
    %c0_i32_0 = arith.constant 0 : i32
    %c0_i32_1 = arith.constant 0 : i32
    return %c0_i32, %c0_i32_0 : i32, i32
  }
  func.func @transform_5(%arg0: i32) -> (i32, i32) {
    %c0_i32 = arith.constant 0 : i32
    %c0_i32_0 = arith.constant 0 : i32
    %c0_i32_1 = arith.constant 0 : i32
    return %c0_i32, %c0_i32_0 : i32, i32
  }
}

</mosaic_0001>

<bundles_post_ra>
// kernel: tpu_custom_call.1
= control target key start
LH: loop header
LB: loop body
LE: loop exit
PB: predicated region body
PF: predicated region fallthrough
CT: control target
= control target key end

     0   :  { %s5222_s0 = inlined_call_operand.hbm [shape: f32[8,256], index: 0, kind: input, shape index: {}]   ;;  %s5223_s1 = inlined_call_operand.hbm [shape: s8[256,4096], index: 1, kind: input, shape index: {}]   ;;  %s5224_s2 = inlined_call_operand.hbm [shape: s8[4096,1024], index: 2, kind: input, shape index: {}]   ;;  %s5225_s3 = inlined_call_operand.hbm [shape: s8[256,1024], index: 3, kind: input, shape index: {}]   ;;  %s5226_s4 = inlined_call_operand.hbm [shape: f32[3,6144], index: 4, kind: input, shape index: {}]   ;;  %s5227_s5 = inlined_call_operand.hbm [shape: f32[8,1024], index: 5, kind: output, shape index: {}]  }
   0x1   :  { %5237 = sst [smem:[#allocation19_spill]] %s5223_s1 }
   0x2   :  { %5238 = sst [smem:[#allocation20_spill]] %s5225_s3 }
   0x3   :  { %10 = vsyncpa [#allocation5], 0 }
   0x4   :  { %11 = vsyncpa [#allocation8], 0 }
   0x5   :  { %13 = vsyncpa [#allocation8 + $0x1], 0 }
   0x6   :  { %14 = vsyncpa [#allocation11], 0 }
   0x7   :  { %15 = vsyncpa [#allocation6], 0  ;;  %s4189_s18 = smov 0   ;;  %s4191_s19 = smov 0  }
   0x8   :  { %s4193_s20 = smov 0   ;;  %s4195_s21 = smov 0  }
   0x9 LB: > { %s4208_s22 = sadd.s32 4294967295, %s4147_s21   ;;  %s4211_s23 = sadd.s32 1, %s4147_s21   ;;  %s4147_s21 = sphi %s4195_s21, %s5265_s21   ;;  %s4143_s20 = sphi %s4193_s20, %s5264_s20   ;;  %s4139_s19 = sphi %s4191_s19, %s5263_s19   ;;  %s4135_s18 = sphi %s4189_s18, %s5262_s18  }
   0xa   : > { %s46_s24 = ssub.s32 %s4147_s21, %s4211_s23  ;;  %s49_s25 = sadd.s32 1, %s4143_s20 }
   0xb   : > { %p47_p0 = scmp.eq.s32.totalorder %s46_s24, 0  ;;  %p56_p1 = scmp.ne.s32.totalorder %s4143_s20, %s4139_s19 }
   0xc   : > { %p57_p2 = scmp.eq.s32.totalorder %s4147_s21, 0  ;;  %p62_p3 = scmp.ne.s32.totalorder %s4139_s19, %s4135_s18 }
   0xd   : > { %s4221_s26 = scalar_select %p47_p0, %s4143_s20, %s49_s25  }
   0xe   : > { %p4223_p4 = por %p57_p2, %p56_p1  ;;  %p5228_p5 = scmp.eq.s32.totalorder %s4208_s22, 0 }
   0xf   : > { %5239 = sst [smem:[#allocation18_spill]] %s4221_s26  ;;  %p3766_p6 = scmp.ge.s32.totalorder %s4147_s21, 1 }
  0x10   : > { %p162_p7 = scmp.lt.s32.totalorder %s4147_s21, 5  ;;  %p4232_p8 = por %p5228_p5, %p62_p3 }
  0x11   : > { %s4149_s30 = smov [#allocation10]   ;;  %p3835_p13 = scmp.lt.s32.totalorder %s4147_s21, 4 }
  0x12   : > { %s5241_s28 = scalar_select %p4232_p8, 1, 0 }
  0x13   : > { %p4237_p10 = pnand %p3766_p6, %p162_p7  ;;  %s185_s6 = sshll.u32 %s4149_s30, 4  ;;  %s186_s6 = int_to_ptr.vmem [resolvable:$true] %s185_s6 }
  0x14   : > { %s210_s8 = sand.u32 1, %s4147_s21   ;;  %s5234_s9 = sand.u32 1, %s4143_s20  }
  0x15   : > { %s5242_s29 = scalar_select %p4237_p10, 1, 0 }
  0x16   : > { %p3815_p11 = pneg %p4237_p10  ;;  %p4254_p0 = pnand %p3835_p13, %p4223_p4 }
  0x17   : > { %s5245_s3 = sld [smem:[#allocation20_spill]] }
  0x18   : > { %p4245_p12 = pnand %p3815_p11, %p5228_p5 }
  0x19   : > { %s5244_s10 = scalar_select %p4254_p0, 1, 0 }
  0x1a   : > { %s5243_s7 = scalar_select %p4245_p12, 1, 0 }
  0x1b   : > { %p4266_p2 = pneg %p4245_p12 }
  0x1d   : > { %s3931_s13 = scalar_lea.hbm %s5245_s3, 8192 }
  0x1e   : > { %p3932_p1 = scmp.ne.s32.totalorder %s5245_s3, %s3931_s13  ;;  %p3938_p6 = scmp.lt.u32.totalorder %s3931_s13, %s5245_s3 }
  0x20   : > { %p3934_p3 = pnand %p4266_p2, %p3932_p1 }
  0x22   : > { %p3935_p4 = pneg %p3934_p3 }
  0x24   : > { %p3940_p7 = pnand %p3938_p6, %p3935_p4 }
  0x26   : > { %3943 = shalt.err (!%p3940_p7)
}
  0x27   : > { %s3944_s24 = scalar_lea.vmem %s186_s6, 8192  ;;  %p3952_p5 = scmp.lt.s32.totalorder %s186_s6, %s186_s6 }
  0x28   : > { %p3945_p11 = scmp.ne.s32.totalorder %s186_s6, %s3944_s24  ;;  %p3953_p8 = scmp.lt.s32.totalorder %s3944_s24, %s3944_s24 }
  0x2a   : > { %p3947_p13 = pnand %p3945_p11, %p4266_p2  ;;  %p3954_p10 = por %p3953_p8, %p3952_p5 }
  0x2c   : > { %p3948_p9 = pneg %p3947_p13 }
  0x2e   : > { %p3955_p0 = pnand %p3954_p10, %p3948_p9 }
  0x30   : > { %3958 = shalt.err (!%p3955_p0)
}
  0x31   : > { %s4150_s25 = smov 1024   ;;  %s4151_s27 = smov 64  }
  0x32   : > { %3821 = dma.hbm_to_vmem [thread:$0]  (!%p4245_p12), %s5245_s3, 8192, %s186_s6, [#allocation11], %s4150_s25, %s4150_s25, %s4151_s27  }
  0x33   : > { %s3771_s12 = sshll.u32 %s5234_s9, 9  ;;  %s3792_s13 = sshll.u32 %s4147_s21, 10 }
  0x34   : > { %s5247_s1 = sld [smem:[#allocation19_spill]]  ;;  %s214_s18 = scalar_lea.vmem [#allocation7], %s3771_s12 }
  0x35   : > { %s221_s24 = sshll.u32 %s214_s18, 4  ;;  %s4295_s26 = scalar_lea.sflag [#allocation8], %s210_s8  ;;  %s4293_s24 = int_to_ptr.vmem [resolvable:$true] %s221_s24 }
  0x36   : > { %p5248_p8 = scmp.ne.s32.totalorder %s5244_s10, 0 }
  0x38   : > { %p5235_p9 = pneg %p5248_p8 }
  0x3a   : > { %s4291_s17 = scalar_lea.hbm %s5247_s1, %s3792_s13  ;;  %s3964_s13 = scalar_lea.hbm %s5247_s1, 32768 }
  0x3b   : > { %s3959_s30 = scalar_lea.hbm %s4291_s17, 8192  ;;  %p3965_p1 = scmp.lt.u32.totalorder %s4291_s17, %s5247_s1 }
  0x3c   : > { %p3960_p5 = scmp.ne.s32.totalorder %s4291_s17, %s3959_s30  ;;  %p3966_p3 = scmp.lt.u32.totalorder %s3964_s13, %s3959_s30 }
  0x3d   : > { %p3968_p6 = scmp.lt.u32.totalorder %s3959_s30, %s4291_s17 }
  0x3e   : > { %p3962_p10 = pnand %p5235_p9, %p3960_p5  ;;  %p3967_p4 = por %p3966_p3, %p3965_p1 }
  0x40   : > { %p3963_p0 = pneg %p3962_p10  ;;  %p3969_p7 = por %p3968_p6, %p3967_p4 }
  0x42   : > { %p3970_p11 = pnand %p3969_p7, %p3963_p0 }
  0x44   : > { %3973 = shalt.err (!%p3970_p11)
}
  0x45   : > { %s3974_s8 = scalar_lea.vmem %s4293_s24, 8192  ;;  %s4152_s12 = smov [#allocation7]  }
  0x46   : > { %p3975_p13 = scmp.ne.s32.totalorder %s4293_s24, %s3974_s8  ;;  %s3979_s18 = sshll.u32 %s4152_s12, 4  ;;  %s3980_s18 = int_to_ptr.vmem [resolvable:$false] %s3979_s18 }
  0x47   : > { %s3981_s6 = scalar_lea.vmem %s3980_s18, 16384  ;;  %p3982_p12 = scmp.lt.s32.totalorder %s4293_s24, %s3980_s18 }
  0x48   : > { %p3977_p5 = pnand %p3975_p13, %p5235_p9  ;;  %p3983_p1 = scmp.lt.s32.totalorder %s3981_s6, %s3974_s8 }
  0x4a   : > { %p3978_p10 = pneg %p3977_p5  ;;  %p3984_p3 = por %p3983_p1, %p3982_p12 }
  0x4c   : > { %p3985_p4 = pnand %p3984_p3, %p3978_p10 }
  0x4e   : > { %3988 = shalt.err (!%p3985_p4)
}
  0x4f   : > { %s4153_s30 = smov 4096   ;;  %s4154_s11 = smov [#allocation4]  }
  0x50   : > { %3828 = dma.hbm_to_vmem [thread:$0]  (!%p5248_p8), %s4291_s17, 8192, %s4293_s24, %s4295_s26, %s4153_s30, %s4150_s25, %s4151_s27  }
  0x51   : > { %s175_s13 = sshll.u32 %s4154_s11, 4  ;;  %s4155_s14 = smov [#allocation12]   ;;  %s176_s13 = int_to_ptr.vmem [resolvable:$true] %s175_s13 }
  0x52   : > { %s199_s15 = sshll.u32 %s4155_s14, 4  ;;  %s3989_s18 = scalar_lea.hbm %s5222_s0, 256  ;;  %s200_s15 = int_to_ptr.vmem [resolvable:$true] %s199_s15 }
  0x53   : > { %p3990_p12 = scmp.ne.s32.totalorder %s5222_s0, %s3989_s18  ;;  %p3996_p7 = scmp.lt.u32.totalorder %s3989_s18, %s5222_s0 }
  0x55   : > { %p3992_p0 = pnand %p3990_p12, %p4266_p2 }
  0x57   : > { %p3993_p6 = pneg %p3992_p0 }
  0x59   : > { %p3998_p11 = pnand %p3996_p7, %p3993_p6 }
  0x5b   : > { %4001 = shalt.err (!%p3998_p11)
}
  0x5c   : > { %s4002_s17 = scalar_lea.vmem %s176_s13, 256  ;;  %p4010_p1 = scmp.lt.s32.totalorder %s176_s13, %s176_s13 }
  0x5d   : > { %p4003_p13 = scmp.ne.s32.totalorder %s176_s13, %s4002_s17  ;;  %p4011_p3 = scmp.lt.s32.totalorder %s4002_s17, %s4002_s17 }
  0x5f   : > { %p4005_p5 = pnand %p4003_p13, %p4266_p2  ;;  %p4012_p4 = por %p4011_p3, %p4010_p1 }
  0x61   : > { %p4006_p10 = pneg %p4005_p5 }
  0x63   : > { %p4013_p9 = pnand %p4012_p4, %p4006_p10 }
  0x65   : > { %4016 = shalt.err (!%p4013_p9)
}
  0x66   : > { %p5249_p12 = scmp.ne.s32.totalorder %s5243_s7, 0  ;;  %s5250_s1 = sand.u32 1, %s4143_s20  }
  0x67   : > { %s3774_s3 = sshll.u32 %s5250_s1, 11  ;;  %s4017_s14 = scalar_lea.hbm %s5226_s4, 3072 }
  0x68   : > { %3818 = dma.hbm_to_vmem [thread:$0]  (!%p5249_p12), %s5222_s0, 256, %s176_s13, [#allocation5]  }
  0x69   : > { %p4018_p0 = scmp.ne.s32.totalorder %s5226_s4, %s4017_s14  ;;  %p4024_p7 = scmp.lt.u32.totalorder %s4017_s14, %s5226_s4 }
  0x6b   : > { %p4020_p9 = pnand %p4018_p0, %p4266_p2 }
  0x6d   : > { %p4021_p6 = pneg %p4020_p9 }
  0x6f   : > { %p4026_p11 = pnand %p4024_p7, %p4021_p6 }
  0x71   : > { %4029 = shalt.err (!%p4026_p11)
}
  0x72   : > { %s4030_s13 = scalar_lea.vmem %s200_s15, 3072  ;;  %p4038_p1 = scmp.lt.s32.totalorder %s200_s15, %s200_s15 }
  0x73   : > { %p4031_p13 = scmp.ne.s32.totalorder %s200_s15, %s4030_s13  ;;  %p4039_p3 = scmp.lt.s32.totalorder %s4030_s13, %s4030_s13 }
  0x75   : > { %p4033_p5 = pnand %p4031_p13, %p4266_p2  ;;  %p4040_p4 = por %p4039_p3, %p4038_p1 }
  0x77   : > { %p4034_p10 = pneg %p4033_p5 }
  0x79   : > { %p4041_p8 = pnand %p4040_p4, %p4034_p10 }
  0x7b   : > { %4044 = shalt.err (!%p4041_p8)
}
  0x7c   : > { %3824 = dma.hbm_to_vmem [thread:$0]  (!%p5249_p12), %s5226_s4, 3072, %s200_s15, [#allocation11]  }
  0x7d   : > { %s3794_s24 = sshll.u32 %s4147_s21, 15  ;;  %s235_s11 = scalar_lea.vmem [#allocation9], %s3774_s3 }
  0x7e   : > { %s4367_s16 = scalar_lea.hbm %s5224_s2, %s3794_s24  ;;  %s243_s14 = sshll.u32 %s235_s11, 4  ;;  %s4369_s14 = int_to_ptr.vmem [resolvable:$true] %s243_s14 }
  0x7f   : > { %s4045_s7 = scalar_lea.hbm %s4367_s16, 32768  ;;  %p5251_p8 = scmp.ne.s32.totalorder %s5244_s10, 0 }
  0x80   : > { %p4046_p2 = scmp.ne.s32.totalorder %s4367_s16, %s4045_s7  ;;  %s4050_s12 = scalar_lea.hbm %s5224_s2, 131072 }
  0x81   : > { %p5252_p0 = pneg %p5251_p8  ;;  %p4051_p6 = scmp.lt.u32.totalorder %s4367_s16, %s5224_s2 }
  0x82   : > { %p4052_p7 = scmp.lt.u32.totalorder %s4050_s12, %s4045_s7  ;;  %p4054_p13 = scmp.lt.u32.totalorder %s4045_s7, %s4367_s16 }
  0x83   : > { %p4048_p9 = pnand %p4046_p2, %p5252_p0 }
  0x84   : > { %p4053_p11 = por %p4052_p7, %p4051_p6 }
  0x85   : > { %p4049_p12 = pneg %p4048_p9 }
  0x86   : > { %p4055_p5 = por %p4054_p13, %p4053_p11 }
  0x88   : > { %p4056_p10 = pnand %p4055_p5, %p4049_p12 }
  0x8a   : > { %4059 = shalt.err (!%p4056_p10)
}
  0x8b   : > { %s4060_s3 = scalar_lea.vmem %s4369_s14, 32768  ;;  %p5253_p3 = pmov %p5252_p0 }
  0x8c   : > { %p4061_p1 = scmp.ne.s32.totalorder %s4369_s14, %s4060_s3  ;;  %s4156_s6 = smov [#allocation9]  }
  0x8d   : > { %s4065_s13 = sshll.u32 %s4156_s6, 4  ;;  %s4066_s13 = int_to_ptr.vmem [resolvable:$false] %s4065_s13 }
  0x8e   : > { %p4063_p4 = pnand %p4061_p1, %p5253_p3  ;;  %s4067_s17 = scalar_lea.vmem %s4066_s13, 65536 }
  0x8f   : > { %p4068_p0 = scmp.lt.s32.totalorder %s4369_s14, %s4066_s13  ;;  %p4069_p9 = scmp.lt.s32.totalorder %s4067_s17, %s4060_s3 }
  0x90   : > { %p4064_p2 = pneg %p4063_p4 }
  0x91   : > { %p4070_p6 = por %p4069_p9, %p4068_p0 }
  0x93   : > { %p4071_p7 = pnand %p4070_p6, %p4064_p2 }
  0x95   : > { %4074 = shalt.err (!%p4071_p7)
}
  0x96   : > { %3831 = dma.hbm_to_vmem [thread:$0]  (!%p5251_p8), %s4367_s16, 32768, %s4369_s14, %s4295_s26, %s4150_s25, %s4150_s25, %s4151_s27  }
  0x97   : > { %p5254_p12 = scmp.ne.s32.totalorder %s5242_s29, 0 }
  0x98   : > { %p5255_p11 = scmp.eq.s32.totalorder (!%p5254_p12), %s4208_s22, 0 }
  0x99   : > { %255 = sbr.rel (%p5254_p12) target bundleno = 1841 (0x731), region = 40 }
  0xa0   : > { %4118 = dma.done.wait (%p5255_p11), [#allocation5], 256   ;;  %p5256_p13 = pmov %p5255_p11 }
  0xa1   : > { %s261_s10 = sand.u32 1, %s4208_s22   ;;  %s263_s9 = sand.u32 1, %s4139_s19  }
  0xa2   : > { %4120 = vsyncadd (%p5256_p13), [#allocation5], 4294967040  ;;  %s3780_s24 = sshll.u32 %s263_s9, 9  ;;  %s262_s1 = scalar_lea.sflag [#allocation8], %s261_s10 }
  0xa3   : > { %s4406_s30 = scalar_lea.vmem [#allocation7], %s3780_s24  ;;  %p5257_p5 = scmp.ne.s32.totalorder %s5241_s28, 0 }
  0xa5   : > { %4122 = dma.done.wait (%p5257_p5), %s262_s1, 40960  }
  0xa6   : > { %4124 = vsyncadd (%p5257_p5), %s262_s1, 4294926336  ;;  %s3781_s26 = sshll.u32 %s263_s9, 11  ;;  %p5258_p8 = pmov %p5255_p11 }
  0xa7   : > { %s4412_s29 = scalar_lea.vmem [#allocation9], %s3781_s26 }
  0xa8   : > { %4126 = dma.done.wait (%p5258_p8), [#allocation11], 11264   ;;  %p5259_p10 = pmov %p5258_p8 }
  0xa9   : > { %v311_v0 = vld [vmem:[#allocation4] sm:$0xff]  ;;  %v312_v1 = vld [vmem:[#allocation4 + $0x8] sm:$0xff]  ;;  %p5260_p1 = scmp.ne.s32.totalorder %s4208_s22, 0 }
  0xaa   : > { %4128 = vsyncadd (%p5259_p10), [#allocation11], 4294956032  ;;  %v4418_v2 = vpack.c.bf16 %v311_v0, %v311_v0  ;;  %v4420_v3 = vpack.c.bf16 %v312_v1, %v312_v1  ;;  %v334_v4 = vld [vmem:[#allocation10 + $0x8] sm:$0xff] (!%p5260_p1)  ;;  %v336_v5 = vld [vmem:[#allocation10 + $0x18] sm:$0xff] (!%p5260_p1)  ;;  %v4157_v7 = vmov (!%p5260_p1), 0.0  }
  0xab   : > { %318 = sbr.rel (%p5260_p1) target bundleno = 573 (0x23d), region = 64  ;;  %v333_v6 = vld [vmem:[#allocation10] sm:$0xff] (!%p5260_p1)  ;;  %319 = vst [vmem:[#allocation2] sm:$0xff] (!%p5260_p1), %v4157_v7  ;;  %320 = vst [vmem:[#allocation2 + $0x8] sm:$0xff] (!%p5260_p1), %v4157_v7  ;;  %v398_v8 = vunpack.c.l.s8.bf16 (!%p5260_p1), %v334_v4  ;;  %v406_v9 = vunpack.c.h.s8.bf16 (!%p5260_p1), %v334_v4  ;;  %v400_v10 = vunpack.c.l.s8.bf16 (!%p5260_p1), %v336_v5  ;;  %v408_v11 = vunpack.c.h.s8.bf16 (!%p5260_p1), %v336_v5  ;;  %v335_v12 = vld [vmem:[#allocation10 + $0x10] sm:$0xff] (!%p5260_p1) }
  0xac   : > { %557 = vmatprep.mubr.bf16.mxu0 (!%p5260_p1), %v4420_v3  ;;  %598 = vmatprep.mubr.bf16.mxu1 (!%p5260_p1), %v4420_v3  ;;  %321 = vst [vmem:[#allocation2 + $0x10] sm:$0xff] (!%p5260_p1), %v4157_v7  ;;  %322 = vst [vmem:[#allocation2 + $0x18] sm:$0xff] (!%p5260_p1), %v4157_v7  ;;  %v397_v13 = vunpack.c.l.s8.bf16 (!%p5260_p1), %v333_v6  ;;  %v399_v14 = vunpack.c.l.s8.bf16 (!%p5260_p1), %v335_v12  ;;  %v342_v15 = vld [vmem:[#allocation10 + $0x48] sm:$0xff] (!%p5260_p1)  ;;  %v344_v16 = vld [vmem:[#allocation10 + $0x58] sm:$0xff] (!%p5260_p1)  ;;  %v405_v17 = vunpack.c.h.s8.bf16 (!%p5260_p1), %v333_v6  ;;  %v407_v18 = vunpack.c.h.s8.bf16 (!%p5260_p1), %v335_v12 }
  0xad   : > { %323 = vst [vmem:[#allocation2 + $0x20] sm:$0xff] (!%p5260_p1), %v4157_v7  ;;  %324 = vst [vmem:[#allocation2 + $0x28] sm:$0xff] (!%p5260_p1), %v4157_v7  ;;  %525 = vmatprep.subr.bf16.mxu0 (!%p5260_p1), %v398_v8  ;;  %566 = vmatprep.subr.bf16.mxu1 (!%p5260_p1), %v400_v10  ;;  %v414_v19 = vunpack.c.l.s8.bf16 (!%p5260_p1), %v342_v15  ;;  %v416_v20 = vunpack.c.l.s8.bf16 (!%p5260_p1), %v344_v16  ;;  %v341_v21 = vld [vmem:[#allocation10 + $0x40] sm:$0xff] (!%p5260_p1)  ;;  %v343_v22 = vld [vmem:[#allocation10 + $0x50] sm:$0xff] (!%p5260_p1)  ;;  %v422_v25 = vunpack.c.h.s8.bf16 (!%p5260_p1), %v342_v15  ;;  %v424_v26 = vunpack.c.h.s8.bf16 (!%p5260_p1), %v344_v16 }
  0xae   : > { %325 = vst [vmem:[#allocation2 + $0x30] sm:$0xff] (!%p5260_p1), %v4157_v7  ;;  %326 = vst [vmem:[#allocation2 + $0x38] sm:$0xff] (!%p5260_p1), %v4157_v7  ;;  %526 = vmatpush1.bf16.msra.mxu0 (!%p5260_p1), %v397_v13  ;;  %567 = vmatpush1.bf16.msra.mxu1 (!%p5260_p1), %v399_v14  ;;  %v413_v23 = vunpack.c.l.s8.bf16 (!%p5260_p1), %v341_v21  ;;  %v415_v24 = vunpack.c.l.s8.bf16 (!%p5260_p1), %v343_v22  ;;  %v350_v27 = vld [vmem:[#allocation10 + $0x88] sm:$0xff] (!%p5260_p1)  ;;  %v352_v28 = vld [vmem:[#allocation10 + $0x98] sm:$0xff] (!%p5260_p1)  ;;  %v421_v29 = vunpack.c.h.s8.bf16 (!%p5260_p1), %v341_v21  ;;  %v423_v30 = vunpack.c.h.s8.bf16 (!%p5260_p1), %v343_v22 }
  0xaf   : > { %527 = vmatprep.subr.bf16.mxu0 (!%p5260_p1), %v406_v9  ;;  %568 = vmatprep.subr.bf16.mxu1 (!%p5260_p1), %v408_v11  ;;  %v430_v31 = vunpack.c.l.s8.bf16 (!%p5260_p1), %v350_v27  ;;  %v432_v32 = vunpack.c.l.s8.bf16 (!%p5260_p1), %v352_v28  ;;  %v349_v33 = vld [vmem:[#allocation10 + $0x80] sm:$0xff] (!%p5260_p1)  ;;  %v351_v34 = vld [vmem:[#allocation10 + $0x90] sm:$0xff] (!%p5260_p1)  ;;  %v438_v37 = vunpack.c.h.s8.bf16 (!%p5260_p1), %v350_v27  ;;  %v440_v38 = vunpack.c.h.s8.bf16 (!%p5260_p1), %v352_v28  ;;  %v358_v39 = vld [vmem:[#allocation10 + $0xc8] sm:$0xff] (!%p5260_p1) }
  0xb0   : > { %v429_v35 = vunpack.c.l.s8.bf16 (!%p5260_p1), %v349_v33  ;;  %v431_v36 = vunpack.c.l.s8.bf16 (!%p5260_p1), %v351_v34  ;;  %v360_v40 = vld [vmem:[#allocation10 + $0xd8] sm:$0xff] (!%p5260_p1)  ;;  %v437_v41 = vunpack.c.h.s8.bf16 (!%p5260_p1), %v349_v33  ;;  %v439_v42 = vunpack.c.h.s8.bf16 (!%p5260_p1), %v351_v34  ;;  %v357_v45 = vld [vmem:[#allocation10 + $0xc0] sm:$0xff] (!%p5260_p1)  ;;  %v359_v46 = vld [vmem:[#allocation10 + $0xd0] sm:$0xff] (!%p5260_p1) }
  0xb1   : > { %v446_v43 = vunpack.c.l.s8.bf16 (!%p5260_p1), %v358_v39  ;;  %v448_v44 = vunpack.c.l.s8.bf16 (!%p5260_p1), %v360_v40  ;;  %v445_v47 = vunpack.c.l.s8.bf16 (!%p5260_p1), %v357_v45  ;;  %v447_v48 = vunpack.c.l.s8.bf16 (!%p5260_p1), %v359_v46  ;;  %v366_v51 = vld [vmem:[#allocation10 + $0x108] sm:$0xff] (!%p5260_p1)  ;;  %v368_v52 = vld [vmem:[#allocation10 + $0x118] sm:$0xff] (!%p5260_p1)  ;;  %v365_v57 = vld [vmem:[#allocation10 + $0x100] sm:$0xff] (!%p5260_p1) }
  0xb2   : > { %528 = vmatpush1.bf16.msra.mxu0 %v405_v17  ;;  %569 = vmatpush1.bf16.msra.mxu1 %v407_v18  ;;  %v454_v49 = vunpack.c.h.s8.bf16 %v358_v39  ;;  %v456_v50 = vunpack.c.h.s8.bf16 %v360_v40  ;;  %v453_v53 = vunpack.c.h.s8.bf16 %v357_v45  ;;  %v455_v54 = vunpack.c.h.s8.bf16 %v359_v46  ;;  %v367_v58 = vld [vmem:[#allocation10 + $0x110] sm:$0xff]  ;;  %v374_v63 = vld [vmem:[#allocation10 + $0x148] sm:$0xff]  ;;  %v376_v0 = vld [vmem:[#allocation10 + $0x158] sm:$0xff] }
  0xb3   : > { %529 = vmatprep.subr.bf16.mxu0 %v414_v19  ;;  %570 = vmatprep.subr.bf16.mxu1 %v416_v20  ;;  %v462_v55 = vunpack.c.l.s8.bf16 %v366_v51  ;;  %v464_v56 = vunpack.c.l.s8.bf16 %v368_v52  ;;  %v461_v59 = vunpack.c.l.s8.bf16 %v365_v57  ;;  %v463_v60 = vunpack.c.l.s8.bf16 %v367_v58  ;;  %v373_v7 = vld [vmem:[#allocation10 + $0x140] sm:$0xff]  ;;  %v375_v8 = vld [vmem:[#allocation10 + $0x150] sm:$0xff]  ;;  %v382_v13 = vld [vmem:[#allocation10 + $0x188] sm:$0xff] }
  0xb4   : > { %v470_v61 = vunpack.c.h.s8.bf16 %v366_v51  ;;  %v472_v62 = vunpack.c.h.s8.bf16 %v368_v52  ;;  %v469_v1 = vunpack.c.h.s8.bf16 %v365_v57  ;;  %v471_v4 = vunpack.c.h.s8.bf16 %v367_v58  ;;  %v384_v14 = vld [vmem:[#allocation10 + $0x198] sm:$0xff]  ;;  %v381_v19 = vld [vmem:[#allocation10 + $0x180] sm:$0xff]  ;;  %v383_v20 = vld [vmem:[#allocation10 + $0x190] sm:$0xff] }
  0xb5   : > { %v478_v5 = vunpack.c.l.s8.bf16 %v374_v63  ;;  %v480_v6 = vunpack.c.l.s8.bf16 %v376_v0  ;;  %v477_v9 = vunpack.c.l.s8.bf16 %v373_v7  ;;  %v479_v10 = vunpack.c.l.s8.bf16 %v375_v8 }
  0xb6   : > { %530 = vmatpush1.bf16.msra.mxu0 %v413_v23  ;;  %571 = vmatpush1.bf16.msra.mxu1 %v415_v24  ;;  %v486_v11 = vunpack.c.h.s8.bf16 %v374_v63  ;;  %v488_v12 = vunpack.c.h.s8.bf16 %v376_v0  ;;  %v485_v15 = vunpack.c.h.s8.bf16 %v373_v7  ;;  %v487_v16 = vunpack.c.h.s8.bf16 %v375_v8 }
  0xb7   : > { %531 = vmatprep.subr.bf16.mxu0 %v422_v25  ;;  %572 = vmatprep.subr.bf16.mxu1 %v424_v26  ;;  %v494_v17 = vunpack.c.l.s8.bf16 %v382_v13  ;;  %v496_v18 = vunpack.c.l.s8.bf16 %v384_v14  ;;  %v493_v21 = vunpack.c.l.s8.bf16 %v381_v19  ;;  %v495_v22 = vunpack.c.l.s8.bf16 %v383_v20  ;;  %v390_v25 = vld [vmem:[#allocation10 + $0x1c8] sm:$0xff]  ;;  %v392_v26 = vld [vmem:[#allocation10 + $0x1d8] sm:$0xff] }
  0xb8   : > { %v502_v23 = vunpack.c.h.s8.bf16 %v382_v13  ;;  %v504_v24 = vunpack.c.h.s8.bf16 %v384_v14  ;;  %v501_v27 = vunpack.c.h.s8.bf16 %v381_v19  ;;  %v503_v28 = vunpack.c.h.s8.bf16 %v383_v20 }
  0xba   : > { %532 = vmatpush1.bf16.msra.mxu0 %v421_v29  ;;  %573 = vmatpush1.bf16.msra.mxu1 %v423_v30  ;;  %v510_v29 = vunpack.c.l.s8.bf16 %v390_v25  ;;  %v512_v30 = vunpack.c.l.s8.bf16 %v392_v26 }
  0xbb   : > { %533 = vmatprep.subr.bf16.mxu0 %v430_v31  ;;  %574 = vmatprep.subr.bf16.mxu1 %v432_v32  ;;  %v389_v31 = vld [vmem:[#allocation10 + $0x1c0] sm:$0xff]  ;;  %v391_v32 = vld [vmem:[#allocation10 + $0x1d0] sm:$0xff] }
  0xbc   : > { %v509_v33 = vunpack.c.l.s8.bf16 %v389_v31  ;;  %v511_v34 = vunpack.c.l.s8.bf16 %v391_v32  ;;  %v517_v39 = vunpack.c.h.s8.bf16 %v389_v31  ;;  %v519_v40 = vunpack.c.h.s8.bf16 %v391_v32 }
  0xbe   : > { %534 = vmatpush1.bf16.msra.mxu0 %v429_v35  ;;  %575 = vmatpush1.bf16.msra.mxu1 %v431_v36  ;;  %v518_v35 = vunpack.c.h.s8.bf16 %v390_v25  ;;  %v520_v36 = vunpack.c.h.s8.bf16 %v392_v26 }
  0xbf   : > { %535 = vmatprep.subr.bf16.mxu0 %v438_v37  ;;  %576 = vmatprep.subr.bf16.mxu1 %v440_v38  ;;  %v338_v37 = vld [vmem:[#allocation10 + $0x28] sm:$0xff]  ;;  %v340_v38 = vld [vmem:[#allocation10 + $0x38] sm:$0xff] }
  0xc2   : > { %536 = vmatpush1.bf16.msra.mxu0 %v437_v41  ;;  %577 = vmatpush1.bf16.msra.mxu1 %v439_v42  ;;  %v402_v41 = vunpack.c.l.s8.bf16 %v338_v37  ;;  %v404_v42 = vunpack.c.l.s8.bf16 %v340_v38 }
  0xc3   : > { %537 = vmatprep.subr.bf16.mxu0 %v446_v43  ;;  %578 = vmatprep.subr.bf16.mxu1 %v448_v44  ;;  %v337_v43 = vld [vmem:[#allocation10 + $0x20] sm:$0xff]  ;;  %v339_v44 = vld [vmem:[#allocation10 + $0x30] sm:$0xff] }
  0xc4   : > { %v401_v45 = vunpack.c.l.s8.bf16 %v337_v43  ;;  %v403_v46 = vunpack.c.l.s8.bf16 %v339_v44  ;;  %v409_v51 = vunpack.c.h.s8.bf16 %v337_v43  ;;  %v411_v52 = vunpack.c.h.s8.bf16 %v339_v44 }
  0xc6   : > { %538 = vmatpush1.bf16.msra.mxu0 %v445_v47  ;;  %579 = vmatpush1.bf16.msra.mxu1 %v447_v48  ;;  %v410_v47 = vunpack.c.h.s8.bf16 %v338_v37  ;;  %v412_v48 = vunpack.c.h.s8.bf16 %v340_v38 }
  0xc7   : > { %539 = vmatprep.subr.bf16.mxu0 %v454_v49  ;;  %580 = vmatprep.subr.bf16.mxu1 %v456_v50  ;;  %v346_v49 = vld [vmem:[#allocation10 + $0x68] sm:$0xff]  ;;  %v348_v50 = vld [vmem:[#allocation10 + $0x78] sm:$0xff] }
  0xca   : > { %540 = vmatpush1.bf16.msra.mxu0 %v453_v53  ;;  %581 = vmatpush1.bf16.msra.mxu1 %v455_v54  ;;  %v418_v53 = vunpack.c.l.s8.bf16 %v346_v49  ;;  %v420_v54 = vunpack.c.l.s8.bf16 %v348_v50 }
  0xcb   : > { %541 = vmatprep.subr.bf16.mxu0 %v462_v55  ;;  %582 = vmatprep.subr.bf16.mxu1 %v464_v56  ;;  %v345_v55 = vld [vmem:[#allocation10 + $0x60] sm:$0xff]  ;;  %v347_v56 = vld [vmem:[#allocation10 + $0x70] sm:$0xff] }
  0xcc   : > { %v417_v57 = vunpack.c.l.s8.bf16 %v345_v55  ;;  %v419_v58 = vunpack.c.l.s8.bf16 %v347_v56  ;;  %v425_v63 = vunpack.c.h.s8.bf16 %v345_v55  ;;  %v427_v0 = vunpack.c.h.s8.bf16 %v347_v56 }
  0xce   : > { %542 = vmatpush1.bf16.msra.mxu0 %v461_v59  ;;  %583 = vmatpush1.bf16.msra.mxu1 %v463_v60  ;;  %v426_v59 = vunpack.c.h.s8.bf16 %v346_v49  ;;  %v428_v60 = vunpack.c.h.s8.bf16 %v348_v50 }
  0xcf   : > { %543 = vmatprep.subr.bf16.mxu0 %v470_v61  ;;  %584 = vmatprep.subr.bf16.mxu1 %v472_v62  ;;  %v354_v61 = vld [vmem:[#allocation10 + $0xa8] sm:$0xff]  ;;  %v356_v62 = vld [vmem:[#allocation10 + $0xb8] sm:$0xff] }
  0xd2   : > { %544 = vmatpush1.bf16.msra.mxu0 %v469_v1  ;;  %585 = vmatpush1.bf16.msra.mxu1 %v471_v4  ;;  %v434_v1 = vunpack.c.l.s8.bf16 %v354_v61  ;;  %v436_v4 = vunpack.c.l.s8.bf16 %v356_v62 }
  0xd3   : > { %545 = vmatprep.subr.bf16.mxu0 %v478_v5  ;;  %586 = vmatprep.subr.bf16.mxu1 %v480_v6  ;;  %v353_v5 = vld [vmem:[#allocation10 + $0xa0] sm:$0xff]  ;;  %v355_v6 = vld [vmem:[#allocation10 + $0xb0] sm:$0xff] }
  0xd4   : > { %v433_v7 = vunpack.c.l.s8.bf16 %v353_v5  ;;  %v435_v8 = vunpack.c.l.s8.bf16 %v355_v6  ;;  %v441_v13 = vunpack.c.h.s8.bf16 %v353_v5  ;;  %v443_v14 = vunpack.c.h.s8.bf16 %v355_v6 }
  0xd6   : > { %546 = vmatpush1.bf16.msra.mxu0 %v477_v9  ;;  %587 = vmatpush1.bf16.msra.mxu1 %v479_v10  ;;  %v442_v9 = vunpack.c.h.s8.bf16 %v354_v61  ;;  %v444_v10 = vunpack.c.h.s8.bf16 %v356_v62 }
  0xd7   : > { %547 = vmatprep.subr.bf16.mxu0 %v486_v11  ;;  %588 = vmatprep.subr.bf16.mxu1 %v488_v12  ;;  %v362_v11 = vld [vmem:[#allocation10 + $0xe8] sm:$0xff]  ;;  %v364_v12 = vld [vmem:[#allocation10 + $0xf8] sm:$0xff] }
  0xda   : > { %548 = vmatpush1.bf16.msra.mxu0 %v485_v15  ;;  %589 = vmatpush1.bf16.msra.mxu1 %v487_v16  ;;  %v450_v15 = vunpack.c.l.s8.bf16 %v362_v11  ;;  %v452_v16 = vunpack.c.l.s8.bf16 %v364_v12 }
  0xdb   : > { %549 = vmatprep.subr.bf16.mxu0 %v494_v17  ;;  %590 = vmatprep.subr.bf16.mxu1 %v496_v18  ;;  %v361_v17 = vld [vmem:[#allocation10 + $0xe0] sm:$0xff]  ;;  %v363_v18 = vld [vmem:[#allocation10 + $0xf0] sm:$0xff] }
  0xdc   : > { %v449_v19 = vunpack.c.l.s8.bf16 %v361_v17  ;;  %v451_v20 = vunpack.c.l.s8.bf16 %v363_v18  ;;  %v457_v25 = vunpack.c.h.s8.bf16 %v361_v17  ;;  %v459_v26 = vunpack.c.h.s8.bf16 %v363_v18 }
  0xde   : > { %550 = vmatpush1.bf16.msra.mxu0 %v493_v21  ;;  %591 = vmatpush1.bf16.msra.mxu1 %v495_v22  ;;  %v458_v21 = vunpack.c.h.s8.bf16 %v362_v11  ;;  %v460_v22 = vunpack.c.h.s8.bf16 %v364_v12  ;;  %v690_v11 = vlaneseq }
  0xdf   : > { %551 = vmatprep.subr.bf16.mxu0 %v502_v23  ;;  %592 = vmatprep.subr.bf16.mxu1 %v504_v24  ;;  %v370_v23 = vld [vmem:[#allocation10 + $0x128] sm:$0xff]  ;;  %v372_v24 = vld [vmem:[#allocation10 + $0x138] sm:$0xff] }
  0xe0   : > { %v4432_v12 = vshrl.u32 %v690_v11, 7 }
  0xe2   : > { %552 = vmatpush1.bf16.msra.mxu0 %v501_v27  ;;  %593 = vmatpush1.bf16.msra.mxu1 %v503_v28  ;;  %v466_v27 = vunpack.c.l.s8.bf16 %v370_v23  ;;  %v468_v28 = vunpack.c.l.s8.bf16 %v372_v24  ;;  %v4446_v17 = vsub.s32 3, %v4432_v12 }
  0xe3   : > { %553 = vmatprep.subr.bf16.mxu0 %v510_v29  ;;  %594 = vmatprep.subr.bf16.mxu1 %v512_v30  ;;  %v369_v29 = vld [vmem:[#allocation10 + $0x120] sm:$0xff]  ;;  %v371_v30 = vld [vmem:[#allocation10 + $0x130] sm:$0xff] }
  0xe4   : > { %v465_v31 = vunpack.c.l.s8.bf16 %v369_v29  ;;  %v467_v32 = vunpack.c.l.s8.bf16 %v371_v30  ;;  %v473_v37 = vunpack.c.h.s8.bf16 %v369_v29  ;;  %v475_v38 = vunpack.c.h.s8.bf16 %v371_v30 }
  0xe6   : > { %554 = vmatpush1.bf16.msra.mxu0 %v509_v33  ;;  %595 = vmatpush1.bf16.msra.mxu1 %v511_v34  ;;  %v474_v33 = vunpack.c.h.s8.bf16 %v370_v23  ;;  %v476_v34 = vunpack.c.h.s8.bf16 %v372_v24 }
  0xe7   : > { %555 = vmatprep.subr.bf16.mxu0 %v518_v35  ;;  %596 = vmatprep.subr.bf16.mxu1 %v520_v36  ;;  %v378_v35 = vld [vmem:[#allocation10 + $0x168] sm:$0xff]  ;;  %v380_v36 = vld [vmem:[#allocation10 + $0x178] sm:$0xff] }
  0xea   : > { %556 = vmatpush1.bf16.msra.mxu0 %v517_v39  ;;  %597 = vmatpush1.bf16.msra.mxu1 %v519_v40  ;;  %v482_v39 = vunpack.c.l.s8.bf16 %v378_v35  ;;  %v484_v40 = vunpack.c.l.s8.bf16 %v380_v36 }
  0xeb   : > { %607 = vmatprep.subr.bf16.mxu0 %v402_v41  ;;  %648 = vmatprep.subr.bf16.mxu1 %v404_v42  ;;  %v377_v41 = vld [vmem:[#allocation10 + $0x160] sm:$0xff]  ;;  %v379_v42 = vld [vmem:[#allocation10 + $0x170] sm:$0xff] }
  0xec   : > { %v481_v43 = vunpack.c.l.s8.bf16 %v377_v41  ;;  %v483_v44 = vunpack.c.l.s8.bf16 %v379_v42  ;;  %v489_v49 = vunpack.c.h.s8.bf16 %v377_v41  ;;  %v491_v50 = vunpack.c.h.s8.bf16 %v379_v42 }
  0xed   : > { %558 = vmatmul.mubr.bf16.vlgmr.msra.gmra.mrb[0].mxu0 %v4418_v2  ;;  %599 = vmatmul.mubr.bf16.vlgmr.msra.gmra.mrb[0].mxu1 %v4418_v2 }
  0xee   : > { %608 = vmatpush1.bf16.msra.mxu0 %v401_v45  ;;  %649 = vmatpush1.bf16.msra.mxu1 %v403_v46  ;;  %v490_v45 = vunpack.c.h.s8.bf16 %v378_v35  ;;  %v492_v46 = vunpack.c.h.s8.bf16 %v380_v36 }
  0xef   : > { %609 = vmatprep.subr.bf16.mxu0 %v410_v47  ;;  %650 = vmatprep.subr.bf16.mxu1 %v412_v48  ;;  %v386_v47 = vld [vmem:[#allocation10 + $0x1a8] sm:$0xff]  ;;  %v388_v48 = vld [vmem:[#allocation10 + $0x1b8] sm:$0xff] }
  0xf0   : > { %639 = vmatprep.mubr.bf16.mxu0 %v4420_v3  ;;  %680 = vmatprep.mubr.bf16.mxu1 %v4420_v3 }
  0xf2   : > { %610 = vmatpush1.bf16.msra.mxu0 %v409_v51  ;;  %651 = vmatpush1.bf16.msra.mxu1 %v411_v52  ;;  %v498_v51 = vunpack.c.l.s8.bf16 %v386_v47  ;;  %v500_v52 = vunpack.c.l.s8.bf16 %v388_v48 }
  0xf3   : > { %611 = vmatprep.subr.bf16.mxu0 %v418_v53  ;;  %652 = vmatprep.subr.bf16.mxu1 %v420_v54  ;;  %v385_v53 = vld [vmem:[#allocation10 + $0x1a0] sm:$0xff]  ;;  %v387_v54 = vld [vmem:[#allocation10 + $0x1b0] sm:$0xff] }
  0xf4   : > { %v497_v55 = vunpack.c.l.s8.bf16 %v385_v53  ;;  %v499_v56 = vunpack.c.l.s8.bf16 %v387_v54  ;;  %v505_v61 = vunpack.c.h.s8.bf16 %v385_v53  ;;  %v507_v62 = vunpack.c.h.s8.bf16 %v387_v54 }
  0xf6   : > { %612 = vmatpush1.bf16.msra.mxu0 %v417_v57  ;;  %653 = vmatpush1.bf16.msra.mxu1 %v419_v58  ;;  %v506_v57 = vunpack.c.h.s8.bf16 %v386_v47  ;;  %v508_v58 = vunpack.c.h.s8.bf16 %v388_v48 }
  0xf7   : > { %613 = vmatprep.subr.bf16.mxu0 %v426_v59  ;;  %654 = vmatprep.subr.bf16.mxu1 %v428_v60  ;;  %v394_v59 = vld [vmem:[#allocation10 + $0x1e8] sm:$0xff]  ;;  %v396_v60 = vld [vmem:[#allocation10 + $0x1f8] sm:$0xff] }
  0xfa   : > { %614 = vmatpush1.bf16.msra.mxu0 %v425_v63  ;;  %655 = vmatpush1.bf16.msra.mxu1 %v427_v0  ;;  %v514_v63 = vunpack.c.l.s8.bf16 %v394_v59  ;;  %v516_v0 = vunpack.c.l.s8.bf16 %v396_v60 }
  0xfb   : > { %615 = vmatprep.subr.bf16.mxu0 %v434_v1  ;;  %656 = vmatprep.subr.bf16.mxu1 %v436_v4  ;;  %v393_v1 = vld [vmem:[#allocation10 + $0x1e0] sm:$0xff]  ;;  %v395_v4 = vld [vmem:[#allocation10 + $0x1f0] sm:$0xff] }
  0xfc   : > { %v513_v5 = vunpack.c.l.s8.bf16 %v393_v1  ;;  %v515_v6 = vunpack.c.l.s8.bf16 %v395_v4 }
  0xfe   : > { %616 = vmatpush1.bf16.msra.mxu0 %v433_v7  ;;  %657 = vmatpush1.bf16.msra.mxu1 %v435_v8  ;;  %v522_v7 = vunpack.c.h.s8.bf16 %v394_v59  ;;  %v524_v8 = vunpack.c.h.s8.bf16 %v396_v60 }
  0xff   : > { %617 = vmatprep.subr.bf16.mxu0 %v442_v9  ;;  %658 = vmatprep.subr.bf16.mxu1 %v444_v10  ;;  %v521_v9 = vunpack.c.h.s8.bf16 %v393_v1  ;;  %v523_v10 = vunpack.c.h.s8.bf16 %v395_v4 }
 0x102   : > { %618 = vmatpush1.bf16.msra.mxu0 %v441_v13  ;;  %659 = vmatpush1.bf16.msra.mxu1 %v443_v14  ;;  %v4435_v13 = vsub.s32 0, %v4432_v12  ;;  %v4438_v14 = vsub.s32 2, %v4432_v12 }
 0x103   : > { %619 = vmatprep.subr.bf16.mxu0 %v450_v15  ;;  %660 = vmatprep.subr.bf16.mxu1 %v452_v16  ;;  %v4440_v15 = vld [vmem:[#allocation12 + $0xa2] ss:$4 sm:$0xff]  ;;  %v4443_v16 = vsub.s32 1, %v4432_v12 }
 0x104   : > { %v693_v18 = vrot.slane %v4440_v15, %v4435_v13 }
 0x106   : > { %620 = vmatpush1.bf16.msra.mxu0 %v449_v19  ;;  %661 = vmatpush1.bf16.msra.mxu1 %v451_v20  ;;  %v701_v19 = vrot.slane %v4440_v15, %v4438_v14  ;;  %v697_v20 = vrot.slane %v4440_v15, %v4443_v16 }
 0x107   : > { %621 = vmatprep.subr.bf16.mxu0 %v458_v21  ;;  %662 = vmatprep.subr.bf16.mxu1 %v460_v22  ;;  %v705_v21 = vrot.slane %v4440_v15, %v4446_v17 }
 0x10a   : > { %622 = vmatpush1.bf16.msra.mxu0 %v457_v25  ;;  %663 = vmatpush1.bf16.msra.mxu1 %v459_v26 }
 0x10b   : > { %623 = vmatprep.subr.bf16.mxu0 %v466_v27  ;;  %664 = vmatprep.subr.bf16.mxu1 %v468_v28 }
 0x10e   : > { %624 = vmatpush1.bf16.msra.mxu0 %v465_v31  ;;  %665 = vmatpush1.bf16.msra.mxu1 %v467_v32 }
 0x10f   : > { %625 = vmatprep.subr.bf16.mxu0 %v474_v33  ;;  %666 = vmatprep.subr.bf16.mxu1 %v476_v34 }
 0x112   : > { %626 = vmatpush1.bf16.msra.mxu0 %v473_v37  ;;  %667 = vmatpush1.bf16.msra.mxu1 %v475_v38 }
 0x113   : > { %627 = vmatprep.subr.bf16.mxu0 %v482_v39  ;;  %668 = vmatprep.subr.bf16.mxu1 %v484_v40 }
 0x116   : > { %628 = vmatpush1.bf16.msra.mxu0 %v481_v43  ;;  %669 = vmatpush1.bf16.msra.mxu1 %v483_v44 }
 0x117   : > { %629 = vmatprep.subr.bf16.mxu0 %v490_v45  ;;  %670 = vmatprep.subr.bf16.mxu1 %v492_v46 }
 0x11a   : > { %630 = vmatpush1.bf16.msra.mxu0 %v489_v49  ;;  %671 = vmatpush1.bf16.msra.mxu1 %v491_v50 }
 0x11b   : > { %631 = vmatprep.subr.bf16.mxu0 %v498_v51  ;;  %672 = vmatprep.subr.bf16.mxu1 %v500_v52 }
 0x11e   : > { %632 = vmatpush1.bf16.msra.mxu0 %v497_v55  ;;  %673 = vmatpush1.bf16.msra.mxu1 %v499_v56 }
 0x11f   : > { %633 = vmatprep.subr.bf16.mxu0 %v506_v57  ;;  %674 = vmatprep.subr.bf16.mxu1 %v508_v58 }
 0x122   : > { %634 = vmatpush1.bf16.msra.mxu0 %v505_v61  ;;  %675 = vmatpush1.bf16.msra.mxu1 %v507_v62 }
 0x123   : > { %635 = vmatprep.subr.bf16.mxu0 %v514_v63  ;;  %676 = vmatprep.subr.bf16.mxu1 %v516_v0 }
 0x126   : > { %636 = vmatpush1.bf16.msra.mxu0 %v513_v5  ;;  %677 = vmatpush1.bf16.msra.mxu1 %v515_v6 }
 0x127   : > { %637 = vmatprep.subr.bf16.mxu0 %v522_v7  ;;  %678 = vmatprep.subr.bf16.mxu1 %v524_v8 }
 0x12a   : > { %638 = vmatpush1.bf16.msra.mxu0 %v521_v9  ;;  %679 = vmatpush1.bf16.msra.mxu1 %v523_v10 }
 0x12d   : > { %640 = vmatmul.mubr.bf16.vlgmr.msra.gmra.mrb[4].mxu0 %v4418_v2  ;;  %681 = vmatmul.mubr.bf16.vlgmr.msra.gmra.mrb[4].mxu1 %v4418_v2 }
 0x1c0   : > { %v559_v22 = vpop.f32.mrb[0].mxu0  ;;  %v600_v23 = vpop.f32.mrb[0].mxu1 }
 0x1c1   : > { %v730_v24 = vmul.f32 %v693_v18, %v559_v22  ;;  %v732_v25 = vmul.f32 %v701_v19, %v600_v23  ;;  %v561_v26 = vpop.f32.mrb[1].mxu0  ;;  %v602_v27 = vpop.f32.mrb[1].mxu1 }
 0x1c2   : > { %v731_v28 = vmul.f32 %v697_v20, %v561_v26  ;;  %v733_v29 = vmul.f32 %v705_v21, %v602_v27  ;;  %v563_v30 = vpop.f32.mrb[2].mxu0  ;;  %v604_v31 = vpop.f32.mrb[2].mxu1 }
 0x1c3   : > { %v738_v32 = vrot.slane %v730_v24, 4  ;;  %v750_v33 = vrot.slane %v732_v25, 4  ;;  %v564_v34 = vpop.f32.mrb[3].mxu0  ;;  %v605_v35 = vpop.f32.mrb[3].mxu1 }
 0x1c4   : > { %v744_v36 = vrot.slane %v731_v28, 4  ;;  %v756_v37 = vrot.slane %v733_v29, 4 }
 0x1c5   : > { %v739_v38 = vadd.f32 %v738_v32, %v730_v24  ;;  %v751_v39 = vadd.f32 %v750_v33, %v732_v25 }
 0x1c6   : > { %v745_v40 = vadd.f32 %v744_v36, %v731_v28  ;;  %v757_v41 = vadd.f32 %v756_v37, %v733_v29 }
 0x1c7   : > { %v740_v42 = vrot.slane %v739_v38, 2  ;;  %v752_v43 = vrot.slane %v751_v39, 2 }
 0x1c8   : > { %v746_v44 = vrot.slane %v745_v40, 2  ;;  %v758_v45 = vrot.slane %v757_v41, 2 }
 0x1c9   : > { %v741_v46 = vadd.f32 %v740_v42, %v739_v38  ;;  %v753_v47 = vadd.f32 %v752_v43, %v751_v39 }
 0x1ca   : > { %v747_v48 = vadd.f32 %v746_v44, %v745_v40  ;;  %v759_v49 = vadd.f32 %v758_v45, %v757_v41 }
 0x1cb   : > { %v742_v50 = vrot.slane %v741_v46, 1  ;;  %v754_v51 = vrot.slane %v753_v47, 1 }
 0x1cc   : > { %v748_v52 = vrot.slane %v747_v48, 1  ;;  %v760_v53 = vrot.slane %v759_v49, 1 }
 0x1cd   : > { %v743_v54 = vadd.f32 %v742_v50, %v741_v46  ;;  %v755_v55 = vadd.f32 %v754_v51, %v753_v47  ;;  %v4456_v46 = vld [vmem:[#allocation12 + $0xa0] ss:$4 sm:$0xff]  ;;  %v4458_v47 = vld [vmem:[#allocation12 + $0xa1] ss:$4 sm:$0xff] }
 0x1ce   : > { %v749_v56 = vadd.f32 %v748_v52, %v747_v48  ;;  %v761_v57 = vadd.f32 %v760_v53, %v759_v49  ;;  %v895_v48 = vrot.slane %v4456_v46, %v4435_v13  ;;  %v903_v50 = vrot.slane %v4456_v46, %v4438_v14 }
 0x1cf   : > { %v787_v58 = vmul.f32 0.125, %v743_v54  ;;  %v789_v59 = vmul.f32 0.125, %v755_v55  ;;  %v944_v53 = vrot.slane %v4458_v47, %v4435_v13  ;;  %v899_v54 = vrot.slane %v4456_v46, %v4443_v16 }
 0x1d0   : > { %v788_v60 = vmul.f32 0.125, %v749_v56  ;;  %v790_v61 = vmul.f32 0.125, %v761_v57  ;;  %v952_v57 = vrot.slane %v4458_v47, %v4438_v14  ;;  %v956_v13 = vrot.slane %v4458_v47, %v4446_v17 }
 0x1d1   : > { %v795_v62 = vsub.f32 %v730_v24, %v787_v58  ;;  %v797_v63 = vsub.f32 %v732_v25, %v789_v59  ;;  %v907_v58 = vrot.slane %v4456_v46, %v4446_v17 }
 0x1d2   : > { %v796_v0 = vsub.f32 %v731_v28, %v788_v60  ;;  %v798_v1 = vsub.f32 %v733_v29, %v790_v61 }
 0x1d3   : > { %v803_v4 = vmul.f32 %v795_v62, %v795_v62  ;;  %v805_v5 = vmul.f32 %v797_v63, %v797_v63 }
 0x1d4   : > { %v804_v6 = vmul.f32 %v796_v0, %v796_v0  ;;  %v806_v7 = vmul.f32 %v798_v1, %v798_v1 }
 0x1d5   : > { %v811_v8 = vrot.slane %v803_v4, 4  ;;  %v823_v9 = vrot.slane %v805_v5, 4 }
 0x1d6   : > { %v817_v10 = vrot.slane %v804_v6, 4  ;;  %v829_v11 = vrot.slane %v806_v7, 4 }
 0x1d7   : > { %v812_v18 = vadd.f32 %v811_v8, %v803_v4  ;;  %v824_v19 = vadd.f32 %v823_v9, %v805_v5 }
 0x1d8   : > { %v818_v20 = vadd.f32 %v817_v10, %v804_v6  ;;  %v830_v21 = vadd.f32 %v829_v11, %v806_v7 }
 0x1d9   : > { %v813_v22 = vrot.slane %v812_v18, 2  ;;  %v825_v23 = vrot.slane %v824_v19, 2 }
 0x1da   : > { %v819_v26 = vrot.slane %v818_v20, 2  ;;  %v831_v27 = vrot.slane %v830_v21, 2 }
 0x1db   : > { %v814_v24 = vadd.f32 %v813_v22, %v812_v18  ;;  %v826_v25 = vadd.f32 %v825_v23, %v824_v19  ;;  %v4480_v19 = vsub.s32 6, %v4432_v12  ;;  %v4486_v22 = vsub.s32 7, %v4432_v12 }
 0x1dc   : > { %v820_v28 = vadd.f32 %v819_v26, %v818_v20  ;;  %v832_v29 = vadd.f32 %v831_v27, %v830_v21  ;;  %v4483_v21 = vsub.s32 5, %v4432_v12 }
 0x1dd   : > { %v815_v30 = vrot.slane %v814_v24, 1  ;;  %v827_v31 = vrot.slane %v826_v25, 1  ;;  %v717_v27 = vrot.slane %v4440_v15, %v4480_v19 }
 0x1de   : > { %v821_v32 = vrot.slane %v820_v28, 1  ;;  %v833_v33 = vrot.slane %v832_v29, 1 }
 0x1df   : > { %v816_v34 = vadd.f32 %v815_v30, %v814_v24  ;;  %v828_v35 = vadd.f32 %v827_v31, %v826_v25  ;;  %v713_v24 = vrot.slane %v4440_v15, %v4483_v21  ;;  %v721_v25 = vrot.slane %v4440_v15, %v4486_v22 }
 0x1e0   : > { %v822_v36 = vadd.f32 %v821_v32, %v820_v28  ;;  %v834_v37 = vadd.f32 %v833_v33, %v832_v29 }
 0x1e1   : > { %v859_v38 = vmul.f32 0.125, %v816_v34  ;;  %v861_v39 = vmul.f32 0.125, %v828_v35 }
 0x1e2   : > { %v860_v40 = vmul.f32 0.125, %v822_v36  ;;  %v862_v41 = vmul.f32 0.125, %v834_v37 }
 0x1e3   : > { %v867_v42 = vadd.f32 1e-05, %v859_v38  ;;  %v869_v43 = vadd.f32 1e-05, %v861_v39 }
 0x1e4   : > { %v868_v44 = vadd.f32 1e-05, %v860_v40  ;;  %v870_v45 = vadd.f32 1e-05, %v862_v41 }
 0x1e5   : > { %3881 = vrsqrt.f32 %v867_v42 }
 0x1e6   : > { %3883 = vrsqrt.f32 %v869_v43 }
 0x1e7   : > { %3885 = vrsqrt.f32 %v868_v44 }
 0x1e8   : > { %3887 = vrsqrt.f32 %v870_v45 }
 0x1ef   : > { %v3882_v49 = vpop.eup %3881 }
 0x1f0   : > { %v3884_v51 = vpop.eup %3883  ;;  %v883_v52 = vmul.f32 %v3882_v49, %v795_v62  ;;  %v948_v62 = vrot.slane %v4458_v47, %v4443_v16  ;;  %v4477_v16 = vsub.s32 4, %v4432_v12 }
 0x1f1   : > { %v3886_v55 = vpop.eup %3885  ;;  %v885_v56 = vmul.f32 %v3884_v51, %v797_v63 }
 0x1f2   : > { %v3888_v59 = vpop.eup %3887  ;;  %v932_v60 = vmul.f32 %v895_v48, %v883_v52  ;;  %v884_v61 = vmul.f32 %v3886_v55, %v796_v0  ;;  %v709_v26 = vrot.slane %v4440_v15, %v4477_v16 }
 0x1f3   : > { %v934_v4 = vmul.f32 %v903_v50, %v885_v56  ;;  %v886_v5 = vmul.f32 %v3888_v59, %v798_v1 }
 0x1f4   : > { %v981_v6 = vadd.f32 %v944_v53, %v932_v60  ;;  %v933_v7 = vmul.f32 %v899_v54, %v884_v61 }
 0x1f5   : > { %v983_v63 = vadd.f32 %v952_v57, %v934_v4  ;;  %v935_v8 = vmul.f32 %v907_v58, %v886_v5 }
 0x1f6   : > { %vm989_vm0 = vcmp.ge.f32.partialorder %v981_v6, 0.0  ;;  %v997_v14 = vmul.f32 0.01, %v981_v6  ;;  %v982_v9 = vadd.f32 %v948_v62, %v933_v7 }
 0x1f7   : > { %vm991_vm1 = vcmp.ge.f32.partialorder %v983_v63, 0.0  ;;  %v999_v10 = vmul.f32 0.01, %v983_v63  ;;  %v984_v11 = vadd.f32 %v956_v13, %v935_v8 }
 0x1f8   : > { %v1005_v18 = vsel %vm989_vm0, %v981_v6, %v997_v14  ;;  %vm990_vm2 = vcmp.ge.f32.partialorder %v982_v9, 0.0  ;;  %v998_v0 = vmul.f32 0.01, %v982_v9 }
 0x1f9   : > { %1013 = vst [vmem:[#allocation3] sm:$0xff] %v1005_v18  ;;  %v1007_v1 = vsel %vm991_vm1, %v983_v63, %v999_v10  ;;  %vm992_vm3 = vcmp.ge.f32.partialorder %v984_v11, 0.0  ;;  %v1000_v17 = vmul.f32 0.01, %v984_v11 }
 0x1fa   : > { %1015 = vst [vmem:[#allocation3 + $0x10] sm:$0xff] %v1007_v1  ;;  %v1006_v20 = vsel %vm990_vm2, %v982_v9, %v998_v0 }
 0x1fb   : > { %1014 = vst [vmem:[#allocation3 + $0x8] sm:$0xff] %v1006_v20  ;;  %v1008_v23 = vsel %vm992_vm3, %v984_v11, %v1000_v17 }
 0x1fc   : > { %1016 = vst [vmem:[#allocation3 + $0x18] sm:$0xff] %v1008_v23 }
 0x200   : > { %v641_v28 = vpop.f32.mrb[4].mxu0  ;;  %v682_v29 = vpop.f32.mrb[4].mxu1 }
 0x201   : > { %v734_v30 = vmul.f32 %v709_v26, %v641_v28  ;;  %v736_v12 = vmul.f32 %v717_v27, %v682_v29  ;;  %v643_v31 = vpop.f32.mrb[5].mxu0  ;;  %v684_v32 = vpop.f32.mrb[5].mxu1 }
 0x202   : > { %v735_v33 = vmul.f32 %v713_v24, %v643_v31  ;;  %v737_v34 = vmul.f32 %v721_v25, %v684_v32  ;;  %v645_v35 = vpop.f32.mrb[6].mxu0  ;;  %v686_v36 = vpop.f32.mrb[6].mxu1 }
 0x203   : > { %v762_v37 = vrot.slane %v734_v30, 4  ;;  %v774_v38 = vrot.slane %v736_v12, 4  ;;  %v646_v39 = vpop.f32.mrb[7].mxu0  ;;  %v687_v40 = vpop.f32.mrb[7].mxu1 }
 0x204   : > { %v768_v41 = vrot.slane %v735_v33, 4  ;;  %v780_v42 = vrot.slane %v737_v34, 4 }
 0x205   : > { %v763_v43 = vadd.f32 %v762_v37, %v734_v30  ;;  %v775_v44 = vadd.f32 %v774_v38, %v736_v12 }
 0x206   : > { %v769_v45 = vadd.f32 %v768_v41, %v735_v33  ;;  %v781_v15 = vadd.f32 %v780_v42, %v737_v34 }
 0x207   : > { %v764_v48 = vrot.slane %v763_v43, 2  ;;  %v776_v49 = vrot.slane %v775_v44, 2 }
 0x208   : > { %v770_v50 = vrot.slane %v769_v45, 2  ;;  %v782_v51 = vrot.slane %v781_v15, 2 }
 0x209   : > { %v765_v52 = vadd.f32 %v764_v48, %v763_v43  ;;  %v777_v53 = vadd.f32 %v776_v49, %v775_v44 }
 0x20a   : > { %v771_v54 = vadd.f32 %v770_v50, %v769_v45  ;;  %v783_v55 = vadd.f32 %v782_v51, %v781_v15 }
 0x20b   : > { %v766_v56 = vrot.slane %v765_v52, 1  ;;  %v778_v57 = vrot.slane %v777_v53, 1 }
 0x20c   : > { %v772_v58 = vrot.slane %v771_v54, 1  ;;  %v784_v59 = vrot.slane %v783_v55, 1 }
 0x20d   : > { %v767_v60 = vadd.f32 %v766_v56, %v765_v52  ;;  %v779_v61 = vadd.f32 %v778_v57, %v777_v53  ;;  %v911_v52 = vrot.slane %v4456_v46, %v4477_v16  ;;  %v960_v57 = vrot.slane %v4458_v47, %v4477_v16 }
 0x20e   : > { %v773_v62 = vadd.f32 %v772_v58, %v771_v54  ;;  %v785_v4 = vadd.f32 %v784_v59, %v783_v55  ;;  %v919_v54 = vrot.slane %v4456_v46, %v4480_v19  ;;  %v915_v58 = vrot.slane %v4456_v46, %v4483_v21 }
 0x20f   : > { %v791_v5 = vmul.f32 0.125, %v767_v60  ;;  %v793_v13 = vmul.f32 0.125, %v779_v61  ;;  %v968_v61 = vrot.slane %v4458_v47, %v4480_v19  ;;  %v972_v16 = vrot.slane %v4458_v47, %v4486_v22 }
 0x210   : > { %v792_v6 = vmul.f32 0.125, %v773_v62  ;;  %v794_v7 = vmul.f32 0.125, %v785_v4  ;;  %v923_v62 = vrot.slane %v4456_v46, %v4486_v22 }
 0x211   : > { %v799_v63 = vsub.f32 %v734_v30, %v791_v5  ;;  %v801_v8 = vsub.f32 %v736_v12, %v793_v13 }
 0x212   : > { %v800_v14 = vsub.f32 %v735_v33, %v792_v6  ;;  %v802_v9 = vsub.f32 %v737_v34, %v794_v7  ;;  %v964_v6 = vrot.slane %v4458_v47, %v4483_v21 }
 0x213   : > { %v807_v10 = vmul.f32 %v799_v63, %v799_v63  ;;  %v809_v11 = vmul.f32 %v801_v8, %v801_v8 }
 0x214   : > { %v808_v18 = vmul.f32 %v800_v14, %v800_v14  ;;  %v810_v0 = vmul.f32 %v802_v9, %v802_v9 }
 0x215   : > { %v835_v1 = vrot.slane %v807_v10, 4  ;;  %v847_v17 = vrot.slane %v809_v11, 4 }
 0x216   : > { %v841_v20 = vrot.slane %v808_v18, 4  ;;  %v853_v23 = vrot.slane %v810_v0, 4 }
 0x217   : > { %v836_v26 = vadd.f32 %v835_v1, %v807_v10  ;;  %v848_v27 = vadd.f32 %v847_v17, %v809_v11 }
 0x218   : > { %v842_v24 = vadd.f32 %v841_v20, %v808_v18  ;;  %v854_v25 = vadd.f32 %v853_v23, %v810_v0 }
 0x219   : > { %v837_v28 = vrot.slane %v836_v26, 2  ;;  %v849_v29 = vrot.slane %v848_v27, 2 }
 0x21a   : > { %v843_v31 = vrot.slane %v842_v24, 2  ;;  %v855_v32 = vrot.slane %v854_v25, 2 }
 0x21b   : > { %v838_v30 = vadd.f32 %v837_v28, %v836_v26  ;;  %v850_v12 = vadd.f32 %v849_v29, %v848_v27 }
 0x21c   : > { %v844_v33 = vadd.f32 %v843_v31, %v842_v24  ;;  %v856_v34 = vadd.f32 %v855_v32, %v854_v25 }
 0x21d   : > { %v839_v35 = vrot.slane %v838_v30, 1  ;;  %v851_v36 = vrot.slane %v850_v12, 1 }
 0x21e   : > { %v845_v37 = vrot.slane %v844_v33, 1  ;;  %v857_v38 = vrot.slane %v856_v34, 1 }
 0x21f   : > { %v840_v39 = vadd.f32 %v839_v35, %v838_v30  ;;  %v852_v40 = vadd.f32 %v851_v36, %v850_v12 }
 0x220   : > { %v846_v41 = vadd.f32 %v845_v37, %v844_v33  ;;  %v858_v42 = vadd.f32 %v857_v38, %v856_v34 }
 0x221   : > { %v863_v43 = vmul.f32 0.125, %v840_v39  ;;  %v865_v44 = vmul.f32 0.125, %v852_v40 }
 0x222   : > { %v864_v45 = vmul.f32 0.125, %v846_v41  ;;  %v866_v15 = vmul.f32 0.125, %v858_v42 }
 0x223   : > { %v871_v48 = vadd.f32 1e-05, %v863_v43  ;;  %v873_v49 = vadd.f32 1e-05, %v865_v44 }
 0x224   : > { %v872_v50 = vadd.f32 1e-05, %v864_v45  ;;  %v874_v51 = vadd.f32 1e-05, %v866_v15 }
 0x225   : > { %3889 = vrsqrt.f32 %v871_v48 }
 0x226   : > { %3891 = vrsqrt.f32 %v873_v49 }
 0x227   : > { %3893 = vrsqrt.f32 %v872_v50 }
 0x228   : > { %3895 = vrsqrt.f32 %v874_v51 }
 0x22f   : > { %v3890_v53 = vpop.eup %3889 }
 0x230   : > { %v3892_v55 = vpop.eup %3891  ;;  %v887_v56 = vmul.f32 %v3890_v53, %v799_v63 }
 0x231   : > { %v3894_v59 = vpop.eup %3893  ;;  %v889_v60 = vmul.f32 %v3892_v55, %v801_v8 }
 0x232   : > { %v3896_v4 = vpop.eup %3895  ;;  %v936_v5 = vmul.f32 %v911_v52, %v887_v56  ;;  %v888_v13 = vmul.f32 %v3894_v59, %v800_v14 }
 0x233   : > { %v938_v7 = vmul.f32 %v919_v54, %v889_v60  ;;  %v890_v63 = vmul.f32 %v3896_v4, %v802_v9 }
 0x234   : > { %v985_v10 = vadd.f32 %v960_v57, %v936_v5  ;;  %v937_v11 = vmul.f32 %v915_v58, %v888_v13 }
 0x235   : > { %v987_v8 = vadd.f32 %v968_v61, %v938_v7  ;;  %v939_v18 = vmul.f32 %v923_v62, %v890_v63 }
 0x236   : > { %vm993_vm4 = vcmp.ge.f32.partialorder %v985_v10, 0.0  ;;  %v1001_v19 = vmul.f32 0.01, %v985_v10  ;;  %v986_v0 = vadd.f32 %v964_v6, %v937_v11 }
 0x237   : > { %vm995_vm5 = vcmp.ge.f32.partialorder %v987_v8, 0.0  ;;  %v1003_v46 = vmul.f32 0.01, %v987_v8  ;;  %v988_v1 = vadd.f32 %v972_v16, %v939_v18 }
 0x238   : > { %v1009_v17 = vsel %vm993_vm4, %v985_v10, %v1001_v19  ;;  %vm994_vm6 = vcmp.ge.f32.partialorder %v986_v0, 0.0  ;;  %v1002_v14 = vmul.f32 0.01, %v986_v0 }
 0x239   : > { %1017 = vst [vmem:[#allocation3 + $0x20] sm:$0xff] %v1009_v17  ;;  %v1011_v21 = vsel %vm995_vm5, %v987_v8, %v1003_v46  ;;  %vm996_vm7 = vcmp.ge.f32.partialorder %v988_v1, 0.0  ;;  %v1004_v9 = vmul.f32 0.01, %v988_v1 }
 0x23a   : > { %1019 = vst [vmem:[#allocation3 + $0x30] sm:$0xff] %v1011_v21  ;;  %v1010_v20 = vsel %vm994_vm6, %v986_v0, %v1002_v14 }
 0x23b   : > { %1018 = vst [vmem:[#allocation3 + $0x28] sm:$0xff] %v1010_v20  ;;  %v1012_v47 = vsel %vm996_vm7, %v988_v1, %v1004_v9 }
 0x23c   : > { %1020 = vst [vmem:[#allocation3 + $0x38] sm:$0xff] %v1012_v47 }
 0x23d PF: > { %v1031_v22 = vld [vmem:[%s4406_s30 + $0x8] sm:$0xff]  ;;  %v1033_v23 = vld [vmem:[%s4406_s30 + $0x18] sm:$0xff]  ;;  %v1030_v26 = vld [vmem:[%s4406_s30] sm:$0xff]  ;;  %1254 = vmatprep.mubr.bf16.mxu0 %v4420_v3  ;;  %1295 = vmatprep.mubr.bf16.mxu1 %v4420_v3  ;;  %s3785_s28 = sshll.u32 %s4208_s22, 10  ;;  %p3787_p3 = scmp.ne.s32.totalorder %s4208_s22, 3 }
 0x23e   : > { %v1095_v27 = vunpack.c.l.s8.bf16 %v1031_v22  ;;  %v1103_v24 = vunpack.c.h.s8.bf16 %v1031_v22  ;;  %v1097_v25 = vunpack.c.l.s8.bf16 %v1033_v23  ;;  %v1105_v28 = vunpack.c.h.s8.bf16 %v1033_v23  ;;  %v1032_v29 = vld [vmem:[%s4406_s30 + $0x10] sm:$0xff]  ;;  %v1039_v30 = vld [vmem:[%s4406_s30 + $0x48] sm:$0xff]  ;;  %v1041_v12 = vld [vmem:[%s4406_s30 + $0x58] sm:$0xff]  ;;  %s1022_s25 = sshra.s32 %s3785_s28, 7 }
 0x23f   : > { %v1094_v31 = vunpack.c.l.s8.bf16 %v1030_v26  ;;  %v1096_v32 = vunpack.c.l.s8.bf16 %v1032_v29  ;;  %v1102_v33 = vunpack.c.h.s8.bf16 %v1030_v26  ;;  %v1104_v34 = vunpack.c.h.s8.bf16 %v1032_v29  ;;  %v1038_v37 = vld [vmem:[%s4406_s30 + $0x40] sm:$0xff]  ;;  %v1040_v38 = vld [vmem:[%s4406_s30 + $0x50] sm:$0xff]  ;;  %v1047_v43 = vld [vmem:[%s4406_s30 + $0x88] sm:$0xff]  ;;  %s3786_s27 = sshll.u32 %s1022_s25, 2 }
 0x240   : > { %1222 = vmatprep.subr.bf16.mxu0 %v1095_v27  ;;  %1263 = vmatprep.subr.bf16.mxu1 %v1097_v25  ;;  %v1111_v35 = vunpack.c.l.s8.bf16 %v1039_v30  ;;  %v1113_v36 = vunpack.c.l.s8.bf16 %v1041_v12  ;;  %v1110_v39 = vunpack.c.l.s8.bf16 %v1038_v37  ;;  %v1112_v40 = vunpack.c.l.s8.bf16 %v1040_v38  ;;  %v1049_v44 = vld [vmem:[%s4406_s30 + $0x98] sm:$0xff]  ;;  %v1046_v50 = vld [vmem:[%s4406_s30 + $0x80] sm:$0xff]  ;;  %v1048_v51 = vld [vmem:[%s4406_s30 + $0x90] sm:$0xff]  ;;  %s4630_s16 = scalar_lea.vmem [#allocation12], %s3786_s27 }
 0x241   : > { %1223 = vmatpush1.bf16.msra.mxu0 %v1094_v31  ;;  %1264 = vmatpush1.bf16.msra.mxu1 %v1096_v32  ;;  %v1119_v41 = vunpack.c.h.s8.bf16 %v1039_v30  ;;  %v1121_v42 = vunpack.c.h.s8.bf16 %v1041_v12  ;;  %v1118_v45 = vunpack.c.h.s8.bf16 %v1038_v37  ;;  %v1120_v15 = vunpack.c.h.s8.bf16 %v1040_v38  ;;  %v1055_v56 = vld [vmem:[%s4406_s30 + $0xc8] sm:$0xff]  ;;  %v1057_v57 = vld [vmem:[%s4406_s30 + $0xd8] sm:$0xff]  ;;  %v1054_v62 = vld [vmem:[%s4406_s30 + $0xc0] sm:$0xff] }
 0x242   : > { %1224 = vmatprep.subr.bf16.mxu0 %v1103_v24  ;;  %1265 = vmatprep.subr.bf16.mxu1 %v1105_v28  ;;  %v1127_v48 = vunpack.c.l.s8.bf16 %v1047_v43  ;;  %v1129_v49 = vunpack.c.l.s8.bf16 %v1049_v44  ;;  %v1126_v52 = vunpack.c.l.s8.bf16 %v1046_v50  ;;  %v1128_v53 = vunpack.c.l.s8.bf16 %v1048_v51  ;;  %v1056_v4 = vld [vmem:[%s4406_s30 + $0xd0] sm:$0xff]  ;;  %v1063_v63 = vld [vmem:[%s4406_s30 + $0x108] sm:$0xff]  ;;  %v1065_v16 = vld [vmem:[%s4406_s30 + $0x118] sm:$0xff] }
 0x243   : > { %v1135_v54 = vunpack.c.h.s8.bf16 %v1047_v43  ;;  %v1137_v55 = vunpack.c.h.s8.bf16 %v1049_v44  ;;  %v1134_v58 = vunpack.c.h.s8.bf16 %v1046_v50  ;;  %v1136_v59 = vunpack.c.h.s8.bf16 %v1048_v51  ;;  %v1062_v19 = vld [vmem:[%s4406_s30 + $0x100] sm:$0xff]  ;;  %v1064_v0 = vld [vmem:[%s4406_s30 + $0x110] sm:$0xff]  ;;  %v1071_v21 = vld [vmem:[%s4406_s30 + $0x148] sm:$0xff] }
 0x244   : > { %v1143_v60 = vunpack.c.l.s8.bf16 %v1055_v56  ;;  %v1145_v61 = vunpack.c.l.s8.bf16 %v1057_v57  ;;  %v1142_v5 = vunpack.c.l.s8.bf16 %v1054_v62  ;;  %v1144_v13 = vunpack.c.l.s8.bf16 %v1056_v4  ;;  %v1073_v9 = vld [vmem:[%s4406_s30 + $0x158] sm:$0xff]  ;;  %v1070_v26 = vld [vmem:[%s4406_s30 + $0x140] sm:$0xff]  ;;  %v1072_v27 = vld [vmem:[%s4406_s30 + $0x150] sm:$0xff] }
 0x245   : > { %1225 = vmatpush1.bf16.msra.mxu0 %v1102_v33  ;;  %1266 = vmatpush1.bf16.msra.mxu1 %v1104_v34  ;;  %v1151_v6 = vunpack.c.h.s8.bf16 %v1055_v56  ;;  %v1153_v7 = vunpack.c.h.s8.bf16 %v1057_v57  ;;  %v1150_v10 = vunpack.c.h.s8.bf16 %v1054_v62  ;;  %v1152_v11 = vunpack.c.h.s8.bf16 %v1056_v4  ;;  %v1079_v31 = vld [vmem:[%s4406_s30 + $0x188] sm:$0xff]  ;;  %v1081_v32 = vld [vmem:[%s4406_s30 + $0x198] sm:$0xff] }
 0x246   : > { %1226 = vmatprep.subr.bf16.mxu0 %v1111_v35  ;;  %1267 = vmatprep.subr.bf16.mxu1 %v1113_v36  ;;  %v1159_v8 = vunpack.c.l.s8.bf16 %v1063_v63  ;;  %v1161_v18 = vunpack.c.l.s8.bf16 %v1065_v16  ;;  %v1158_v46 = vunpack.c.l.s8.bf16 %v1062_v19  ;;  %v1160_v1 = vunpack.c.l.s8.bf16 %v1064_v0  ;;  %v1078_v35 = vld [vmem:[%s4406_s30 + $0x180] sm:$0xff]  ;;  %v1080_v36 = vld [vmem:[%s4406_s30 + $0x190] sm:$0xff] }
 0x247   : > { %v1167_v17 = vunpack.c.h.s8.bf16 %v1063_v63  ;;  %v1169_v14 = vunpack.c.h.s8.bf16 %v1065_v16  ;;  %v1166_v20 = vunpack.c.h.s8.bf16 %v1062_v19  ;;  %v1168_v47 = vunpack.c.h.s8.bf16 %v1064_v0 }
 0x248   : > { %v1175_v22 = vunpack.c.l.s8.bf16 %v1071_v21  ;;  %v1177_v23 = vunpack.c.l.s8.bf16 %v1073_v9  ;;  %v1174_v24 = vunpack.c.l.s8.bf16 %v1070_v26  ;;  %v1176_v25 = vunpack.c.l.s8.bf16 %v1072_v27 }
 0x249   : > { %1227 = vmatpush1.bf16.msra.mxu0 %v1110_v39  ;;  %1268 = vmatpush1.bf16.msra.mxu1 %v1112_v40  ;;  %v1183_v28 = vunpack.c.h.s8.bf16 %v1071_v21  ;;  %v1185_v29 = vunpack.c.h.s8.bf16 %v1073_v9  ;;  %v1182_v30 = vunpack.c.h.s8.bf16 %v1070_v26  ;;  %v1184_v12 = vunpack.c.h.s8.bf16 %v1072_v27 }
 0x24a   : > { %1228 = vmatprep.subr.bf16.mxu0 %v1119_v41  ;;  %1269 = vmatprep.subr.bf16.mxu1 %v1121_v42  ;;  %v1191_v33 = vunpack.c.l.s8.bf16 %v1079_v31  ;;  %v1193_v34 = vunpack.c.l.s8.bf16 %v1081_v32  ;;  %v1190_v37 = vunpack.c.l.s8.bf16 %v1078_v35  ;;  %v1192_v38 = vunpack.c.l.s8.bf16 %v1080_v36  ;;  %v1087_v41 = vld [vmem:[%s4406_s30 + $0x1c8] sm:$0xff]  ;;  %v1089_v42 = vld [vmem:[%s4406_s30 + $0x1d8] sm:$0xff] }
 0x24b   : > { %v1199_v39 = vunpack.c.h.s8.bf16 %v1079_v31  ;;  %v1201_v40 = vunpack.c.h.s8.bf16 %v1081_v32  ;;  %v1198_v43 = vunpack.c.h.s8.bf16 %v1078_v35  ;;  %v1200_v44 = vunpack.c.h.s8.bf16 %v1080_v36 }
 0x24d   : > { %1229 = vmatpush1.bf16.msra.mxu0 %v1118_v45  ;;  %1270 = vmatpush1.bf16.msra.mxu1 %v1120_v15  ;;  %v1207_v45 = vunpack.c.l.s8.bf16 %v1087_v41  ;;  %v1209_v15 = vunpack.c.l.s8.bf16 %v1089_v42 }
 0x24e   : > { %1230 = vmatprep.subr.bf16.mxu0 %v1127_v48  ;;  %1271 = vmatprep.subr.bf16.mxu1 %v1129_v49  ;;  %v1086_v48 = vld [vmem:[%s4406_s30 + $0x1c0] sm:$0xff]  ;;  %v1088_v49 = vld [vmem:[%s4406_s30 + $0x1d0] sm:$0xff] }
 0x24f   : > { %v1206_v50 = vunpack.c.l.s8.bf16 %v1086_v48  ;;  %v1208_v51 = vunpack.c.l.s8.bf16 %v1088_v49  ;;  %v1214_v56 = vunpack.c.h.s8.bf16 %v1086_v48  ;;  %v1216_v57 = vunpack.c.h.s8.bf16 %v1088_v49 }
 0x251   : > { %1231 = vmatpush1.bf16.msra.mxu0 %v1126_v52  ;;  %1272 = vmatpush1.bf16.msra.mxu1 %v1128_v53  ;;  %v1215_v52 = vunpack.c.h.s8.bf16 %v1087_v41  ;;  %v1217_v53 = vunpack.c.h.s8.bf16 %v1089_v42 }
 0x252   : > { %1232 = vmatprep.subr.bf16.mxu0 %v1135_v54  ;;  %1273 = vmatprep.subr.bf16.mxu1 %v1137_v55  ;;  %v1035_v54 = vld [vmem:[%s4406_s30 + $0x28] sm:$0xff]  ;;  %v1037_v55 = vld [vmem:[%s4406_s30 + $0x38] sm:$0xff] }
 0x255   : > { %1233 = vmatpush1.bf16.msra.mxu0 %v1134_v58  ;;  %1274 = vmatpush1.bf16.msra.mxu1 %v1136_v59  ;;  %v1099_v58 = vunpack.c.l.s8.bf16 %v1035_v54  ;;  %v1101_v59 = vunpack.c.l.s8.bf16 %v1037_v55 }
 0x256   : > { %1234 = vmatprep.subr.bf16.mxu0 %v1143_v60  ;;  %1275 = vmatprep.subr.bf16.mxu1 %v1145_v61  ;;  %v1034_v60 = vld [vmem:[%s4406_s30 + $0x20] sm:$0xff]  ;;  %v1036_v61 = vld [vmem:[%s4406_s30 + $0x30] sm:$0xff] }
 0x257   : > { %v1098_v62 = vunpack.c.l.s8.bf16 %v1034_v60  ;;  %v1100_v4 = vunpack.c.l.s8.bf16 %v1036_v61  ;;  %v1106_v63 = vunpack.c.h.s8.bf16 %v1034_v60  ;;  %v1108_v16 = vunpack.c.h.s8.bf16 %v1036_v61 }
 0x259   : > { %1235 = vmatpush1.bf16.msra.mxu0 %v1142_v5  ;;  %1276 = vmatpush1.bf16.msra.mxu1 %v1144_v13  ;;  %v1107_v5 = vunpack.c.h.s8.bf16 %v1035_v54  ;;  %v1109_v13 = vunpack.c.h.s8.bf16 %v1037_v55 }
 0x25a   : > { %1236 = vmatprep.subr.bf16.mxu0 %v1151_v6  ;;  %1277 = vmatprep.subr.bf16.mxu1 %v1153_v7  ;;  %v1043_v6 = vld [vmem:[%s4406_s30 + $0x68] sm:$0xff]  ;;  %v1045_v7 = vld [vmem:[%s4406_s30 + $0x78] sm:$0xff] }
 0x25d   : > { %1237 = vmatpush1.bf16.msra.mxu0 %v1150_v10  ;;  %1278 = vmatpush1.bf16.msra.mxu1 %v1152_v11  ;;  %v1115_v10 = vunpack.c.l.s8.bf16 %v1043_v6  ;;  %v1117_v11 = vunpack.c.l.s8.bf16 %v1045_v7 }
 0x25e   : > { %1238 = vmatprep.subr.bf16.mxu0 %v1159_v8  ;;  %1279 = vmatprep.subr.bf16.mxu1 %v1161_v18  ;;  %v1042_v8 = vld [vmem:[%s4406_s30 + $0x60] sm:$0xff]  ;;  %v1044_v18 = vld [vmem:[%s4406_s30 + $0x70] sm:$0xff] }
 0x25f   : > { %v1114_v19 = vunpack.c.l.s8.bf16 %v1042_v8  ;;  %v1116_v0 = vunpack.c.l.s8.bf16 %v1044_v18  ;;  %v1122_v21 = vunpack.c.h.s8.bf16 %v1042_v8  ;;  %v1124_v9 = vunpack.c.h.s8.bf16 %v1044_v18 }
 0x261   : > { %1239 = vmatpush1.bf16.msra.mxu0 %v1158_v46  ;;  %1280 = vmatpush1.bf16.msra.mxu1 %v1160_v1  ;;  %v1123_v46 = vunpack.c.h.s8.bf16 %v1043_v6  ;;  %v1125_v1 = vunpack.c.h.s8.bf16 %v1045_v7 }
 0x262   : > { %1240 = vmatprep.subr.bf16.mxu0 %v1167_v17  ;;  %1281 = vmatprep.subr.bf16.mxu1 %v1169_v14  ;;  %v1051_v17 = vld [vmem:[%s4406_s30 + $0xa8] sm:$0xff]  ;;  %v1053_v14 = vld [vmem:[%s4406_s30 + $0xb8] sm:$0xff] }
 0x263   : > { %v1139_v27 = vunpack.c.h.s8.bf16 %v1051_v17 }
 0x265   : > { %1241 = vmatpush1.bf16.msra.mxu0 %v1166_v20  ;;  %1282 = vmatpush1.bf16.msra.mxu1 %v1168_v47  ;;  %v1133_v20 = vunpack.c.l.s8.bf16 %v1053_v14  ;;  %v1050_v47 = vld [vmem:[%s4406_s30 + $0xa0] sm:$0xff] }
 0x266   : > { %1242 = vmatprep.subr.bf16.mxu0 %v1175_v22  ;;  %1283 = vmatprep.subr.bf16.mxu1 %v1177_v23  ;;  %v1052_v22 = vld [vmem:[%s4406_s30 + $0xb0] sm:$0xff]  ;;  %v1130_v23 = vunpack.c.l.s8.bf16 %v1050_v47 }
 0x267   : > { %v1132_v26 = vunpack.c.l.s8.bf16 %v1052_v22  ;;  %v1140_v31 = vunpack.c.h.s8.bf16 %v1052_v22 }
 0x269   : > { %1243 = vmatpush1.bf16.msra.mxu0 %v1174_v24  ;;  %1284 = vmatpush1.bf16.msra.mxu1 %v1176_v25  ;;  %v1141_v24 = vunpack.c.h.s8.bf16 %v1053_v14  ;;  %v1059_v25 = vld [vmem:[%s4406_s30 + $0xe8] sm:$0xff] }
 0x26a   : > { %1244 = vmatprep.subr.bf16.mxu0 %v1183_v28  ;;  %1285 = vmatprep.subr.bf16.mxu1 %v1185_v29  ;;  %v1061_v28 = vld [vmem:[%s4406_s30 + $0xf8] sm:$0xff]  ;;  %v1138_v29 = vunpack.c.h.s8.bf16 %v1050_v47  ;;  %v1147_v32 = vunpack.c.l.s8.bf16 %v1059_v25  ;;  %v1155_v36 = vunpack.c.h.s8.bf16 %v1059_v25 }
 0x26d   : > { %1245 = vmatpush1.bf16.msra.mxu0 %v1182_v30  ;;  %1286 = vmatpush1.bf16.msra.mxu1 %v1184_v12  ;;  %v1149_v30 = vunpack.c.l.s8.bf16 %v1061_v28  ;;  %v1058_v12 = vld [vmem:[%s4406_s30 + $0xe0] sm:$0xff] }
 0x26e   : > { %1246 = vmatprep.subr.bf16.mxu0 %v1191_v33  ;;  %1287 = vmatprep.subr.bf16.mxu1 %v1193_v34  ;;  %v1060_v33 = vld [vmem:[%s4406_s30 + $0xf0] sm:$0xff]  ;;  %v1146_v34 = vunpack.c.l.s8.bf16 %v1058_v12 }
 0x26f   : > { %v1148_v35 = vunpack.c.l.s8.bf16 %v1060_v33  ;;  %v1156_v41 = vunpack.c.h.s8.bf16 %v1060_v33 }
 0x271   : > { %1247 = vmatpush1.bf16.msra.mxu0 %v1190_v37  ;;  %1288 = vmatpush1.bf16.msra.mxu1 %v1192_v38  ;;  %v1157_v37 = vunpack.c.h.s8.bf16 %v1061_v28  ;;  %v1067_v38 = vld [vmem:[%s4406_s30 + $0x128] sm:$0xff] }
 0x272   : > { %1248 = vmatprep.subr.bf16.mxu0 %v1199_v39  ;;  %1289 = vmatprep.subr.bf16.mxu1 %v1201_v40  ;;  %v1069_v39 = vld [vmem:[%s4406_s30 + $0x138] sm:$0xff]  ;;  %v1154_v40 = vunpack.c.h.s8.bf16 %v1058_v12  ;;  %v1163_v42 = vunpack.c.l.s8.bf16 %v1067_v38  ;;  %v1171_v49 = vunpack.c.h.s8.bf16 %v1067_v38  ;;  %v1896_v38 = vld [vmem:[%s4412_s29 + $0x248] sm:$0xff] }
 0x275   : > { %1249 = vmatpush1.bf16.msra.mxu0 %v1198_v43  ;;  %1290 = vmatpush1.bf16.msra.mxu1 %v1200_v44  ;;  %v1165_v43 = vunpack.c.l.s8.bf16 %v1069_v39  ;;  %v1066_v44 = vld [vmem:[%s4406_s30 + $0x120] sm:$0xff] }
 0x276   : > { %1250 = vmatprep.subr.bf16.mxu0 %v1207_v45  ;;  %1291 = vmatprep.subr.bf16.mxu1 %v1209_v15  ;;  %v1068_v45 = vld [vmem:[%s4406_s30 + $0x130] sm:$0xff]  ;;  %v1162_v15 = vunpack.c.l.s8.bf16 %v1066_v44 }
 0x277   : > { %v1164_v48 = vunpack.c.l.s8.bf16 %v1068_v45  ;;  %v1172_v54 = vunpack.c.h.s8.bf16 %v1068_v45  ;;  %v2232_v45 = vunpack.c.h.s8.bf16 %v1896_v38 }
 0x279   : > { %1251 = vmatpush1.bf16.msra.mxu0 %v1206_v50  ;;  %1292 = vmatpush1.bf16.msra.mxu1 %v1208_v51  ;;  %v1173_v50 = vunpack.c.h.s8.bf16 %v1069_v39  ;;  %v1075_v51 = vld [vmem:[%s4406_s30 + $0x168] sm:$0xff] }
 0x27a   : > { %1252 = vmatprep.subr.bf16.mxu0 %v1215_v52  ;;  %1293 = vmatprep.subr.bf16.mxu1 %v1217_v53  ;;  %v1077_v52 = vld [vmem:[%s4406_s30 + $0x178] sm:$0xff]  ;;  %v1170_v53 = vunpack.c.h.s8.bf16 %v1066_v44  ;;  %v1179_v55 = vunpack.c.l.s8.bf16 %v1075_v51  ;;  %v1187_v61 = vunpack.c.h.s8.bf16 %v1075_v51 }
 0x27d   : > { %1253 = vmatpush1.bf16.msra.mxu0 %v1214_v56  ;;  %1294 = vmatpush1.bf16.msra.mxu1 %v1216_v57  ;;  %v1181_v56 = vunpack.c.l.s8.bf16 %v1077_v52  ;;  %v1074_v57 = vld [vmem:[%s4406_s30 + $0x160] sm:$0xff] }
 0x27e   : > { %1304 = vmatprep.subr.bf16.mxu0 %v1099_v58  ;;  %1345 = vmatprep.subr.bf16.mxu1 %v1101_v59  ;;  %v1076_v58 = vld [vmem:[%s4406_s30 + $0x170] sm:$0xff]  ;;  %v1178_v59 = vunpack.c.l.s8.bf16 %v1074_v57 }
 0x27f   : > { %v1180_v60 = vunpack.c.l.s8.bf16 %v1076_v58  ;;  %v1188_v6 = vunpack.c.h.s8.bf16 %v1076_v58 }
 0x280   : > { %1255 = vmatmul.mubr.bf16.vlgmr.msra.gmra.mrb[0].mxu0 %v4418_v2  ;;  %1296 = vmatmul.mubr.bf16.vlgmr.msra.gmra.mrb[0].mxu1 %v4418_v2 }
 0x281   : > { %1305 = vmatpush1.bf16.msra.mxu0 %v1098_v62  ;;  %1346 = vmatpush1.bf16.msra.mxu1 %v1100_v4  ;;  %v1189_v62 = vunpack.c.h.s8.bf16 %v1077_v52  ;;  %v1083_v4 = vld [vmem:[%s4406_s30 + $0x1a8] sm:$0xff] }
 0x282   : > { %1306 = vmatprep.subr.bf16.mxu0 %v1107_v5  ;;  %1347 = vmatprep.subr.bf16.mxu1 %v1109_v13  ;;  %v1085_v5 = vld [vmem:[%s4406_s30 + $0x1b8] sm:$0xff]  ;;  %v1186_v13 = vunpack.c.h.s8.bf16 %v1074_v57  ;;  %v1195_v7 = vunpack.c.l.s8.bf16 %v1083_v4  ;;  %v1203_v18 = vunpack.c.h.s8.bf16 %v1083_v4 }
 0x283   : > { %1336 = vmatprep.mubr.bf16.mxu0 %v4420_v3  ;;  %1377 = vmatprep.mubr.bf16.mxu1 %v4420_v3  ;;  %v1131_v3 = vunpack.c.l.s8.bf16 %v1051_v17 }
 0x285   : > { %1307 = vmatpush1.bf16.msra.mxu0 %v1106_v63  ;;  %1348 = vmatpush1.bf16.msra.mxu1 %v1108_v16  ;;  %v1197_v63 = vunpack.c.l.s8.bf16 %v1085_v5  ;;  %v1082_v16 = vld [vmem:[%s4406_s30 + $0x1a0] sm:$0xff] }
 0x286   : > { %1308 = vmatprep.subr.bf16.mxu0 %v1115_v10  ;;  %1349 = vmatprep.subr.bf16.mxu1 %v1117_v11  ;;  %v1084_v10 = vld [vmem:[%s4406_s30 + $0x1b0] sm:$0xff]  ;;  %v1194_v11 = vunpack.c.l.s8.bf16 %v1082_v16 }
 0x287   : > { %v1196_v8 = vunpack.c.l.s8.bf16 %v1084_v10  ;;  %v1204_v17 = vunpack.c.h.s8.bf16 %v1084_v10 }
 0x289   : > { %1309 = vmatpush1.bf16.msra.mxu0 %v1114_v19  ;;  %1350 = vmatpush1.bf16.msra.mxu1 %v1116_v0  ;;  %v1205_v19 = vunpack.c.h.s8.bf16 %v1085_v5  ;;  %v1091_v0 = vld [vmem:[%s4406_s30 + $0x1e8] sm:$0xff] }
 0x28a   : > { %1310 = vmatprep.subr.bf16.mxu0 %v1123_v46  ;;  %1351 = vmatprep.subr.bf16.mxu1 %v1125_v1  ;;  %v1093_v46 = vld [vmem:[%s4406_s30 + $0x1f8] sm:$0xff]  ;;  %v1202_v1 = vunpack.c.h.s8.bf16 %v1082_v16  ;;  %v1211_v14 = vunpack.c.l.s8.bf16 %v1091_v0  ;;  %v1219_v22 = vunpack.c.h.s8.bf16 %v1091_v0 }
 0x28d   : > { %1311 = vmatpush1.bf16.msra.mxu0 %v1122_v21  ;;  %1352 = vmatpush1.bf16.msra.mxu1 %v1124_v9  ;;  %v1213_v21 = vunpack.c.l.s8.bf16 %v1093_v46  ;;  %v1090_v9 = vld [vmem:[%s4406_s30 + $0x1e0] sm:$0xff] }
 0x28e   : > { %1312 = vmatprep.subr.bf16.mxu0 %v1131_v3  ;;  %1353 = vmatprep.subr.bf16.mxu1 %v1133_v20  ;;  %v1092_v3 = vld [vmem:[%s4406_s30 + $0x1f0] sm:$0xff]  ;;  %v1210_v20 = vunpack.c.l.s8.bf16 %v1090_v9 }
 0x28f   : > { %v1212_v47 = vunpack.c.l.s8.bf16 %v1092_v3  ;;  %v1220_v25 = vunpack.c.h.s8.bf16 %v1092_v3 }
 0x291   : > { %1313 = vmatpush1.bf16.msra.mxu0 %v1130_v23  ;;  %1354 = vmatpush1.bf16.msra.mxu1 %v1132_v26  ;;  %v1221_v23 = vunpack.c.h.s8.bf16 %v1093_v46  ;;  %v1824_v26 = vld [vmem:[%s4412_s29 + $0x8] sm:$0xff] }
 0x292   : > { %1314 = vmatprep.subr.bf16.mxu0 %v1139_v27  ;;  %1355 = vmatprep.subr.bf16.mxu1 %v1141_v24  ;;  %v1888_v27 = vld [vmem:[%s4412_s29 + $0x208] sm:$0xff]  ;;  %v1218_v24 = vunpack.c.h.s8.bf16 %v1090_v9  ;;  %v2080_v28 = vunpack.c.l.s8.bf16 %v1824_v26  ;;  %v2088_v33 = vunpack.c.h.s8.bf16 %v1824_v26 }
 0x295   : > { %1315 = vmatpush1.bf16.msra.mxu0 %v1138_v29  ;;  %1356 = vmatpush1.bf16.msra.mxu1 %v1140_v31  ;;  %v2208_v29 = vunpack.c.l.s8.bf16 %v1888_v27  ;;  %v1823_v31 = vld [vmem:[%s4412_s29] sm:$0xff] }
 0x296   : > { %1316 = vmatprep.subr.bf16.mxu0 %v1147_v32  ;;  %1357 = vmatprep.subr.bf16.mxu1 %v1149_v30  ;;  %v1887_v32 = vld [vmem:[%s4412_s29 + $0x200] sm:$0xff]  ;;  %v2079_v30 = vunpack.c.l.s8.bf16 %v1823_v31 }
 0x297   : > { %v2207_v12 = vunpack.c.l.s8.bf16 %v1887_v32 }
 0x299   : > { %1317 = vmatpush1.bf16.msra.mxu0 %v1146_v34  ;;  %1358 = vmatpush1.bf16.msra.mxu1 %v1148_v35  ;;  %v2216_v34 = vunpack.c.h.s8.bf16 %v1888_v27  ;;  %v2087_v35 = vunpack.c.h.s8.bf16 %v1823_v31 }
 0x29a   : > { %1318 = vmatprep.subr.bf16.mxu0 %v1155_v36  ;;  %1359 = vmatprep.subr.bf16.mxu1 %v1157_v37  ;;  %v2215_v36 = vunpack.c.h.s8.bf16 %v1887_v32  ;;  %v1832_v37 = vld [vmem:[%s4412_s29 + $0x48] sm:$0xff] }
 0x29b   : > { %v2096_v39 = vunpack.c.l.s8.bf16 %v1832_v37  ;;  %v2104_v44 = vunpack.c.h.s8.bf16 %v1832_v37  ;;  %v1871_v37 = vld [vmem:[%s4412_s29 + $0x180] sm:$0xff] }
 0x29d   : > { %1319 = vmatpush1.bf16.msra.mxu0 %v1154_v40  ;;  %1360 = vmatpush1.bf16.msra.mxu1 %v1156_v41  ;;  %v2224_v40 = vunpack.c.l.s8.bf16 %v1896_v38  ;;  %v1831_v41 = vld [vmem:[%s4412_s29 + $0x40] sm:$0xff] }
 0x29e   : > { %1320 = vmatprep.subr.bf16.mxu0 %v1163_v42  ;;  %1361 = vmatprep.subr.bf16.mxu1 %v1165_v43  ;;  %v1895_v42 = vld [vmem:[%s4412_s29 + $0x240] sm:$0xff] }
 0x29f   : > { %v2223_v43 = vunpack.c.l.s8.bf16 %v1895_v42  ;;  %v1935_v38 = vld [vmem:[%s4412_s29 + $0x380] sm:$0xff] }
 0x2a1   : > { %1321 = vmatpush1.bf16.msra.mxu0 %v1162_v15  ;;  %1362 = vmatpush1.bf16.msra.mxu1 %v1164_v48  ;;  %v2103_v15 = vunpack.c.h.s8.bf16 %v1831_v41  ;;  %v2231_v48 = vunpack.c.h.s8.bf16 %v1895_v42 }
 0x2a2   : > { %1322 = vmatprep.subr.bf16.mxu0 %v1171_v49  ;;  %1363 = vmatprep.subr.bf16.mxu1 %v1173_v50  ;;  %v1840_v49 = vld [vmem:[%s4412_s29 + $0x88] sm:$0xff] }
 0x2a3   : > { %v1904_v50 = vld [vmem:[%s4412_s29 + $0x288] sm:$0xff]  ;;  %v2112_v51 = vunpack.c.l.s8.bf16 %v1840_v49  ;;  %v2120_v57 = vunpack.c.h.s8.bf16 %v1840_v49  ;;  %v1879_v49 = vld [vmem:[%s4412_s29 + $0x1c0] sm:$0xff] }
 0x2a4   : > { %v2240_v52 = vunpack.c.l.s8.bf16 %v1904_v50  ;;  %v2248_v58 = vunpack.c.h.s8.bf16 %v1904_v50  ;;  %v1943_v50 = vld [vmem:[%s4412_s29 + $0x3c0] sm:$0xff] }
 0x2a5   : > { %1323 = vmatpush1.bf16.msra.mxu0 %v1170_v53  ;;  %1364 = vmatpush1.bf16.msra.mxu1 %v1172_v54  ;;  %v1839_v53 = vld [vmem:[%s4412_s29 + $0x80] sm:$0xff] }
 0x2a6   : > { %1324 = vmatprep.subr.bf16.mxu0 %v1179_v55  ;;  %1365 = vmatprep.subr.bf16.mxu1 %v1181_v56  ;;  %v1903_v54 = vld [vmem:[%s4412_s29 + $0x280] sm:$0xff]  ;;  %v2111_v55 = vunpack.c.l.s8.bf16 %v1839_v53 }
 0x2a7   : > { %v2239_v56 = vunpack.c.l.s8.bf16 %v1903_v54 }
 0x2a9   : > { %1325 = vmatpush1.bf16.msra.mxu0 %v1178_v59  ;;  %1366 = vmatpush1.bf16.msra.mxu1 %v1180_v60  ;;  %v2119_v59 = vunpack.c.h.s8.bf16 %v1839_v53  ;;  %v2247_v60 = vunpack.c.h.s8.bf16 %v1903_v54 }
 0x2aa   : > { %1326 = vmatprep.subr.bf16.mxu0 %v1187_v61  ;;  %1367 = vmatprep.subr.bf16.mxu1 %v1189_v62  ;;  %v1848_v61 = vld [vmem:[%s4412_s29 + $0xc8] sm:$0xff] }
 0x2ab   : > { %v1912_v62 = vld [vmem:[%s4412_s29 + $0x2c8] sm:$0xff]  ;;  %v2128_v4 = vunpack.c.l.s8.bf16 %v1848_v61  ;;  %v2136_v16 = vunpack.c.h.s8.bf16 %v1848_v61  ;;  %v1390_v61 = vlaneseq }
 0x2ac   : > { %v2256_v5 = vunpack.c.l.s8.bf16 %v1912_v62  ;;  %v2264_v10 = vunpack.c.h.s8.bf16 %v1912_v62 }
 0x2ad   : > { %1327 = vmatpush1.bf16.msra.mxu0 %v1186_v13  ;;  %1368 = vmatpush1.bf16.msra.mxu1 %v1188_v6  ;;  %v1847_v13 = vld [vmem:[%s4412_s29 + $0xc0] sm:$0xff]  ;;  %v4625_v62 = vshrl.u32 %v1390_v61, 7 }
 0x2ae   : > { %1328 = vmatprep.subr.bf16.mxu0 %v1195_v7  ;;  %1369 = vmatprep.subr.bf16.mxu1 %v1197_v63  ;;  %v1911_v6 = vld [vmem:[%s4412_s29 + $0x2c0] sm:$0xff]  ;;  %v2127_v7 = vunpack.c.l.s8.bf16 %v1847_v13 }
 0x2af   : > { %v2255_v63 = vunpack.c.l.s8.bf16 %v1911_v6 }
 0x2b1   : > { %1329 = vmatpush1.bf16.msra.mxu0 %v1194_v11  ;;  %1370 = vmatpush1.bf16.msra.mxu1 %v1196_v8  ;;  %v2135_v11 = vunpack.c.h.s8.bf16 %v1847_v13  ;;  %v2263_v8 = vunpack.c.h.s8.bf16 %v1911_v6  ;;  %v4636_v13 = vld [vmem:[%s4630_s16 + $0x8] sm:$0x77]  ;;  %v4639_v6 = vsub.s32 6, %v4625_v62 }
 0x2b2   : > { %1330 = vmatprep.subr.bf16.mxu0 %v1203_v18  ;;  %1371 = vmatprep.subr.bf16.mxu1 %v1205_v19  ;;  %v1856_v18 = vld [vmem:[%s4412_s29 + $0x108] sm:$0xff] }
 0x2b3   : > { %v1920_v19 = vld [vmem:[%s4412_s29 + $0x308] sm:$0xff]  ;;  %v2144_v0 = vunpack.c.l.s8.bf16 %v1856_v18  ;;  %v2152_v9 = vunpack.c.h.s8.bf16 %v1856_v18 }
 0x2b4   : > { %v2272_v46 = vunpack.c.l.s8.bf16 %v1920_v19  ;;  %v2280_v3 = vunpack.c.h.s8.bf16 %v1920_v19 }
 0x2b5   : > { %1331 = vmatpush1.bf16.msra.mxu0 %v1202_v1  ;;  %1372 = vmatpush1.bf16.msra.mxu1 %v1204_v17  ;;  %v1855_v1 = vld [vmem:[%s4412_s29 + $0x100] sm:$0xff] }
 0x2b6   : > { %1332 = vmatprep.subr.bf16.mxu0 %v1211_v14  ;;  %1373 = vmatprep.subr.bf16.mxu1 %v1213_v21  ;;  %v1919_v17 = vld [vmem:[%s4412_s29 + $0x300] sm:$0xff]  ;;  %v2143_v14 = vunpack.c.l.s8.bf16 %v1855_v1 }
 0x2b7   : > { %v2271_v21 = vunpack.c.l.s8.bf16 %v1919_v17 }
 0x2b9   : > { %1333 = vmatpush1.bf16.msra.mxu0 %v1210_v20  ;;  %1374 = vmatpush1.bf16.msra.mxu1 %v1212_v47  ;;  %v2151_v20 = vunpack.c.h.s8.bf16 %v1855_v1  ;;  %v2279_v47 = vunpack.c.h.s8.bf16 %v1919_v17 }
 0x2ba   : > { %1334 = vmatprep.subr.bf16.mxu0 %v1219_v22  ;;  %1375 = vmatprep.subr.bf16.mxu1 %v1221_v23  ;;  %v1864_v22 = vld [vmem:[%s4412_s29 + $0x148] sm:$0xff] }
 0x2bb   : > { %v1928_v23 = vld [vmem:[%s4412_s29 + $0x348] sm:$0xff]  ;;  %v2160_v26 = vunpack.c.l.s8.bf16 %v1864_v22  ;;  %v2168_v31 = vunpack.c.h.s8.bf16 %v1864_v22 }
 0x2bc   : > { %v2288_v27 = vunpack.c.l.s8.bf16 %v1928_v23  ;;  %v2296_v32 = vunpack.c.h.s8.bf16 %v1928_v23 }
 0x2bd   : > { %1335 = vmatpush1.bf16.msra.mxu0 %v1218_v24  ;;  %1376 = vmatpush1.bf16.msra.mxu1 %v1220_v25  ;;  %v1863_v24 = vld [vmem:[%s4412_s29 + $0x140] sm:$0xff] }
 0x2be   : > { %2591 = vmatprep.subr.bf16.mxu0 %v2080_v28  ;;  %2632 = vmatprep.subr.bf16.mxu1 %v2208_v29  ;;  %v1927_v25 = vld [vmem:[%s4412_s29 + $0x340] sm:$0xff]  ;;  %v2159_v28 = vunpack.c.l.s8.bf16 %v1863_v24 }
 0x2bf   : > { %v2287_v29 = vunpack.c.l.s8.bf16 %v1927_v25 }
 0x2c0   : > { %1337 = vmatmul.mubr.bf16.vlgmr.msra.gmra.mrb[4].mxu0 %v4418_v2  ;;  %1378 = vmatmul.mubr.bf16.vlgmr.msra.gmra.mrb[4].mxu1 %v4418_v2  ;;  %v2095_v2 = vunpack.c.l.s8.bf16 %v1831_v41 }
 0x2c1   : > { %2592 = vmatpush1.bf16.msra.mxu0 %v2079_v30  ;;  %2633 = vmatpush1.bf16.msra.mxu1 %v2207_v12  ;;  %v2167_v30 = vunpack.c.h.s8.bf16 %v1863_v24  ;;  %v2295_v12 = vunpack.c.h.s8.bf16 %v1927_v25 }
 0x2c2   : > { %2593 = vmatprep.subr.bf16.mxu0 %v2088_v33  ;;  %2634 = vmatprep.subr.bf16.mxu1 %v2216_v34  ;;  %v1872_v33 = vld [vmem:[%s4412_s29 + $0x188] sm:$0xff] }
 0x2c3   : > { %v1936_v34 = vld [vmem:[%s4412_s29 + $0x388] sm:$0xff]  ;;  %v2184_v41 = vunpack.c.h.s8.bf16 %v1872_v33 }
 0x2c4   : > { %v2312_v42 = vunpack.c.h.s8.bf16 %v1936_v34 }
 0x2c5   : > { %2594 = vmatpush1.bf16.msra.mxu0 %v2087_v35  ;;  %2635 = vmatpush1.bf16.msra.mxu1 %v2215_v36  ;;  %v2176_v35 = vunpack.c.l.s8.bf16 %v1872_v33  ;;  %v2304_v36 = vunpack.c.l.s8.bf16 %v1936_v34 }
 0x2c6   : > { %2595 = vmatprep.subr.bf16.mxu0 %v2096_v39  ;;  %2636 = vmatprep.subr.bf16.mxu1 %v2224_v40  ;;  %v2175_v39 = vunpack.c.l.s8.bf16 %v1871_v37  ;;  %v2303_v40 = vunpack.c.l.s8.bf16 %v1935_v38 }
 0x2c9   : > { %2596 = vmatpush1.bf16.msra.mxu0 %v2095_v2  ;;  %2637 = vmatpush1.bf16.msra.mxu1 %v2223_v43  ;;  %v2183_v2 = vunpack.c.h.s8.bf16 %v1871_v37  ;;  %v1880_v43 = vld [vmem:[%s4412_s29 + $0x1c8] sm:$0xff] }
 0x2ca   : > { %2597 = vmatprep.subr.bf16.mxu0 %v2104_v44  ;;  %2638 = vmatprep.subr.bf16.mxu1 %v2232_v45  ;;  %v1944_v44 = vld [vmem:[%s4412_s29 + $0x3c8] sm:$0xff]  ;;  %v2311_v45 = vunpack.c.h.s8.bf16 %v1935_v38  ;;  %v2200_v53 = vunpack.c.h.s8.bf16 %v1880_v43 }
 0x2cb   : > { %v2328_v54 = vunpack.c.h.s8.bf16 %v1944_v44 }
 0x2cd   : > { %2598 = vmatpush1.bf16.msra.mxu0 %v2103_v15  ;;  %2639 = vmatpush1.bf16.msra.mxu1 %v2231_v48  ;;  %v2192_v15 = vunpack.c.l.s8.bf16 %v1880_v43  ;;  %v2320_v48 = vunpack.c.l.s8.bf16 %v1944_v44 }
 0x2ce   : > { %2599 = vmatprep.subr.bf16.mxu0 %v2112_v51  ;;  %2640 = vmatprep.subr.bf16.mxu1 %v2240_v52  ;;  %v2191_v51 = vunpack.c.l.s8.bf16 %v1879_v49  ;;  %v2319_v52 = vunpack.c.l.s8.bf16 %v1943_v50 }
 0x2d1   : > { %2600 = vmatpush1.bf16.msra.mxu0 %v2111_v55  ;;  %2641 = vmatpush1.bf16.msra.mxu1 %v2239_v56  ;;  %v2199_v55 = vunpack.c.h.s8.bf16 %v1879_v49  ;;  %v2327_v56 = vunpack.c.h.s8.bf16 %v1943_v50 }
 0x2d2   : > { %2601 = vmatprep.subr.bf16.mxu0 %v2120_v57  ;;  %2642 = vmatprep.subr.bf16.mxu1 %v2248_v58  ;;  %v4617_v57 = vld [vmem:[%s4412_s29 + $0x408] sm:$0xff] }
 0x2d3   : > { %v4620_v58 = vld [vmem:[%s4412_s29 + $0x608] sm:$0xff] }
 0x2d5   : > { %2602 = vmatpush1.bf16.msra.mxu0 %v2119_v59  ;;  %2643 = vmatpush1.bf16.msra.mxu1 %v2247_v60  ;;  %v2336_v59 = vunpack.c.l.s8.bf16 %v4617_v57  ;;  %v2464_v60 = vunpack.c.l.s8.bf16 %v4620_v58 }
 0x2d6   : > { %2603 = vmatprep.subr.bf16.mxu0 %v2128_v4  ;;  %2644 = vmatprep.subr.bf16.mxu1 %v2256_v5  ;;  %v4628_v4 = vsub.s32 2, %v4625_v62  ;;  %v4633_v5 = vld [vmem:[%s4630_s16] sm:$0x77] }
 0x2d9   : > { %2604 = vmatpush1.bf16.msra.mxu0 %v2127_v7  ;;  %2645 = vmatpush1.bf16.msra.mxu1 %v2255_v63  ;;  %v1393_v7 = vrot.slane %v4633_v5, %v4628_v4  ;;  %v1401_v63 = vrot.slane %v4636_v13, %v4628_v4 }
 0x2da   : > { %2605 = vmatprep.subr.bf16.mxu0 %v2136_v16  ;;  %2646 = vmatprep.subr.bf16.mxu1 %v2264_v10  ;;  %v1397_v16 = vrot.slane %v4633_v5, %v4639_v6  ;;  %v1405_v10 = vrot.slane %v4636_v13, %v4639_v6 }
 0x2dc   : > { %v1437_v18 = vrot.slane %v1397_v16, %v4628_v4  ;;  %v1445_v19 = vrot.slane %v1405_v10, %v4628_v4 }
 0x2dd   : > { %2606 = vmatpush1.bf16.msra.mxu0 %v2135_v11  ;;  %2647 = vmatpush1.bf16.msra.mxu1 %v2263_v8  ;;  %v1433_v11 = vrot.slane %v1393_v7, %v4628_v4  ;;  %v1441_v8 = vrot.slane %v1401_v63, %v4628_v4 }
 0x2de   : > { %2607 = vmatprep.subr.bf16.mxu0 %v2144_v0  ;;  %2648 = vmatprep.subr.bf16.mxu1 %v2272_v46 }
 0x2e1   : > { %2608 = vmatpush1.bf16.msra.mxu0 %v2143_v14  ;;  %2649 = vmatpush1.bf16.msra.mxu1 %v2271_v21 }
 0x2e2   : > { %2609 = vmatprep.subr.bf16.mxu0 %v2152_v9  ;;  %2650 = vmatprep.subr.bf16.mxu1 %v2280_v3 }
 0x2e5   : > { %2610 = vmatpush1.bf16.msra.mxu0 %v2151_v20  ;;  %2651 = vmatpush1.bf16.msra.mxu1 %v2279_v47 }
 0x2e6   : > { %2611 = vmatprep.subr.bf16.mxu0 %v2160_v26  ;;  %2652 = vmatprep.subr.bf16.mxu1 %v2288_v27 }
 0x2e9   : > { %2612 = vmatpush1.bf16.msra.mxu0 %v2159_v28  ;;  %2653 = vmatpush1.bf16.msra.mxu1 %v2287_v29 }
 0x2ea   : > { %2613 = vmatprep.subr.bf16.mxu0 %v2168_v31  ;;  %2654 = vmatprep.subr.bf16.mxu1 %v2296_v32 }
 0x2ed   : > { %2614 = vmatpush1.bf16.msra.mxu0 %v2167_v30  ;;  %2655 = vmatpush1.bf16.msra.mxu1 %v2295_v12 }
 0x2ee   : > { %2615 = vmatprep.subr.bf16.mxu0 %v2176_v35  ;;  %2656 = vmatprep.subr.bf16.mxu1 %v2304_v36 }
 0x2f1   : > { %2616 = vmatpush1.bf16.msra.mxu0 %v2175_v39  ;;  %2657 = vmatpush1.bf16.msra.mxu1 %v2303_v40 }
 0x2f2   : > { %2617 = vmatprep.subr.bf16.mxu0 %v2184_v41  ;;  %2658 = vmatprep.subr.bf16.mxu1 %v2312_v42 }
 0x2f5   : > { %2618 = vmatpush1.bf16.msra.mxu0 %v2183_v2  ;;  %2659 = vmatpush1.bf16.msra.mxu1 %v2311_v45 }
 0x2f6   : > { %2619 = vmatprep.subr.bf16.mxu0 %v2192_v15  ;;  %2660 = vmatprep.subr.bf16.mxu1 %v2320_v48 }
 0x2f9   : > { %2620 = vmatpush1.bf16.msra.mxu0 %v2191_v51  ;;  %2661 = vmatpush1.bf16.msra.mxu1 %v2319_v52 }
 0x2fa   : > { %2621 = vmatprep.subr.bf16.mxu0 %v2200_v53  ;;  %2662 = vmatprep.subr.bf16.mxu1 %v2328_v54 }
 0x2fd   : > { %2622 = vmatpush1.bf16.msra.mxu0 %v2199_v55  ;;  %2663 = vmatpush1.bf16.msra.mxu1 %v2327_v56 }
 0x2fe   : > { %2673 = vmatprep.subr.bf16.mxu0 %v2336_v59  ;;  %2714 = vmatprep.subr.bf16.mxu1 %v2464_v60 }
 0x353   : > { %v1256_v0 = vpop.f32.mrb[0].mxu0  ;;  %v1297_v46 = vpop.f32.mrb[0].mxu1 }
 0x354   : > { %v1462_v1 = vmul.f32 %v1433_v11, %v1256_v0  ;;  %v1464_v17 = vmul.f32 %v1441_v8, %v1297_v46  ;;  %v1258_v14 = vpop.f32.mrb[1].mxu0  ;;  %v1299_v21 = vpop.f32.mrb[1].mxu1 }
 0x355   : > { %v1463_v9 = vmul.f32 %v1437_v18, %v1258_v14  ;;  %v1465_v3 = vmul.f32 %v1445_v19, %v1299_v21  ;;  %v1260_v20 = vpop.f32.mrb[2].mxu0  ;;  %v1301_v47 = vpop.f32.mrb[2].mxu1 }
 0x356   : > { %v1470_v22 = vrot.slane %v1462_v1, 4  ;;  %v1482_v23 = vrot.slane %v1464_v17, 4  ;;  %v1261_v26 = vpop.f32.mrb[3].mxu0  ;;  %v1302_v27 = vpop.f32.mrb[3].mxu1 }
 0x357   : > { %v1476_v24 = vrot.slane %v1463_v9, 4  ;;  %v1488_v25 = vrot.slane %v1465_v3, 4 }
 0x358   : > { %v1471_v28 = vadd.f32 %v1470_v22, %v1462_v1  ;;  %v1483_v29 = vadd.f32 %v1482_v23, %v1464_v17 }
 0x359   : > { %v1477_v31 = vadd.f32 %v1476_v24, %v1463_v9  ;;  %v1489_v32 = vadd.f32 %v1488_v25, %v1465_v3 }
 0x35a   : > { %v1472_v30 = vrot.slane %v1471_v28, 2  ;;  %v1484_v12 = vrot.slane %v1483_v29, 2 }
 0x35b   : > { %v1478_v33 = vrot.slane %v1477_v31, 2  ;;  %v1490_v34 = vrot.slane %v1489_v32, 2 }
 0x35c   : > { %v1473_v35 = vadd.f32 %v1472_v30, %v1471_v28  ;;  %v1485_v36 = vadd.f32 %v1484_v12, %v1483_v29 }
 0x35d   : > { %v1479_v37 = vadd.f32 %v1478_v33, %v1477_v31  ;;  %v1491_v38 = vadd.f32 %v1490_v34, %v1489_v32  ;;  %v4666_v34 = vsub.s32 0, %v4625_v62 }
 0x35e   : > { %v1474_v39 = vrot.slane %v1473_v35, 1  ;;  %v1486_v40 = vrot.slane %v1485_v36, 1 }
 0x35f   : > { %v1480_v41 = vrot.slane %v1479_v37, 1  ;;  %v1492_v42 = vrot.slane %v1491_v38, 1 }
 0x360   : > { %v1475_v2 = vadd.f32 %v1474_v39, %v1473_v35  ;;  %v1487_v43 = vadd.f32 %v1486_v40, %v1485_v36  ;;  %v4669_v35 = vsub.s32 1, %v4625_v62  ;;  %v4672_v36 = vsub.s32 4, %v4625_v62 }
 0x361   : > { %v1481_v44 = vadd.f32 %v1480_v41, %v1479_v37  ;;  %v1493_v45 = vadd.f32 %v1492_v42, %v1491_v38  ;;  %v1626_v37 = vrot.slane %v4633_v5, %v4666_v34  ;;  %v4677_v38 = vsub.s32 5, %v4625_v62 }
 0x362   : > { %v1519_v15 = vmul.f32 0.125, %v1475_v2  ;;  %v1521_v48 = vmul.f32 0.125, %v1487_v43  ;;  %v1634_v39 = vrot.slane %v4636_v13, %v4666_v34  ;;  %v1706_v40 = vrot.slane %v4633_v5, %v4669_v35 }
 0x363   : > { %v1520_v49 = vmul.f32 0.125, %v1481_v44  ;;  %v1522_v50 = vmul.f32 0.125, %v1493_v45  ;;  %v1630_v41 = vrot.slane %v4633_v5, %v4672_v36  ;;  %v1714_v42 = vrot.slane %v4636_v13, %v4669_v35 }
 0x364   : > { %v1527_v51 = vsub.f32 %v1462_v1, %v1519_v15  ;;  %v4653_v52 = vsub.f32 %v1464_v17, %v1521_v48  ;;  %v1638_v2 = vrot.slane %v4636_v13, %v4672_v36  ;;  %v1666_v43 = vrot.slane %v1626_v37, %v4666_v34 }
 0x365   : > { %v4655_v53 = vsub.f32 %v1463_v9, %v1520_v49  ;;  %v4657_v54 = vsub.f32 %v1465_v3, %v1522_v50  ;;  %v1710_v44 = vrot.slane %v4633_v5, %v4677_v38  ;;  %v1674_v15 = vrot.slane %v1634_v39, %v4666_v34 }
 0x366   : > { %v1535_v55 = vmul.f32 %v1527_v51, %v1527_v51  ;;  %v1537_v56 = vmul.f32 %v4653_v52, %v4653_v52  ;;  %v1718_v48 = vrot.slane %v4636_v13, %v4677_v38  ;;  %v1678_v5 = vrot.slane %v1638_v2, %v4666_v34  ;;  %v2024_v2 = vld [vmem:[%s4412_s29 + $0x648] sm:$0xff] }
 0x367   : > { %v1536_v59 = vmul.f32 %v4655_v53, %v4655_v53  ;;  %v1538_v60 = vmul.f32 %v4657_v54, %v4657_v54  ;;  %v1750_v13 = vrot.slane %v1710_v44, %v4669_v35 }
 0x368   : > { %v1543_v61 = vrot.slane %v1535_v55, 4  ;;  %v1555_v7 = vrot.slane %v1537_v56, 4 }
 0x369   : > { %v1549_v63 = vrot.slane %v1536_v59, 4  ;;  %v1561_v16 = vrot.slane %v1538_v60, 4 }
 0x36a   : > { %v1544_v10 = vadd.f32 %v1543_v61, %v1535_v55  ;;  %v1556_v11 = vadd.f32 %v1555_v7, %v1537_v56  ;;  %v1746_v55 = vrot.slane %v1706_v40, %v4669_v35  ;;  %v1670_v56 = vrot.slane %v1630_v41, %v4666_v34  ;;  %v1960_v41 = vld [vmem:[%s4412_s29 + $0x448] sm:$0xff] }
 0x36b   : > { %v1550_v8 = vadd.f32 %v1549_v63, %v1536_v59  ;;  %v1562_v18 = vadd.f32 %v1561_v16, %v1538_v60  ;;  %v1754_v61 = vrot.slane %v1714_v42, %v4669_v35  ;;  %v2472_v40 = vunpack.c.h.s8.bf16 %v4620_v58 }
 0x36c   : > { %v1545_v19 = vrot.slane %v1544_v10, 2  ;;  %v1557_v0 = vrot.slane %v1556_v11, 2 }
 0x36d   : > { %v1551_v46 = vrot.slane %v1550_v8, 2  ;;  %v1563_v1 = vrot.slane %v1562_v18, 2 }
 0x36e   : > { %v1546_v17 = vadd.f32 %v1545_v19, %v1544_v10  ;;  %v1558_v14 = vadd.f32 %v1557_v0, %v1556_v11  ;;  %v1758_v11 = vrot.slane %v1718_v48, %v4669_v35  ;;  %v4705_v0 = vld [vmem:[%s4630_s16 + $0x10] sm:$0x77] }
 0x36f   : > { %v1552_v21 = vadd.f32 %v1551_v46, %v1550_v8  ;;  %v1564_v9 = vadd.f32 %v1563_v1, %v1562_v18  ;;  %v1959_v48 = vld [vmem:[%s4412_s29 + $0x440] sm:$0xff] }
 0x370   : > { %v1547_v3 = vrot.slane %v1546_v17, 1  ;;  %v1559_v20 = vrot.slane %v1558_v14, 1 }
 0x371   : > { %v1553_v47 = vrot.slane %v1552_v21, 1  ;;  %v1565_v22 = vrot.slane %v1564_v9, 1 }
 0x372   : > { %v1548_v23 = vadd.f32 %v1547_v3, %v1546_v17  ;;  %v1560_v26 = vadd.f32 %v1559_v20, %v1558_v14  ;;  %v4708_v17 = vld [vmem:[%s4630_s16 + $0x18] sm:$0x77] }
 0x373   : > { %v1554_v27 = vadd.f32 %v1553_v47, %v1552_v21  ;;  %v1566_v24 = vadd.f32 %v1565_v22, %v1564_v9  ;;  %v1951_v21 = vld [vmem:[%s4412_s29 + $0x400] sm:$0xff]  ;;  %v1409_v9 = vrot.slane %v4705_v0, %v4628_v4  ;;  %v1417_v22 = vrot.slane %v4708_v17, %v4628_v4 }
 0x374   : > { %v1591_v25 = vmul.f32 0.125, %v1548_v23  ;;  %v1593_v28 = vmul.f32 0.125, %v1560_v26  ;;  %v2015_v47 = vld [vmem:[%s4412_s29 + $0x600] sm:$0xff] }
 0x375   : > { %v1592_v29 = vmul.f32 0.125, %v1554_v27  ;;  %v1594_v31 = vmul.f32 0.125, %v1566_v24  ;;  %v1413_v27 = vrot.slane %v4705_v0, %v4639_v6  ;;  %v1421_v24 = vrot.slane %v4708_v17, %v4639_v6 }
 0x376   : > { %v1599_v32 = vadd.f32 1e-05, %v1591_v25  ;;  %v1601_v30 = vadd.f32 1e-05, %v1593_v28  ;;  %v1449_v37 = vrot.slane %v1409_v9, %v4628_v4  ;;  %v1457_v39 = vrot.slane %v1417_v22, %v4628_v4  ;;  %v2032_v9 = vld [vmem:[%s4412_s29 + $0x688] sm:$0xff] }
 0x377   : > { %v1600_v12 = vadd.f32 1e-05, %v1592_v29  ;;  %v1602_v33 = vadd.f32 1e-05, %v1594_v31  ;;  %v2335_v29 = vunpack.c.l.s8.bf16 %v1951_v21  ;;  %v1453_v42 = vrot.slane %v1413_v27, %v4628_v4 }
 0x378   : > { %3897 = vrsqrt.f32 %v1599_v32  ;;  %v2471_v58 = vunpack.c.h.s8.bf16 %v2015_v47 }
 0x379   : > { %3899 = vrsqrt.f32 %v1601_v30  ;;  %v2463_v30 = vunpack.c.l.s8.bf16 %v2015_v47  ;;  %v2359_v47 = vunpack.c.h.s8.bf16 %v1959_v48 }
 0x37a   : > { %3901 = vrsqrt.f32 %v1600_v12  ;;  %v2344_v12 = vunpack.c.h.s8.bf16 %v4617_v57  ;;  %v1461_v57 = vrot.slane %v1421_v24, %v4628_v4  ;;  %v1967_v24 = vld [vmem:[%s4412_s29 + $0x480] sm:$0xff] }
 0x37b   : > { %3903 = vrsqrt.f32 %v1602_v33 }
 0x382   : > { %v3898_v45 = vpop.eup %3897 }
 0x383   : > { %v3900_v49 = vpop.eup %3899  ;;  %v1615_v50 = vmul.f32 %v3898_v45, %v1527_v51 }
 0x384   : > { %v3902_v59 = vpop.eup %3901  ;;  %v1617_v60 = vmul.f32 %v3900_v49, %v4653_v52 }
 0x385   : > { %v3904_v7 = vpop.eup %3903  ;;  %v1695_v63 = vmul.f32 %v1666_v43, %v1615_v50  ;;  %v1616_v16 = vmul.f32 %v3902_v59, %v4655_v53  ;;  %v2343_v43 = vunpack.c.h.s8.bf16 %v1951_v21  ;;  %v2480_v59 = vunpack.c.l.s8.bf16 %v2024_v2 }
 0x386   : > { %v1697_v51 = vmul.f32 %v1674_v15, %v1617_v60  ;;  %v1618_v10 = vmul.f32 %v3904_v7, %v4657_v54  ;;  %v2352_v15 = vunpack.c.l.s8.bf16 %v1960_v41  ;;  %v2023_v60 = vld [vmem:[%s4412_s29 + $0x640] sm:$0xff] }
 0x387   : > { %v1775_v8 = vadd.f32 %v1746_v55, %v1695_v63  ;;  %v1696_v18 = vmul.f32 %v1670_v56, %v1616_v16 }
 0x388   : > { %v1777_v52 = vadd.f32 %v1754_v61, %v1697_v51  ;;  %v1698_v19 = vmul.f32 %v1678_v5, %v1618_v10 }
 0x389   : > { %v1776_v46 = vadd.f32 %v1750_v13, %v1696_v18  ;;  %vm1783_vm8 = vcmp.ge.f32.partialorder %v1775_v8, 0.0  ;;  %v1791_v1 = vmul.f32 0.01, %v1775_v8 }
 0x38a   : > { %v1778_v53 = vadd.f32 %v1758_v11, %v1698_v19  ;;  %vm1785_vm9 = vcmp.ge.f32.partialorder %v1777_v52, 0.0  ;;  %v1793_v14 = vmul.f32 0.01, %v1777_v52  ;;  %v2351_v11 = vunpack.c.l.s8.bf16 %v1959_v48  ;;  %v1976_v48 = vld [vmem:[%s4412_s29 + $0x4c8] sm:$0xff] }
 0x38b   : > { %vm1784_vm10 = vcmp.ge.f32.partialorder %v1776_v46, 0.0  ;;  %v1792_v54 = vmul.f32 0.01, %v1776_v46  ;;  %v1799_v20 = vsel %vm1783_vm8, %v1775_v8, %v1791_v1  ;;  %v2360_v19 = vunpack.c.h.s8.bf16 %v1960_v41 }
 0x38c   : > { %vm1786_vm11 = vcmp.ge.f32.partialorder %v1778_v53, 0.0  ;;  %v1794_v3 = vmul.f32 0.01, %v1778_v53  ;;  %v1801_v26 = vsel %vm1785_vm9, %v1777_v52, %v1793_v14  ;;  %v4724_v32 = vpack.c.bf16 %v1799_v20, %v1799_v20  ;;  %v1968_v14 = vld [vmem:[%s4412_s29 + $0x488] sm:$0xff] }
 0x38d   : > { %v1800_v23 = vsel %vm1784_vm10, %v1776_v46, %v1792_v54  ;;  %v4728_v33 = vpack.c.bf16 %v1801_v26, %v1801_v26  ;;  %v2479_v52 = vunpack.c.l.s8.bf16 %v2023_v60  ;;  %v2487_v26 = vunpack.c.h.s8.bf16 %v2023_v60 }
 0x38e   : > { %v4720_v25 = vpack.c.bf16 %v1800_v23, %v1800_v23  ;;  %v1802_v28 = vsel %vm1786_vm11, %v1778_v53, %v1794_v3  ;;  %v2488_v53 = vunpack.c.h.s8.bf16 %v2024_v2  ;;  %v2368_v27 = vunpack.c.l.s8.bf16 %v1968_v14 }
 0x38f   : > { %v4722_v31 = vpack.c.bf16 %v1802_v28, %v1802_v28 }
 0x390   : > { %2623 = vmatprep.mubr.bf16.mxu0 %v4720_v25 }
 0x391   : > { %2664 = vmatprep.mubr.bf16.mxu1 %v4722_v31  ;;  %2624 = vmatmul.mubr.bf16.vlgmr.msra.gmra.mrb[8].mxu0 %v4724_v32 }
 0x392   : > { %2665 = vmatmul.mubr.bf16.vlgmr.msra.gmra.mrb[8].mxu1 %v4728_v33  ;;  %2674 = vmatpush1.bf16.msra.mxu0 %v2335_v29 }
 0x393   : > { %2715 = vmatpush1.bf16.msra.mxu1 %v2463_v30  ;;  %v1338_v44 = vpop.f32.mrb[4].mxu0  ;;  %v1379_v45 = vpop.f32.mrb[4].mxu1  ;;  %2675 = vmatprep.subr.bf16.mxu0 %v2344_v12  ;;  %v2496_v30 = vunpack.c.l.s8.bf16 %v2032_v9  ;;  %v2031_v12 = vld [vmem:[%s4412_s29 + $0x680] sm:$0xff] }
 0x394   : > { %v4741_v49 = vmul.f32 %v1449_v37, %v1338_v44  ;;  %v4743_v50 = vmul.f32 %v1457_v39, %v1379_v45  ;;  %2716 = vmatprep.subr.bf16.mxu1 %v2472_v40  ;;  %v1340_v55 = vpop.f32.mrb[5].mxu0  ;;  %v1381_v56 = vpop.f32.mrb[5].mxu1  ;;  %v2376_v44 = vunpack.c.h.s8.bf16 %v1968_v14 }
 0x395   : > { %v4746_v61 = vmul.f32 %v1453_v42, %v1340_v55  ;;  %v4748_v5 = vmul.f32 %v1461_v57, %v1381_v56  ;;  %v1342_v7 = vpop.f32.mrb[6].mxu0  ;;  %v1383_v63 = vpop.f32.mrb[6].mxu1  ;;  %v2367_v42 = vunpack.c.l.s8.bf16 %v1967_v24 }
 0x396   : > { %v1494_v16 = vrot.slane %v4741_v49, 4  ;;  %v1506_v13 = vrot.slane %v4743_v50, 4  ;;  %2676 = vmatpush1.bf16.msra.mxu0 %v2343_v43  ;;  %v1343_v51 = vpop.f32.mrb[7].mxu0  ;;  %v1384_v10 = vpop.f32.mrb[7].mxu1  ;;  %v2495_v43 = vunpack.c.l.s8.bf16 %v2031_v12  ;;  %v2375_v63 = vunpack.c.h.s8.bf16 %v1967_v24 }
 0x397   : > { %v1500_v8 = vrot.slane %v4746_v61, 4  ;;  %v1512_v18 = vrot.slane %v4748_v5, 4  ;;  %2717 = vmatpush1.bf16.msra.mxu1 %v2471_v58  ;;  %2677 = vmatprep.subr.bf16.mxu0 %v2352_v15  ;;  %v2504_v15 = vunpack.c.h.s8.bf16 %v2032_v9  ;;  %v2503_v51 = vunpack.c.h.s8.bf16 %v2031_v12 }
 0x398   : > { %v1495_v46 = vadd.f32 %v1494_v16, %v4741_v49  ;;  %v1507_v1 = vadd.f32 %v1506_v13, %v4743_v50  ;;  %2718 = vmatprep.subr.bf16.mxu1 %v2480_v59  ;;  %v2040_v59 = vld [vmem:[%s4412_s29 + $0x6c8] sm:$0xff]  ;;  %v2384_v10 = vunpack.c.l.s8.bf16 %v1976_v48 }
 0x399   : > { %v1501_v54 = vadd.f32 %v1500_v8, %v4746_v61  ;;  %v1513_v21 = vadd.f32 %v1512_v18, %v4748_v5 }
 0x39a   : > { %v1496_v3 = vrot.slane %v1495_v46, 2  ;;  %v1508_v20 = vrot.slane %v1507_v1, 2  ;;  %2678 = vmatpush1.bf16.msra.mxu0 %v2351_v11  ;;  %v1975_v11 = vld [vmem:[%s4412_s29 + $0x4c0] sm:$0xff] }
 0x39b   : > { %v1502_v22 = vrot.slane %v1501_v54, 2  ;;  %v1514_v23 = vrot.slane %v1513_v21, 2  ;;  %2719 = vmatpush1.bf16.msra.mxu1 %v2479_v52  ;;  %2679 = vmatprep.subr.bf16.mxu0 %v2360_v19  ;;  %v2512_v52 = vunpack.c.l.s8.bf16 %v2040_v59  ;;  %v2039_v19 = vld [vmem:[%s4412_s29 + $0x6c0] sm:$0xff]  ;;  %v2391_v24 = vunpack.c.h.s8.bf16 %v1975_v11 }
 0x39c   : > { %v1497_v28 = vadd.f32 %v1496_v3, %v1495_v46  ;;  %v1509_v29 = vadd.f32 %v1508_v20, %v1507_v1  ;;  %2720 = vmatprep.subr.bf16.mxu1 %v2488_v53  ;;  %v2520_v3 = vunpack.c.h.s8.bf16 %v2040_v59  ;;  %v1984_v20 = vld [vmem:[%s4412_s29 + $0x508] sm:$0xff] }
 0x39d   : > { %v1503_v37 = vadd.f32 %v1502_v22, %v1501_v54  ;;  %v1515_v39 = vadd.f32 %v1514_v23, %v1513_v21  ;;  %v2511_v54 = vunpack.c.l.s8.bf16 %v2039_v19  ;;  %v2048_v23 = vld [vmem:[%s4412_s29 + $0x708] sm:$0xff]  ;;  %v2400_v12 = vunpack.c.l.s8.bf16 %v1984_v20 }
 0x39e   : > { %v1498_v40 = vrot.slane %v1497_v28, 1  ;;  %v1510_v41 = vrot.slane %v1509_v29, 1  ;;  %2680 = vmatpush1.bf16.msra.mxu0 %v2359_v47 }
 0x39f   : > { %v1504_v57 = vrot.slane %v1503_v37, 1  ;;  %v1516_v2 = vrot.slane %v1515_v39, 1  ;;  %2721 = vmatpush1.bf16.msra.mxu1 %v2487_v26  ;;  %2681 = vmatprep.subr.bf16.mxu0 %v2368_v27 }
 0x3a0   : > { %v1499_v45 = vadd.f32 %v1498_v40, %v1497_v28  ;;  %v1511_v58 = vadd.f32 %v1510_v41, %v1509_v29  ;;  %2722 = vmatprep.subr.bf16.mxu1 %v2496_v30  ;;  %v2519_v30 = vunpack.c.h.s8.bf16 %v2039_v19  ;;  %v2528_v41 = vunpack.c.l.s8.bf16 %v2048_v23 }
 0x3a1   : > { %v1505_v55 = vadd.f32 %v1504_v57, %v1503_v37  ;;  %v1517_v56 = vadd.f32 %v1516_v2, %v1515_v39  ;;  %v1983_v37 = vld [vmem:[%s4412_s29 + $0x500] sm:$0xff] }
 0x3a2   : > { %v1523_v60 = vmul.f32 0.125, %v1499_v45  ;;  %v1525_v7 = vmul.f32 0.125, %v1511_v58  ;;  %2682 = vmatpush1.bf16.msra.mxu0 %v2367_v42  ;;  %v2047_v42 = vld [vmem:[%s4412_s29 + $0x700] sm:$0xff]  ;;  %v2399_v45 = vunpack.c.l.s8.bf16 %v1983_v37 }
 0x3a3   : > { %v1524_v16 = vmul.f32 0.125, %v1505_v55  ;;  %v1526_v13 = vmul.f32 0.125, %v1517_v56  ;;  %2723 = vmatpush1.bf16.msra.mxu1 %v2495_v43  ;;  %2683 = vmatprep.subr.bf16.mxu0 %v2376_v44  ;;  %v2408_v55 = vunpack.c.h.s8.bf16 %v1984_v20 }
 0x3a4   : > { %v4766_v8 = vsub.f32 %v4741_v49, %v1523_v60  ;;  %v4769_v18 = vsub.f32 %v4743_v50, %v1525_v7  ;;  %2724 = vmatprep.subr.bf16.mxu1 %v2504_v15  ;;  %v2383_v50 = vunpack.c.l.s8.bf16 %v1975_v11  ;;  %v2536_v60 = vunpack.c.h.s8.bf16 %v2048_v23  ;;  %v1992_v7 = vld [vmem:[%s4412_s29 + $0x548] sm:$0xff] }
 0x3a5   : > { %v4773_v46 = vsub.f32 %v4746_v61, %v1524_v16  ;;  %v4776_v1 = vsub.f32 %v4748_v5, %v1526_v13  ;;  %v2392_v5 = vunpack.c.h.s8.bf16 %v1976_v48  ;;  %v2527_v48 = vunpack.c.l.s8.bf16 %v2047_v42  ;;  %v2056_v13 = vld [vmem:[%s4412_s29 + $0x748] sm:$0xff] }
 0x3a6   : > { %v1539_v53 = vmul.f32 %v4766_v8, %v4766_v8  ;;  %v1541_v49 = vmul.f32 %v4769_v18, %v4769_v18  ;;  %2684 = vmatpush1.bf16.msra.mxu0 %v2375_v63  ;;  %v2407_v11 = vunpack.c.h.s8.bf16 %v1983_v37 }
 0x3a7   : > { %v1540_v14 = vmul.f32 %v4773_v46, %v4773_v46  ;;  %v1542_v61 = vmul.f32 %v4776_v1, %v4776_v1  ;;  %2725 = vmatpush1.bf16.msra.mxu1 %v2503_v51  ;;  %2685 = vmatprep.subr.bf16.mxu0 %v2384_v10 }
 0x3a8   : > { %v1567_v21 = vrot.slane %v1539_v53, 4  ;;  %v1579_v9 = vrot.slane %v1541_v49, 4  ;;  %2726 = vmatprep.subr.bf16.mxu1 %v2512_v52 }
 0x3a9   : > { %v1573_v47 = vrot.slane %v1540_v14, 4  ;;  %v1585_v22 = vrot.slane %v1542_v61, 4 }
 0x3aa   : > { %v1568_v26 = vadd.f32 %v1567_v21, %v1539_v53  ;;  %v1580_v27 = vadd.f32 %v1579_v9, %v1541_v49  ;;  %2686 = vmatpush1.bf16.msra.mxu0 %v2383_v50  ;;  %v2535_v53 = vunpack.c.h.s8.bf16 %v2047_v42  ;;  %v2416_v49 = vunpack.c.l.s8.bf16 %v1992_v7  ;;  %v1991_v50 = vld [vmem:[%s4412_s29 + $0x540] sm:$0xff] }
 0x3ab   : > { %v1574_v28 = vadd.f32 %v1573_v47, %v1540_v14  ;;  %v1586_v29 = vadd.f32 %v1585_v22, %v1542_v61  ;;  %2727 = vmatpush1.bf16.msra.mxu1 %v2511_v54  ;;  %2687 = vmatprep.subr.bf16.mxu0 %v2392_v5  ;;  %v2544_v54 = vunpack.c.l.s8.bf16 %v2056_v13  ;;  %v2055_v5 = vld [vmem:[%s4412_s29 + $0x740] sm:$0xff]  ;;  %v2415_v47 = vunpack.c.l.s8.bf16 %v1991_v50 }
 0x3ac   : > { %v1569_v39 = vrot.slane %v1568_v26, 2  ;;  %v1581_v40 = vrot.slane %v1580_v27, 2  ;;  %2728 = vmatprep.subr.bf16.mxu1 %v2520_v3  ;;  %v1642_v42 = vrot.slane %v4705_v0, %v4666_v34 }
 0x3ad   : > { %v1575_v57 = vrot.slane %v1574_v28, 2  ;;  %v1587_v2 = vrot.slane %v1586_v29, 2 }
 0x3ae   : > { %v1570_v43 = vadd.f32 %v1569_v39, %v1568_v26  ;;  %v1582_v44 = vadd.f32 %v1581_v40, %v1580_v27  ;;  %2688 = vmatpush1.bf16.msra.mxu0 %v2391_v24  ;;  %v2543_v26 = vunpack.c.l.s8.bf16 %v2055_v5  ;;  %v2424_v27 = vunpack.c.h.s8.bf16 %v1992_v7  ;;  %v1999_v39 = vld [vmem:[%s4412_s29 + $0x580] sm:$0xff]  ;;  %v2072_v7 = vld [vmem:[%s4412_s29 + $0x7c8] sm:$0xff] }
 0x3af   : > { %v1576_v58 = vadd.f32 %v1575_v57, %v1574_v28  ;;  %v1588_v15 = vadd.f32 %v1587_v2, %v1586_v29  ;;  %2729 = vmatpush1.bf16.msra.mxu1 %v2519_v30  ;;  %2689 = vmatprep.subr.bf16.mxu0 %v2400_v12  ;;  %v2552_v24 = vunpack.c.h.s8.bf16 %v2056_v13  ;;  %v2000_v28 = vld [vmem:[%s4412_s29 + $0x588] sm:$0xff]  ;;  %v2423_v30 = vunpack.c.h.s8.bf16 %v1991_v50 }
 0x3b0   : > { %v1571_v56 = vrot.slane %v1570_v43, 1  ;;  %v1583_v59 = vrot.slane %v1582_v44, 1  ;;  %2730 = vmatprep.subr.bf16.mxu1 %v2528_v41  ;;  %v2064_v29 = vld [vmem:[%s4412_s29 + $0x788] sm:$0xff]  ;;  %v2551_v12 = vunpack.c.h.s8.bf16 %v2055_v5  ;;  %v2432_v37 = vunpack.c.l.s8.bf16 %v2000_v28  ;;  %v2063_v41 = vld [vmem:[%s4412_s29 + $0x780] sm:$0xff] }
 0x3b1   : > { %v1577_v63 = vrot.slane %v1576_v58, 1  ;;  %v1589_v16 = vrot.slane %v1588_v15, 1  ;;  %v2560_v40 = vunpack.c.l.s8.bf16 %v2064_v29  ;;  %v1650_v57 = vrot.slane %v4708_v17, %v4666_v34  ;;  %v2071_v5 = vld [vmem:[%s4412_s29 + $0x7c0] sm:$0xff] }
 0x3b2   : > { %v1572_v51 = vadd.f32 %v1571_v56, %v1570_v43  ;;  %v1584_v10 = vadd.f32 %v1583_v59, %v1582_v44  ;;  %2690 = vmatpush1.bf16.msra.mxu0 %v2399_v45  ;;  %v2431_v2 = vunpack.c.l.s8.bf16 %v1999_v39  ;;  %v1722_v43 = vrot.slane %v4705_v0, %v4669_v35  ;;  %v2008_v56 = vld [vmem:[%s4412_s29 + $0x5c8] sm:$0xff] }
 0x3b3   : > { %v1578_v52 = vadd.f32 %v1577_v63, %v1576_v58  ;;  %v1590_v19 = vadd.f32 %v1589_v16, %v1588_v15  ;;  %2731 = vmatpush1.bf16.msra.mxu1 %v2527_v48  ;;  %2691 = vmatprep.subr.bf16.mxu0 %v2408_v55  ;;  %v1646_v44 = vrot.slane %v4705_v0, %v4672_v36  ;;  %v2559_v45 = vunpack.c.l.s8.bf16 %v2063_v41 }
 0x3b4   : > { %v1595_v14 = vmul.f32 0.125, %v1572_v51  ;;  %v1597_v61 = vmul.f32 0.125, %v1584_v10  ;;  %2732 = vmatprep.subr.bf16.mxu1 %v2536_v60  ;;  %v2440_v58 = vunpack.c.h.s8.bf16 %v2000_v28  ;;  %v1730_v15 = vrot.slane %v4708_v17, %v4669_v35 }
 0x3b5   : > { %v1596_v21 = vmul.f32 0.125, %v1578_v52  ;;  %v1598_v9 = vmul.f32 0.125, %v1590_v19  ;;  %v1654_v48 = vrot.slane %v4708_v17, %v4672_v36  ;;  %v2568_v55 = vunpack.c.h.s8.bf16 %v2064_v29 }
 0x3b6   : > { %v1603_v3 = vadd.f32 1e-05, %v1595_v14  ;;  %v1605_v20 = vadd.f32 1e-05, %v1597_v61  ;;  %2692 = vmatpush1.bf16.msra.mxu0 %v2407_v11  ;;  %v1682_v59 = vrot.slane %v1642_v42, %v4666_v34  ;;  %v1726_v60 = vrot.slane %v4705_v0, %v4677_v38 }
 0x3b7   : > { %v1604_v22 = vadd.f32 1e-05, %v1596_v21  ;;  %v1606_v23 = vadd.f32 1e-05, %v1598_v9  ;;  %2733 = vmatpush1.bf16.msra.mxu1 %v2535_v53  ;;  %2693 = vmatprep.subr.bf16.mxu0 %v2416_v49  ;;  %v1690_v16 = vrot.slane %v1650_v57, %v4666_v34  ;;  %v1734_v13 = vrot.slane %v4708_v17, %v4677_v38  ;;  %v2007_v49 = vld [vmem:[%s4412_s29 + $0x5c0] sm:$0xff] }
 0x3b8   : > { %3905 = vrsqrt.f32 %v1603_v3  ;;  %2734 = vmatprep.subr.bf16.mxu1 %v2544_v54  ;;  %v2439_v51 = vunpack.c.h.s8.bf16 %v1999_v39  ;;  %v2567_v10 = vunpack.c.h.s8.bf16 %v2063_v41  ;;  %v1762_v19 = vrot.slane %v1722_v43, %v4669_v35  ;;  %v1825_v43 = vld [vmem:[%s4412_s29 + $0x10] sm:$0xff] }
 0x3b9   : > { %3907 = vrsqrt.f32 %v1605_v20  ;;  %v1686_v53 = vrot.slane %v1646_v44, %v4666_v34  ;;  %v2448_v0 = vunpack.c.l.s8.bf16 %v2008_v56  ;;  %v1770_v17 = vrot.slane %v1730_v15, %v4669_v35  ;;  %v1889_v15 = vld [vmem:[%s4412_s29 + $0x210] sm:$0xff] }
 0x3ba   : > { %3909 = vrsqrt.f32 %v1604_v22  ;;  %2694 = vmatpush1.bf16.msra.mxu0 %v2415_v47  ;;  %v1694_v61 = vrot.slane %v1654_v48, %v4666_v34  ;;  %v2576_v54 = vunpack.c.l.s8.bf16 %v2072_v7  ;;  %v1766_v3 = vrot.slane %v1726_v60, %v4669_v35 }
 0x3bb   : > { %3911 = vrsqrt.f32 %v1606_v23  ;;  %2735 = vmatpush1.bf16.msra.mxu1 %v2543_v26  ;;  %2695 = vmatprep.subr.bf16.mxu0 %v2424_v27  ;;  %v2447_v22 = vunpack.c.l.s8.bf16 %v2007_v49  ;;  %v2575_v27 = vunpack.c.l.s8.bf16 %v2071_v5  ;;  %v2583_v42 = vunpack.c.h.s8.bf16 %v2071_v5 }
 0x3bc   : > { %2736 = vmatprep.subr.bf16.mxu1 %v2552_v24  ;;  %v2456_v24 = vunpack.c.h.s8.bf16 %v2008_v56  ;;  %v2081_v60 = vunpack.c.l.s8.bf16 %v1825_v43 }
 0x3be   : > { %2696 = vmatpush1.bf16.msra.mxu0 %v2423_v30  ;;  %v1826_v30 = vld [vmem:[%s4412_s29 + $0x18] sm:$0xff] }
 0x3bf   : > { %2737 = vmatpush1.bf16.msra.mxu1 %v2551_v12  ;;  %2697 = vmatprep.subr.bf16.mxu0 %v2432_v37  ;;  %v1890_v37 = vld [vmem:[%s4412_s29 + $0x218] sm:$0xff] }
 0x3c0   : > { %2738 = vmatprep.subr.bf16.mxu1 %v2560_v40  ;;  %v2455_v40 = vunpack.c.h.s8.bf16 %v2007_v49  ;;  %v1833_v49 = vld [vmem:[%s4412_s29 + $0x50] sm:$0xff] }
 0x3c2   : > { %v3906_v63 = vpop.eup %3905  ;;  %2698 = vmatpush1.bf16.msra.mxu0 %v2431_v2  ;;  %v2082_v2 = vunpack.c.l.s8.bf16 %v1826_v30 }
 0x3c3   : > { %v3908_v11 = vpop.eup %3907  ;;  %v1619_v52 = vmul.f32 %v3906_v63, %v4766_v8  ;;  %2739 = vmatpush1.bf16.msra.mxu1 %v2559_v45  ;;  %2699 = vmatprep.subr.bf16.mxu0 %v2440_v58  ;;  %v2210_v45 = vunpack.c.l.s8.bf16 %v1890_v37 }
 0x3c4   : > { %v3910_v50 = vpop.eup %3909  ;;  %v1621_v14 = vmul.f32 %v3908_v11, %v4769_v18  ;;  %2740 = vmatprep.subr.bf16.mxu1 %v2568_v55  ;;  %v1774_v18 = vrot.slane %v1734_v13, %v4669_v35  ;;  %v2218_v11 = vunpack.c.h.s8.bf16 %v1890_v37  ;;  %v1849_v37 = vld [vmem:[%s4412_s29 + $0xd0] sm:$0xff] }
 0x3c5   : > { %v3912_v21 = vpop.eup %3911  ;;  %v1699_v8 = vmul.f32 %v1682_v59, %v1619_v52  ;;  %v1620_v9 = vmul.f32 %v3910_v50, %v4773_v46  ;;  %v2584_v46 = vunpack.c.h.s8.bf16 %v2072_v7  ;;  %v1898_v52 = vld [vmem:[%s4412_s29 + $0x258] sm:$0xff] }
 0x3c6   : > { %v1701_v20 = vmul.f32 %v1690_v16, %v1621_v14  ;;  %v1622_v47 = vmul.f32 %v3912_v21, %v4776_v1  ;;  %2700 = vmatpush1.bf16.msra.mxu0 %v2439_v51  ;;  %v2209_v16 = vunpack.c.l.s8.bf16 %v1889_v15  ;;  %v2090_v51 = vunpack.c.h.s8.bf16 %v1826_v30  ;;  %v1897_v14 = vld [vmem:[%s4412_s29 + $0x250] sm:$0xff]  ;;  %v1842_v21 = vld [vmem:[%s4412_s29 + $0x98] sm:$0xff] }
 0x3c7   : > { %v1779_v23 = vadd.f32 %v1762_v19, %v1699_v8  ;;  %v1700_v26 = vmul.f32 %v1686_v53, %v1620_v9  ;;  %2741 = vmatpush1.bf16.msra.mxu1 %v2567_v10  ;;  %2701 = vmatprep.subr.bf16.mxu0 %v2448_v0  ;;  %v1834_v10 = vld [vmem:[%s4412_s29 + $0x58] sm:$0xff]  ;;  %v2089_v19 = vunpack.c.h.s8.bf16 %v1825_v43  ;;  %v2217_v53 = vunpack.c.h.s8.bf16 %v1889_v15  ;;  %v1857_v15 = vld [vmem:[%s4412_s29 + $0x110] sm:$0xff] }
 0x3c8   : > { %v1781_v28 = vadd.f32 %v1770_v17, %v1701_v20  ;;  %v1702_v29 = vmul.f32 %v1694_v61, %v1622_v47  ;;  %2742 = vmatprep.subr.bf16.mxu1 %v2576_v54  ;;  %v2098_v0 = vunpack.c.l.s8.bf16 %v1834_v10  ;;  %v2226_v50 = vunpack.c.l.s8.bf16 %v1898_v52  ;;  %v1906_v8 = vld [vmem:[%s4412_s29 + $0x298] sm:$0xff]  ;;  %v1841_v47 = vld [vmem:[%s4412_s29 + $0x90] sm:$0xff] }
 0x3c9   : > { %v1780_v12 = vadd.f32 %v1766_v3, %v1700_v26  ;;  %vm1787_vm12 = vcmp.ge.f32.partialorder %v1779_v23, 0.0  ;;  %v1795_v1 = vmul.f32 0.01, %v1779_v23  ;;  %v2097_v17 = vunpack.c.l.s8.bf16 %v1833_v49  ;;  %v1922_v43 = vld [vmem:[%s4412_s29 + $0x318] sm:$0xff] }
 0x3ca   : > { %v1782_v39 = vadd.f32 %v1774_v18, %v1702_v29  ;;  %2702 = vmatpush1.bf16.msra.mxu0 %v2447_v22  ;;  %vm1789_vm13 = vcmp.ge.f32.partialorder %v1781_v28, 0.0  ;;  %v1797_v41 = vmul.f32 0.01, %v1781_v28  ;;  %v2225_v61 = vunpack.c.l.s8.bf16 %v1897_v14  ;;  %v1905_v22 = vld [vmem:[%s4412_s29 + $0x290] sm:$0xff]  ;;  %v1914_v29 = vld [vmem:[%s4412_s29 + $0x2d8] sm:$0xff] }
 0x3cb   : > { %2743 = vmatpush1.bf16.msra.mxu1 %v2575_v27  ;;  %2703 = vmatprep.subr.bf16.mxu0 %v2456_v24  ;;  %vm1788_vm14 = vcmp.ge.f32.partialorder %v1780_v12, 0.0  ;;  %v1796_v57 = vmul.f32 0.01, %v1780_v12  ;;  %v1803_v58 = vsel %vm1787_vm12, %v1779_v23, %v1795_v1  ;;  %v2106_v54 = vunpack.c.h.s8.bf16 %v1834_v10  ;;  %v1866_v10 = vld [vmem:[%s4412_s29 + $0x158] sm:$0xff] }
 0x3cc   : > { %2744 = vmatprep.subr.bf16.mxu1 %v2584_v46  ;;  %vm1790_vm15 = vcmp.ge.f32.partialorder %v1782_v39, 0.0  ;;  %v1798_v44 = vmul.f32 0.01, %v1782_v39  ;;  %v1805_v55 = vsel %vm1789_vm13, %v1781_v28, %v1797_v41  ;;  %v4840_v63 = vpack.c.bf16 %v1803_v58, %v1803_v58  ;;  %v1850_v28 = vld [vmem:[%s4412_s29 + $0xd8] sm:$0xff] }
 0x3cd   : > { %v1804_v48 = vsel %vm1788_vm14, %v1780_v12, %v1796_v57  ;;  %v4843_v13 = vpack.c.bf16 %v1805_v55, %v1805_v55  ;;  %v2234_v5 = vunpack.c.h.s8.bf16 %v1898_v52  ;;  %v2105_v9 = vunpack.c.h.s8.bf16 %v1833_v49  ;;  %v1921_v55 = vld [vmem:[%s4412_s29 + $0x310] sm:$0xff] }
 0x3ce   : > { %2704 = vmatpush1.bf16.msra.mxu0 %v2455_v40  ;;  %v4836_v56 = vpack.c.bf16 %v1804_v48, %v1804_v48  ;;  %v1806_v59 = vsel %vm1790_vm15, %v1782_v39, %v1798_v44  ;;  %v2233_v3 = vunpack.c.h.s8.bf16 %v1897_v14  ;;  %v2114_v20 = vunpack.c.l.s8.bf16 %v1842_v21  ;;  %v1913_v39 = vld [vmem:[%s4412_s29 + $0x2d0] sm:$0xff] }
 0x3cf   : > { %2745 = vmatpush1.bf16.msra.mxu1 %v2583_v42  ;;  %v4838_v7 = vpack.c.bf16 %v1806_v59, %v1806_v59  ;;  %2755 = vmatprep.subr.bf16.mxu0 %v2082_v2  ;;  %v2242_v18 = vunpack.c.l.s8.bf16 %v1906_v8  ;;  %v2113_v23 = vunpack.c.l.s8.bf16 %v1841_v47  ;;  %v2241_v26 = vunpack.c.l.s8.bf16 %v1905_v22  ;;  %v1858_v2 = vld [vmem:[%s4412_s29 + $0x118] sm:$0xff] }
 0x3d0   : > { %2705 = vmatprep.mubr.bf16.mxu0 %v4836_v56  ;;  %2796 = vmatprep.subr.bf16.mxu1 %v2210_v45  ;;  %v2122_v27 = vunpack.c.h.s8.bf16 %v1842_v21  ;;  %v2250_v24 = vunpack.c.h.s8.bf16 %v1906_v8  ;;  %v2121_v46 = vunpack.c.h.s8.bf16 %v1841_v47  ;;  %v2249_v30 = vunpack.c.h.s8.bf16 %v1905_v22  ;;  %v1938_v21 = vld [vmem:[%s4412_s29 + $0x398] sm:$0xff] }
 0x3d1   : > { %2746 = vmatprep.mubr.bf16.mxu1 %v4838_v7  ;;  %2706 = vmatmul.mubr.bf16.vlgmr.msra.gmra.mrb[12].mxu0 %v4840_v63  ;;  %v2130_v12 = vunpack.c.l.s8.bf16 %v1850_v28  ;;  %v2258_v1 = vunpack.c.l.s8.bf16 %v1914_v29  ;;  %v2129_v40 = vunpack.c.l.s8.bf16 %v1849_v37  ;;  %v2257_v41 = vunpack.c.l.s8.bf16 %v1913_v39 }
 0x3d2   : > { %2747 = vmatmul.mubr.bf16.vlgmr.msra.gmra.mrb[12].mxu1 %v4843_v13  ;;  %2756 = vmatpush1.bf16.msra.mxu0 %v2081_v60  ;;  %v2138_v42 = vunpack.c.h.s8.bf16 %v1850_v28  ;;  %v2266_v57 = vunpack.c.h.s8.bf16 %v1914_v29  ;;  %v2137_v44 = vunpack.c.h.s8.bf16 %v1849_v37  ;;  %v2265_v45 = vunpack.c.h.s8.bf16 %v1913_v39  ;;  %v1946_v28 = vld [vmem:[%s4412_s29 + $0x3d8] sm:$0xff] }
 0x3d3   : > { %2797 = vmatpush1.bf16.msra.mxu1 %v2209_v16  ;;  %2787 = vmatprep.mubr.bf16.mxu0 %v4720_v25  ;;  %v2146_v58 = vunpack.c.l.s8.bf16 %v1858_v2  ;;  %v2274_v48 = vunpack.c.l.s8.bf16 %v1922_v43  ;;  %v2145_v59 = vunpack.c.l.s8.bf16 %v1857_v15  ;;  %v2273_v60 = vunpack.c.l.s8.bf16 %v1921_v55 }
 0x3d4   : > { %2828 = vmatprep.mubr.bf16.mxu1 %v4722_v31  ;;  %2757 = vmatprep.subr.bf16.mxu0 %v2090_v51  ;;  %v2154_v16 = vunpack.c.h.s8.bf16 %v1858_v2  ;;  %v2282_v51 = vunpack.c.h.s8.bf16 %v1922_v43  ;;  %v2153_v52 = vunpack.c.h.s8.bf16 %v1857_v15  ;;  %v2306_v47 = vunpack.c.l.s8.bf16 %v1938_v21  ;;  %v2018_v2 = vld [vmem:[%s4412_s29 + $0x618] sm:$0xff] }
 0x3d5   : > { %2798 = vmatprep.subr.bf16.mxu1 %v2218_v11  ;;  %v1930_v11 = vld [vmem:[%s4412_s29 + $0x358] sm:$0xff]  ;;  %v2322_v37 = vunpack.c.l.s8.bf16 %v1946_v28  ;;  %v2466_v15 = vunpack.c.l.s8.bf16 %v2018_v2 }
 0x3d6   : > { %2758 = vmatpush1.bf16.msra.mxu0 %v2089_v19  ;;  %v2281_v19 = vunpack.c.h.s8.bf16 %v1921_v55  ;;  %v2290_v49 = vunpack.c.l.s8.bf16 %v1930_v11 }
 0x3d7   : > { %2799 = vmatpush1.bf16.msra.mxu1 %v2217_v53  ;;  %2759 = vmatprep.subr.bf16.mxu0 %v2098_v0  ;;  %v2162_v53 = vunpack.c.l.s8.bf16 %v1866_v10  ;;  %v1865_v0 = vld [vmem:[%s4412_s29 + $0x150] sm:$0xff] }
 0x3d8   : > { %2800 = vmatprep.subr.bf16.mxu1 %v2226_v50  ;;  %v1929_v50 = vld [vmem:[%s4412_s29 + $0x350] sm:$0xff]  ;;  %v2161_v14 = vunpack.c.l.s8.bf16 %v1865_v0  ;;  %v2169_v8 = vunpack.c.h.s8.bf16 %v1865_v0 }
 0x3da   : > { %2760 = vmatpush1.bf16.msra.mxu0 %v2097_v17  ;;  %v2289_v17 = vunpack.c.l.s8.bf16 %v1929_v50 }
 0x3db   : > { %2801 = vmatpush1.bf16.msra.mxu1 %v2225_v61  ;;  %2761 = vmatprep.subr.bf16.mxu0 %v2106_v54  ;;  %v2170_v61 = vunpack.c.h.s8.bf16 %v1866_v10  ;;  %v2298_v54 = vunpack.c.h.s8.bf16 %v1930_v11  ;;  %v2026_v10 = vld [vmem:[%s4412_s29 + $0x658] sm:$0xff] }
 0x3dc   : > { %2802 = vmatprep.subr.bf16.mxu1 %v2234_v5  ;;  %v1874_v5 = vld [vmem:[%s4412_s29 + $0x198] sm:$0xff]  ;;  %v2482_v0 = vunpack.c.l.s8.bf16 %v2026_v10 }
 0x3de   : > { %2762 = vmatpush1.bf16.msra.mxu0 %v2105_v9  ;;  %v2297_v9 = vunpack.c.h.s8.bf16 %v1929_v50 }
 0x3df   : > { %2803 = vmatpush1.bf16.msra.mxu1 %v2233_v3  ;;  %2763 = vmatprep.subr.bf16.mxu0 %v2114_v20  ;;  %v2178_v3 = vunpack.c.l.s8.bf16 %v1874_v5  ;;  %v1873_v20 = vld [vmem:[%s4412_s29 + $0x190] sm:$0xff] }
 0x3e0   : > { %2804 = vmatprep.subr.bf16.mxu1 %v2242_v18  ;;  %v1937_v18 = vld [vmem:[%s4412_s29 + $0x390] sm:$0xff]  ;;  %v2177_v22 = vunpack.c.l.s8.bf16 %v1873_v20  ;;  %v2185_v29 = vunpack.c.h.s8.bf16 %v1873_v20 }
 0x3e2   : > { %2764 = vmatpush1.bf16.msra.mxu0 %v2113_v23  ;;  %v2305_v23 = vunpack.c.l.s8.bf16 %v1937_v18 }
 0x3e3   : > { %2805 = vmatpush1.bf16.msra.mxu1 %v2241_v26  ;;  %2765 = vmatprep.subr.bf16.mxu0 %v2122_v27  ;;  %v2186_v26 = vunpack.c.h.s8.bf16 %v1874_v5  ;;  %v2314_v27 = vunpack.c.h.s8.bf16 %v1938_v21  ;;  %v2034_v5 = vld [vmem:[%s4412_s29 + $0x698] sm:$0xff] }
 0x3e4   : > { %2806 = vmatprep.subr.bf16.mxu1 %v2250_v24  ;;  %v1882_v24 = vld [vmem:[%s4412_s29 + $0x1d8] sm:$0xff]  ;;  %v2498_v20 = vunpack.c.l.s8.bf16 %v2034_v5 }
 0x3e6   : > { %2766 = vmatpush1.bf16.msra.mxu0 %v2121_v46  ;;  %v2313_v46 = vunpack.c.h.s8.bf16 %v1937_v18 }
 0x3e7   : > { %2807 = vmatpush1.bf16.msra.mxu1 %v2249_v30  ;;  %2767 = vmatprep.subr.bf16.mxu0 %v2130_v12  ;;  %v2194_v30 = vunpack.c.l.s8.bf16 %v1882_v24  ;;  %v1881_v12 = vld [vmem:[%s4412_s29 + $0x1d0] sm:$0xff] }
 0x3e8   : > { %2808 = vmatprep.subr.bf16.mxu1 %v2258_v1  ;;  %v1945_v1 = vld [vmem:[%s4412_s29 + $0x3d0] sm:$0xff]  ;;  %v2193_v39 = vunpack.c.l.s8.bf16 %v1881_v12  ;;  %v2201_v43 = vunpack.c.h.s8.bf16 %v1881_v12 }
 0x3ea   : > { %2768 = vmatpush1.bf16.msra.mxu0 %v2129_v40  ;;  %v2321_v40 = vunpack.c.l.s8.bf16 %v1945_v1 }
 0x3eb   : > { %2809 = vmatpush1.bf16.msra.mxu1 %v2257_v41  ;;  %2769 = vmatprep.subr.bf16.mxu0 %v2138_v42  ;;  %v2202_v41 = vunpack.c.h.s8.bf16 %v1882_v24  ;;  %v2330_v42 = vunpack.c.h.s8.bf16 %v1946_v28  ;;  %v2042_v24 = vld [vmem:[%s4412_s29 + $0x6d8] sm:$0xff] }
 0x3ec   : > { %2810 = vmatprep.subr.bf16.mxu1 %v2266_v57  ;;  %v1954_v57 = vld [vmem:[%s4412_s29 + $0x418] sm:$0xff]  ;;  %v2514_v12 = vunpack.c.l.s8.bf16 %v2042_v24 }
 0x3ee   : > { %2770 = vmatpush1.bf16.msra.mxu0 %v2137_v44  ;;  %v2329_v44 = vunpack.c.h.s8.bf16 %v1945_v1 }
 0x3ef   : > { %2811 = vmatpush1.bf16.msra.mxu1 %v2265_v45  ;;  %2771 = vmatprep.subr.bf16.mxu0 %v2146_v58  ;;  %v2338_v45 = vunpack.c.l.s8.bf16 %v1954_v57  ;;  %v1953_v58 = vld [vmem:[%s4412_s29 + $0x410] sm:$0xff] }
 0x3f0   : > { %2812 = vmatprep.subr.bf16.mxu1 %v2274_v48  ;;  %v2017_v48 = vld [vmem:[%s4412_s29 + $0x610] sm:$0xff]  ;;  %v2337_v55 = vunpack.c.l.s8.bf16 %v1953_v58  ;;  %v2345_v11 = vunpack.c.h.s8.bf16 %v1953_v58 }
 0x3f2   : > { %2772 = vmatpush1.bf16.msra.mxu0 %v2145_v59  ;;  %v2465_v59 = vunpack.c.l.s8.bf16 %v2017_v48 }
 0x3f3   : > { %2813 = vmatpush1.bf16.msra.mxu1 %v2273_v60  ;;  %2773 = vmatprep.subr.bf16.mxu0 %v2154_v16  ;;  %v2346_v60 = vunpack.c.h.s8.bf16 %v1954_v57  ;;  %v1962_v16 = vld [vmem:[%s4412_s29 + $0x458] sm:$0xff] }
 0x3f4   : > { %2814 = vmatprep.subr.bf16.mxu1 %v2282_v51  ;;  %v2474_v51 = vunpack.c.h.s8.bf16 %v2018_v2  ;;  %v2050_v57 = vld [vmem:[%s4412_s29 + $0x718] sm:$0xff] }
 0x3f5   : > { %v2530_v58 = vunpack.c.l.s8.bf16 %v2050_v57 }
 0x3f6   : > { %2774 = vmatpush1.bf16.msra.mxu0 %v2153_v52  ;;  %v2473_v52 = vunpack.c.h.s8.bf16 %v2017_v48 }
 0x3f7   : > { %2815 = vmatpush1.bf16.msra.mxu1 %v2281_v19  ;;  %2775 = vmatprep.subr.bf16.mxu0 %v2162_v53  ;;  %v2354_v19 = vunpack.c.l.s8.bf16 %v1962_v16  ;;  %v1961_v53 = vld [vmem:[%s4412_s29 + $0x450] sm:$0xff] }
 0x3f8   : > { %2816 = vmatprep.subr.bf16.mxu1 %v2290_v49  ;;  %v2025_v49 = vld [vmem:[%s4412_s29 + $0x650] sm:$0xff]  ;;  %v2353_v50 = vunpack.c.l.s8.bf16 %v1961_v53  ;;  %v2361_v21 = vunpack.c.h.s8.bf16 %v1961_v53 }
 0x3fa   : > { %2776 = vmatpush1.bf16.msra.mxu0 %v2161_v14  ;;  %v2481_v14 = vunpack.c.l.s8.bf16 %v2025_v49 }
 0x3fb   : > { %2817 = vmatpush1.bf16.msra.mxu1 %v2289_v17  ;;  %2777 = vmatprep.subr.bf16.mxu0 %v2170_v61  ;;  %v2362_v17 = vunpack.c.h.s8.bf16 %v1962_v16  ;;  %v2490_v61 = vunpack.c.h.s8.bf16 %v2026_v10  ;;  %v1994_v16 = vld [vmem:[%s4412_s29 + $0x558] sm:$0xff] }
 0x3fc   : > { %2818 = vmatprep.subr.bf16.mxu1 %v2298_v54  ;;  %v1970_v54 = vld [vmem:[%s4412_s29 + $0x498] sm:$0xff] }
 0x3fe   : > { %2778 = vmatpush1.bf16.msra.mxu0 %v2169_v8  ;;  %v2489_v8 = vunpack.c.h.s8.bf16 %v2025_v49 }
 0x3ff   : > { %2819 = vmatpush1.bf16.msra.mxu1 %v2297_v9  ;;  %2779 = vmatprep.subr.bf16.mxu0 %v2178_v3  ;;  %v2370_v9 = vunpack.c.l.s8.bf16 %v1970_v54  ;;  %v1969_v3 = vld [vmem:[%s4412_s29 + $0x490] sm:$0xff] }
 0x400   : > { %2820 = vmatprep.subr.bf16.mxu1 %v2306_v47  ;;  %v2033_v47 = vld [vmem:[%s4412_s29 + $0x690] sm:$0xff]  ;;  %v2369_v18 = vunpack.c.l.s8.bf16 %v1969_v3  ;;  %v2377_v28 = vunpack.c.h.s8.bf16 %v1969_v3 }
 0x402   : > { %2780 = vmatpush1.bf16.msra.mxu0 %v2177_v22  ;;  %v2497_v22 = vunpack.c.l.s8.bf16 %v2033_v47 }
 0x403   : > { %2821 = vmatpush1.bf16.msra.mxu1 %v2305_v23  ;;  %2781 = vmatprep.subr.bf16.mxu0 %v2186_v26  ;;  %v2378_v23 = vunpack.c.h.s8.bf16 %v1970_v54  ;;  %v2506_v26 = vunpack.c.h.s8.bf16 %v2034_v5  ;;  %v2066_v54 = vld [vmem:[%s4412_s29 + $0x798] sm:$0xff] }
 0x404   : > { %2822 = vmatprep.subr.bf16.mxu1 %v2314_v27  ;;  %v1978_v27 = vld [vmem:[%s4412_s29 + $0x4d8] sm:$0xff]  ;;  %v2562_v3 = vunpack.c.l.s8.bf16 %v2066_v54 }
 0x406   : > { %2782 = vmatpush1.bf16.msra.mxu0 %v2185_v29  ;;  %v2505_v29 = vunpack.c.h.s8.bf16 %v2033_v47 }
 0x407   : > { %2823 = vmatpush1.bf16.msra.mxu1 %v2313_v46  ;;  %2783 = vmatprep.subr.bf16.mxu0 %v2194_v30  ;;  %v2386_v46 = vunpack.c.l.s8.bf16 %v1978_v27  ;;  %v1977_v30 = vld [vmem:[%s4412_s29 + $0x4d0] sm:$0xff] }
 0x408   : > { %2824 = vmatprep.subr.bf16.mxu1 %v2322_v37  ;;  %v2041_v37 = vld [vmem:[%s4412_s29 + $0x6d0] sm:$0xff]  ;;  %v2385_v1 = vunpack.c.l.s8.bf16 %v1977_v30  ;;  %v2393_v2 = vunpack.c.h.s8.bf16 %v1977_v30 }
 0x40a   : > { %2784 = vmatpush1.bf16.msra.mxu0 %v2193_v39  ;;  %v2513_v39 = vunpack.c.l.s8.bf16 %v2041_v37 }
 0x40b   : > { %2825 = vmatpush1.bf16.msra.mxu1 %v2321_v40  ;;  %2785 = vmatprep.subr.bf16.mxu0 %v2202_v41  ;;  %v2394_v40 = vunpack.c.h.s8.bf16 %v1978_v27  ;;  %v2522_v41 = vunpack.c.h.s8.bf16 %v2042_v24  ;;  %v2074_v27 = vld [vmem:[%s4412_s29 + $0x7d8] sm:$0xff] }
 0x40c   : > { %2826 = vmatprep.subr.bf16.mxu1 %v2330_v42  ;;  %v1986_v42 = vld [vmem:[%s4412_s29 + $0x518] sm:$0xff]  ;;  %v2578_v30 = vunpack.c.l.s8.bf16 %v2074_v27 }
 0x40e   : > { %2786 = vmatpush1.bf16.msra.mxu0 %v2201_v43  ;;  %v2521_v43 = vunpack.c.h.s8.bf16 %v2041_v37 }
 0x40f   : > { %2827 = vmatpush1.bf16.msra.mxu1 %v2329_v44  ;;  %2837 = vmatprep.subr.bf16.mxu0 %v2338_v45  ;;  %v2402_v44 = vunpack.c.l.s8.bf16 %v1986_v42  ;;  %v1985_v45 = vld [vmem:[%s4412_s29 + $0x510] sm:$0xff] }
 0x410   : > { %2878 = vmatprep.subr.bf16.mxu1 %v2466_v15  ;;  %v2049_v15 = vld [vmem:[%s4412_s29 + $0x710] sm:$0xff]  ;;  %v2401_v48 = vunpack.c.l.s8.bf16 %v1985_v45  ;;  %v2409_v10 = vunpack.c.h.s8.bf16 %v1985_v45 }
 0x411   : > { %2788 = vmatmul.mubr.bf16.vlgmr.msra.gmra.mrb[16].mxu0 %v4724_v32 }
 0x412   : > { %2829 = vmatmul.mubr.bf16.vlgmr.msra.gmra.mrb[16].mxu1 %v4728_v33  ;;  %2838 = vmatpush1.bf16.msra.mxu0 %v2337_v55  ;;  %v2529_v55 = vunpack.c.l.s8.bf16 %v2049_v15 }
 0x413   : > { %2869 = vmatprep.mubr.bf16.mxu0 %v4836_v56  ;;  %2879 = vmatpush1.bf16.msra.mxu1 %v2465_v59  ;;  %v2410_v59 = vunpack.c.h.s8.bf16 %v1986_v42  ;;  %v1892_v42 = vld [vmem:[%s4412_s29 + $0x228] sm:$0xff] }
 0x414   : > { %2910 = vmatprep.mubr.bf16.mxu1 %v4838_v7  ;;  %2839 = vmatprep.subr.bf16.mxu0 %v2346_v60  ;;  %v2538_v60 = vunpack.c.h.s8.bf16 %v2050_v57  ;;  %v2212_v45 = vunpack.c.l.s8.bf16 %v1892_v42 }
 0x415   : > { %2880 = vmatprep.subr.bf16.mxu1 %v2474_v51  ;;  %v2058_v51 = vld [vmem:[%s4412_s29 + $0x758] sm:$0xff] }
 0x416   : > { %2840 = vmatpush1.bf16.msra.mxu0 %v2345_v11  ;;  %v2537_v11 = vunpack.c.h.s8.bf16 %v2049_v15  ;;  %v2546_v53 = vunpack.c.l.s8.bf16 %v2058_v51 }
 0x417   : > { %2881 = vmatpush1.bf16.msra.mxu1 %v2473_v52  ;;  %2841 = vmatprep.subr.bf16.mxu0 %v2354_v19  ;;  %v2418_v52 = vunpack.c.l.s8.bf16 %v1994_v16  ;;  %v1993_v19 = vld [vmem:[%s4412_s29 + $0x550] sm:$0xff] }
 0x418   : > { %2882 = vmatprep.subr.bf16.mxu1 %v2482_v0  ;;  %v2057_v0 = vld [vmem:[%s4412_s29 + $0x750] sm:$0xff]  ;;  %v2417_v49 = vunpack.c.l.s8.bf16 %v1993_v19  ;;  %v2425_v5 = vunpack.c.h.s8.bf16 %v1993_v19 }
 0x41a   : > { %2842 = vmatpush1.bf16.msra.mxu0 %v2353_v50  ;;  %v2545_v50 = vunpack.c.l.s8.bf16 %v2057_v0 }
 0x41b   : > { %2883 = vmatpush1.bf16.msra.mxu1 %v2481_v14  ;;  %2843 = vmatprep.subr.bf16.mxu0 %v2362_v17  ;;  %v2426_v14 = vunpack.c.h.s8.bf16 %v1994_v16  ;;  %v2554_v17 = vunpack.c.h.s8.bf16 %v2058_v51  ;;  %v1900_v16 = vld [vmem:[%s4412_s29 + $0x268] sm:$0xff] }
 0x41c   : > { %2884 = vmatprep.subr.bf16.mxu1 %v2490_v61  ;;  %v2002_v61 = vld [vmem:[%s4412_s29 + $0x598] sm:$0xff]  ;;  %v2228_v19 = vunpack.c.l.s8.bf16 %v1900_v16 }
 0x41e   : > { %2844 = vmatpush1.bf16.msra.mxu0 %v2361_v21  ;;  %v2553_v21 = vunpack.c.h.s8.bf16 %v2057_v0 }
 0x41f   : > { %2885 = vmatpush1.bf16.msra.mxu1 %v2489_v8  ;;  %2845 = vmatprep.subr.bf16.mxu0 %v2370_v9  ;;  %v2434_v8 = vunpack.c.l.s8.bf16 %v2002_v61  ;;  %v2001_v9 = vld [vmem:[%s4412_s29 + $0x590] sm:$0xff] }
 0x420   : > { %2886 = vmatprep.subr.bf16.mxu1 %v2498_v20  ;;  %v2065_v20 = vld [vmem:[%s4412_s29 + $0x790] sm:$0xff]  ;;  %v2433_v47 = vunpack.c.l.s8.bf16 %v2001_v9  ;;  %v2441_v24 = vunpack.c.h.s8.bf16 %v2001_v9 }
 0x422   : > { %2846 = vmatpush1.bf16.msra.mxu0 %v2369_v18  ;;  %v2561_v18 = vunpack.c.l.s8.bf16 %v2065_v20 }
 0x423   : > { %2887 = vmatpush1.bf16.msra.mxu1 %v2497_v22  ;;  %2847 = vmatprep.subr.bf16.mxu0 %v2378_v23  ;;  %v2442_v22 = vunpack.c.h.s8.bf16 %v2002_v61  ;;  %v2570_v23 = vunpack.c.h.s8.bf16 %v2066_v54  ;;  %v1908_v61 = vld [vmem:[%s4412_s29 + $0x2a8] sm:$0xff] }
 0x424   : > { %2888 = vmatprep.subr.bf16.mxu1 %v2506_v26  ;;  %v2010_v26 = vld [vmem:[%s4412_s29 + $0x5d8] sm:$0xff]  ;;  %v2244_v9 = vunpack.c.l.s8.bf16 %v1908_v61 }
 0x426   : > { %2848 = vmatpush1.bf16.msra.mxu0 %v2377_v28  ;;  %v2569_v28 = vunpack.c.h.s8.bf16 %v2065_v20 }
 0x427   : > { %2889 = vmatpush1.bf16.msra.mxu1 %v2505_v29  ;;  %2849 = vmatprep.subr.bf16.mxu0 %v2386_v46  ;;  %v2450_v29 = vunpack.c.l.s8.bf16 %v2010_v26  ;;  %v2009_v46 = vld [vmem:[%s4412_s29 + $0x5d0] sm:$0xff] }
 0x428   : > { %2890 = vmatprep.subr.bf16.mxu1 %v2514_v12  ;;  %v2073_v12 = vld [vmem:[%s4412_s29 + $0x7d0] sm:$0xff]  ;;  %v2449_v37 = vunpack.c.l.s8.bf16 %v2009_v46  ;;  %v2457_v57 = vunpack.c.h.s8.bf16 %v2009_v46 }
 0x42a   : > { %2850 = vmatpush1.bf16.msra.mxu0 %v2385_v1  ;;  %v2577_v1 = vunpack.c.l.s8.bf16 %v2073_v12 }
 0x42b   : > { %2891 = vmatpush1.bf16.msra.mxu1 %v2513_v39  ;;  %2851 = vmatprep.subr.bf16.mxu0 %v2394_v40  ;;  %v2458_v39 = vunpack.c.h.s8.bf16 %v2010_v26  ;;  %v2586_v40 = vunpack.c.h.s8.bf16 %v2074_v27  ;;  %v1916_v26 = vld [vmem:[%s4412_s29 + $0x2e8] sm:$0xff] }
 0x42c   : > { %2892 = vmatprep.subr.bf16.mxu1 %v2522_v41  ;;  %v1828_v41 = vld [vmem:[%s4412_s29 + $0x28] sm:$0xff] }
 0x42e   : > { %2852 = vmatpush1.bf16.msra.mxu0 %v2393_v2  ;;  %v2585_v2 = vunpack.c.h.s8.bf16 %v2073_v12  ;;  %v1915_v12 = vld [vmem:[%s4412_s29 + $0x2e0] sm:$0xff] }
 0x42f   : > { %2893 = vmatpush1.bf16.msra.mxu1 %v2521_v43  ;;  %2853 = vmatprep.subr.bf16.mxu0 %v2402_v44  ;;  %v2084_v43 = vunpack.c.l.s8.bf16 %v1828_v41  ;;  %v1827_v44 = vld [vmem:[%s4412_s29 + $0x20] sm:$0xff] }
 0x430   : > { %2894 = vmatprep.subr.bf16.mxu1 %v2530_v58  ;;  %v1891_v58 = vld [vmem:[%s4412_s29 + $0x220] sm:$0xff]  ;;  %v2083_v15 = vunpack.c.l.s8.bf16 %v1827_v44  ;;  %v2091_v51 = vunpack.c.h.s8.bf16 %v1827_v44  ;;  %v2259_v44 = vunpack.c.l.s8.bf16 %v1915_v12 }
 0x432   : > { %2854 = vmatpush1.bf16.msra.mxu0 %v2401_v48  ;;  %v2211_v48 = vunpack.c.l.s8.bf16 %v1891_v58 }
 0x433   : > { %2895 = vmatpush1.bf16.msra.mxu1 %v2529_v55  ;;  %2855 = vmatprep.subr.bf16.mxu0 %v2410_v59  ;;  %v2092_v55 = vunpack.c.h.s8.bf16 %v1828_v41  ;;  %v1836_v59 = vld [vmem:[%s4412_s29 + $0x68] sm:$0xff] }
 0x434   : > { %2896 = vmatprep.subr.bf16.mxu1 %v2538_v60  ;;  %v2220_v60 = vunpack.c.h.s8.bf16 %v1892_v42 }
 0x436   : > { %2856 = vmatpush1.bf16.msra.mxu0 %v2409_v10  ;;  %v2219_v10 = vunpack.c.h.s8.bf16 %v1891_v58 }
 0x437   : > { %2897 = vmatpush1.bf16.msra.mxu1 %v2537_v11  ;;  %2857 = vmatprep.subr.bf16.mxu0 %v2418_v52  ;;  %v2100_v11 = vunpack.c.l.s8.bf16 %v1836_v59  ;;  %v1835_v52 = vld [vmem:[%s4412_s29 + $0x60] sm:$0xff] }
 0x438   : > { %2898 = vmatprep.subr.bf16.mxu1 %v2546_v53  ;;  %v1899_v53 = vld [vmem:[%s4412_s29 + $0x260] sm:$0xff]  ;;  %v2099_v0 = vunpack.c.l.s8.bf16 %v1835_v52  ;;  %v2107_v54 = vunpack.c.h.s8.bf16 %v1835_v52 }
 0x43a   : > { %2858 = vmatpush1.bf16.msra.mxu0 %v2417_v49  ;;  %v2227_v49 = vunpack.c.l.s8.bf16 %v1899_v53 }
 0x43b   : > { %2899 = vmatpush1.bf16.msra.mxu1 %v2545_v50  ;;  %2859 = vmatprep.subr.bf16.mxu0 %v2426_v14  ;;  %v2108_v50 = vunpack.c.h.s8.bf16 %v1836_v59  ;;  %v2236_v14 = vunpack.c.h.s8.bf16 %v1900_v16 }
 0x43c   : > { %2900 = vmatprep.subr.bf16.mxu1 %v2554_v17  ;;  %v1844_v17 = vld [vmem:[%s4412_s29 + $0xa8] sm:$0xff] }
 0x43e   : > { %2860 = vmatpush1.bf16.msra.mxu0 %v2425_v5  ;;  %v2235_v5 = vunpack.c.h.s8.bf16 %v1899_v53 }
 0x43f   : > { %2901 = vmatpush1.bf16.msra.mxu1 %v2553_v21  ;;  %2861 = vmatprep.subr.bf16.mxu0 %v2434_v8  ;;  %v2116_v21 = vunpack.c.l.s8.bf16 %v1844_v17  ;;  %v1843_v8 = vld [vmem:[%s4412_s29 + $0xa0] sm:$0xff] }
 0x440   : > { %2902 = vmatprep.subr.bf16.mxu1 %v2562_v3  ;;  %v1907_v3 = vld [vmem:[%s4412_s29 + $0x2a0] sm:$0xff]  ;;  %v2115_v20 = vunpack.c.l.s8.bf16 %v1843_v8  ;;  %v2123_v27 = vunpack.c.h.s8.bf16 %v1843_v8 }
 0x442   : > { %2862 = vmatpush1.bf16.msra.mxu0 %v2433_v47  ;;  %v2243_v47 = vunpack.c.l.s8.bf16 %v1907_v3 }
 0x443   : > { %2903 = vmatpush1.bf16.msra.mxu1 %v2561_v18  ;;  %2863 = vmatprep.subr.bf16.mxu0 %v2442_v22  ;;  %v2124_v18 = vunpack.c.h.s8.bf16 %v1844_v17  ;;  %v2252_v22 = vunpack.c.h.s8.bf16 %v1908_v61 }
 0x444   : > { %2904 = vmatprep.subr.bf16.mxu1 %v2570_v23  ;;  %v1852_v23 = vld [vmem:[%s4412_s29 + $0xe8] sm:$0xff] }
 0x446   : > { %2864 = vmatpush1.bf16.msra.mxu0 %v2441_v24  ;;  %v2251_v24 = vunpack.c.h.s8.bf16 %v1907_v3 }
 0x447   : > { %2905 = vmatpush1.bf16.msra.mxu1 %v2569_v28  ;;  %2865 = vmatprep.subr.bf16.mxu0 %v2450_v29  ;;  %v2132_v28 = vunpack.c.l.s8.bf16 %v1852_v23  ;;  %v1851_v29 = vld [vmem:[%s4412_s29 + $0xe0] sm:$0xff] }
 0x448   : > { %2906 = vmatprep.subr.bf16.mxu1 %v2578_v30  ;;  %v2260_v30 = vunpack.c.l.s8.bf16 %v1916_v26  ;;  %v2131_v42 = vunpack.c.l.s8.bf16 %v1851_v29  ;;  %v2139_v59 = vunpack.c.h.s8.bf16 %v1851_v29 }
 0x44a   : > { %2866 = vmatpush1.bf16.msra.mxu0 %v2449_v37 }
 0x44b   : > { %2907 = vmatpush1.bf16.msra.mxu1 %v2577_v1  ;;  %2867 = vmatprep.subr.bf16.mxu0 %v2458_v39 }
 0x44c   : > { %2908 = vmatprep.subr.bf16.mxu1 %v2586_v40 }
 0x44e   : > { %2868 = vmatpush1.bf16.msra.mxu0 %v2457_v57 }
 0x44f   : > { %2909 = vmatpush1.bf16.msra.mxu1 %v2585_v2  ;;  %2919 = vmatprep.subr.bf16.mxu0 %v2084_v43 }
 0x450   : > { %2960 = vmatprep.subr.bf16.mxu1 %v2212_v45  ;;  %v2140_v45 = vunpack.c.h.s8.bf16 %v1852_v23 }
 0x451   : > { %2870 = vmatmul.mubr.bf16.vlgmr.msra.gmra.mrb[20].mxu0 %v4840_v63 }
 0x452   : > { %2911 = vmatmul.mubr.bf16.vlgmr.msra.gmra.mrb[20].mxu1 %v4843_v13  ;;  %2920 = vmatpush1.bf16.msra.mxu0 %v2083_v15  ;;  %v2268_v15 = vunpack.c.h.s8.bf16 %v1916_v26 }
 0x453   : > { %2951 = vmatprep.mubr.bf16.mxu0 %v4720_v25  ;;  %2961 = vmatpush1.bf16.msra.mxu1 %v2211_v48  ;;  %v1860_v48 = vld [vmem:[%s4412_s29 + $0x128] sm:$0xff] }
 0x454   : > { %2992 = vmatprep.mubr.bf16.mxu1 %v4722_v31  ;;  %2921 = vmatprep.subr.bf16.mxu0 %v2092_v55  ;;  %v1924_v55 = vld [vmem:[%s4412_s29 + $0x328] sm:$0xff]  ;;  %v2148_v16 = vunpack.c.l.s8.bf16 %v1860_v48  ;;  %v2156_v53 = vunpack.c.h.s8.bf16 %v1860_v48 }
 0x455   : > { %2962 = vmatprep.subr.bf16.mxu1 %v2220_v60  ;;  %v2267_v60 = vunpack.c.h.s8.bf16 %v1915_v12 }
 0x456   : > { %2922 = vmatpush1.bf16.msra.mxu0 %v2091_v51  ;;  %v1859_v51 = vld [vmem:[%s4412_s29 + $0x120] sm:$0xff] }
 0x457   : > { %2963 = vmatpush1.bf16.msra.mxu1 %v2219_v10  ;;  %2923 = vmatprep.subr.bf16.mxu0 %v2100_v11  ;;  %v2276_v10 = vunpack.c.l.s8.bf16 %v1924_v55  ;;  %v1923_v11 = vld [vmem:[%s4412_s29 + $0x320] sm:$0xff]  ;;  %v2147_v52 = vunpack.c.l.s8.bf16 %v1859_v51 }
 0x458   : > { %2964 = vmatprep.subr.bf16.mxu1 %v2228_v19  ;;  %v2275_v19 = vunpack.c.l.s8.bf16 %v1923_v11  ;;  %v2283_v17 = vunpack.c.h.s8.bf16 %v1923_v11 }
 0x45a   : > { %2924 = vmatpush1.bf16.msra.mxu0 %v2099_v0  ;;  %v2284_v0 = vunpack.c.h.s8.bf16 %v1924_v55  ;;  %v1956_v55 = vld [vmem:[%s4412_s29 + $0x428] sm:$0xff] }
 0x45b   : > { %2965 = vmatpush1.bf16.msra.mxu1 %v2227_v49  ;;  %2925 = vmatprep.subr.bf16.mxu0 %v2108_v50  ;;  %v1868_v49 = vld [vmem:[%s4412_s29 + $0x168] sm:$0xff] }
 0x45c   : > { %2966 = vmatprep.subr.bf16.mxu1 %v2236_v14  ;;  %v1932_v50 = vld [vmem:[%s4412_s29 + $0x368] sm:$0xff]  ;;  %v2155_v14 = vunpack.c.h.s8.bf16 %v1859_v51  ;;  %v2164_v61 = vunpack.c.l.s8.bf16 %v1868_v49  ;;  %v2172_v3 = vunpack.c.h.s8.bf16 %v1868_v49  ;;  %v2340_v51 = vunpack.c.l.s8.bf16 %v1956_v55 }
 0x45d   : > { %v1964_v49 = vld [vmem:[%s4412_s29 + $0x468] sm:$0xff] }
 0x45e   : > { %2926 = vmatpush1.bf16.msra.mxu0 %v2107_v54  ;;  %v1867_v54 = vld [vmem:[%s4412_s29 + $0x160] sm:$0xff] }
 0x45f   : > { %2967 = vmatpush1.bf16.msra.mxu1 %v2235_v5  ;;  %2927 = vmatprep.subr.bf16.mxu0 %v2116_v21  ;;  %v2292_v5 = vunpack.c.l.s8.bf16 %v1932_v50  ;;  %v1931_v21 = vld [vmem:[%s4412_s29 + $0x360] sm:$0xff]  ;;  %v2163_v8 = vunpack.c.l.s8.bf16 %v1867_v54 }
 0x460   : > { %2968 = vmatprep.subr.bf16.mxu1 %v2244_v9  ;;  %v2291_v9 = vunpack.c.l.s8.bf16 %v1931_v21  ;;  %v2299_v23 = vunpack.c.h.s8.bf16 %v1931_v21 }
 0x462   : > { %2928 = vmatpush1.bf16.msra.mxu0 %v2115_v20  ;;  %v2300_v20 = vunpack.c.h.s8.bf16 %v1932_v50 }
 0x463   : > { %2969 = vmatpush1.bf16.msra.mxu1 %v2243_v47  ;;  %2929 = vmatprep.subr.bf16.mxu0 %v2124_v18  ;;  %v1876_v47 = vld [vmem:[%s4412_s29 + $0x1a8] sm:$0xff] }
 0x464   : > { %v2625_v46 = vpop.f32.mrb[8].mxu0  ;;  %2970 = vmatprep.subr.bf16.mxu1 %v2252_v22  ;;  %v1940_v18 = vld [vmem:[%s4412_s29 + $0x3a8] sm:$0xff]  ;;  %v2171_v22 = vunpack.c.h.s8.bf16 %v1867_v54  ;;  %v2180_v26 = vunpack.c.l.s8.bf16 %v1876_v47  ;;  %v2356_v54 = vunpack.c.l.s8.bf16 %v1964_v49 }
 0x465   : > { %v2666_v37 = vpop.f32.mrb[8].mxu1  ;;  %v2627_v1 = vpop.f32.mrb[9].mxu0  ;;  %v2316_v12 = vunpack.c.h.s8.bf16 %v1940_v18 }
 0x466   : > { %v4934_v39 = vadd.f32 %v2666_v37, %v2625_v46  ;;  %v2668_v40 = vpop.f32.mrb[9].mxu1  ;;  %2930 = vmatpush1.bf16.msra.mxu0 %v2123_v27  ;;  %v2629_v41 = vpop.f32.mrb[10].mxu0  ;;  %v1875_v27 = vld [vmem:[%s4412_s29 + $0x1a0] sm:$0xff]  ;;  %v1884_v37 = vld [vmem:[%s4412_s29 + $0x1e8] sm:$0xff] }
 0x467   : > { %v4936_v57 = vadd.f32 %v2668_v40, %v2627_v1  ;;  %2971 = vmatpush1.bf16.msra.mxu1 %v2251_v24  ;;  %v2670_v2 = vpop.f32.mrb[10].mxu1  ;;  %v2630_v43 = vpop.f32.mrb[11].mxu0  ;;  %2931 = vmatprep.subr.bf16.mxu0 %v2132_v28  ;;  %v2308_v24 = vunpack.c.l.s8.bf16 %v1940_v18  ;;  %v1939_v28 = vld [vmem:[%s4412_s29 + $0x3a0] sm:$0xff]  ;;  %v2179_v29 = vunpack.c.l.s8.bf16 %v1875_v27  ;;  %v1948_v1 = vld [vmem:[%s4412_s29 + $0x3e8] sm:$0xff]  ;;  %v2187_v40 = vunpack.c.h.s8.bf16 %v1875_v27 }
 0x468   : > { %v2671_v58 = vpop.f32.mrb[11].mxu1  ;;  %2972 = vmatprep.subr.bf16.mxu1 %v2260_v30  ;;  %v2307_v46 = vunpack.c.l.s8.bf16 %v1939_v28  ;;  %v2188_v30 = vunpack.c.h.s8.bf16 %v1876_v47  ;;  %v2315_v41 = vunpack.c.h.s8.bf16 %v1939_v28  ;;  %v1883_v2 = vld [vmem:[%s4412_s29 + $0x1e0] sm:$0xff]  ;;  %v2324_v43 = vunpack.c.l.s8.bf16 %v1948_v1  ;;  %v1972_v18 = vld [vmem:[%s4412_s29 + $0x4a8] sm:$0xff] }
 0x469   : > { %v2332_v48 = vunpack.c.h.s8.bf16 %v1948_v1  ;;  %v2372_v27 = vunpack.c.l.s8.bf16 %v1972_v18  ;;  %v1980_v1 = vld [vmem:[%s4412_s29 + $0x4e8] sm:$0xff] }
 0x46a   : > { %2932 = vmatpush1.bf16.msra.mxu0 %v2131_v42  ;;  %v2196_v42 = vunpack.c.l.s8.bf16 %v1884_v37 }
 0x46b   : > { %2973 = vmatpush1.bf16.msra.mxu1 %v2259_v44  ;;  %2933 = vmatprep.subr.bf16.mxu0 %v2140_v45  ;;  %v1947_v44 = vld [vmem:[%s4412_s29 + $0x3e0] sm:$0xff]  ;;  %v2195_v45 = vunpack.c.l.s8.bf16 %v1883_v2 }
 0x46c   : > { %2974 = vmatprep.subr.bf16.mxu1 %v2268_v15  ;;  %v2323_v58 = vunpack.c.l.s8.bf16 %v1947_v44  ;;  %v2204_v15 = vunpack.c.h.s8.bf16 %v1884_v37 }
 0x46e   : > { %2934 = vmatpush1.bf16.msra.mxu0 %v2139_v59  ;;  %v2020_v59 = vld [vmem:[%s4412_s29 + $0x628] sm:$0xff] }
 0x46f   : > { %2975 = vmatpush1.bf16.msra.mxu1 %v2267_v60  ;;  %2935 = vmatprep.subr.bf16.mxu0 %v2148_v16  ;;  %v2203_v60 = vunpack.c.h.s8.bf16 %v1883_v2  ;;  %v2331_v16 = vunpack.c.h.s8.bf16 %v1947_v44  ;;  %v2468_v11 = vunpack.c.l.s8.bf16 %v2020_v59  ;;  %v2476_v50 = vunpack.c.h.s8.bf16 %v2020_v59  ;;  %v1807_v59 = vld [vmem:[#allocation2] sm:$0xff] }
 0x470   : > { %2976 = vmatprep.subr.bf16.mxu1 %v2276_v10  ;;  %v1955_v10 = vld [vmem:[%s4412_s29 + $0x420] sm:$0xff]  ;;  %v2388_v2 = vunpack.c.l.s8.bf16 %v1980_v1 }
 0x472   : > { %2936 = vmatpush1.bf16.msra.mxu0 %v2147_v52  ;;  %v2019_v52 = vld [vmem:[%s4412_s29 + $0x620] sm:$0xff] }
 0x473   : > { %2977 = vmatpush1.bf16.msra.mxu1 %v2275_v19  ;;  %2937 = vmatprep.subr.bf16.mxu0 %v2156_v53  ;;  %v2339_v19 = vunpack.c.l.s8.bf16 %v1955_v10  ;;  %v2467_v53 = vunpack.c.l.s8.bf16 %v2019_v52 }
 0x474   : > { %2978 = vmatprep.subr.bf16.mxu1 %v2284_v0  ;;  %v2348_v0 = vunpack.c.h.s8.bf16 %v1956_v55 }
 0x476   : > { %2938 = vmatpush1.bf16.msra.mxu0 %v2155_v14  ;;  %v2028_v14 = vld [vmem:[%s4412_s29 + $0x668] sm:$0xff] }
 0x477   : > { %2979 = vmatpush1.bf16.msra.mxu1 %v2283_v17  ;;  %2939 = vmatprep.subr.bf16.mxu0 %v2164_v61  ;;  %v2347_v17 = vunpack.c.h.s8.bf16 %v1955_v10  ;;  %v2475_v61 = vunpack.c.h.s8.bf16 %v2019_v52  ;;  %v2484_v21 = vunpack.c.l.s8.bf16 %v2028_v14  ;;  %v2492_v47 = vunpack.c.h.s8.bf16 %v2028_v14  ;;  %v1808_v52 = vld [vmem:[#allocation2 + $0x8] sm:$0xff] }
 0x478   : > { %2980 = vmatprep.subr.bf16.mxu1 %v2292_v5  ;;  %v1963_v5 = vld [vmem:[%s4412_s29 + $0x460] sm:$0xff] }
 0x47a   : > { %2940 = vmatpush1.bf16.msra.mxu0 %v2163_v8  ;;  %v2027_v8 = vld [vmem:[%s4412_s29 + $0x660] sm:$0xff] }
 0x47b   : > { %2981 = vmatpush1.bf16.msra.mxu1 %v2291_v9  ;;  %2941 = vmatprep.subr.bf16.mxu0 %v2172_v3  ;;  %v2355_v9 = vunpack.c.l.s8.bf16 %v1963_v5  ;;  %v2483_v3 = vunpack.c.l.s8.bf16 %v2027_v8 }
 0x47c   : > { %2982 = vmatprep.subr.bf16.mxu1 %v2300_v20  ;;  %v2364_v20 = vunpack.c.h.s8.bf16 %v1964_v49  ;;  %v2396_v49 = vunpack.c.h.s8.bf16 %v1980_v1 }
 0x47e   : > { %2942 = vmatpush1.bf16.msra.mxu0 %v2171_v22  ;;  %v2036_v22 = vld [vmem:[%s4412_s29 + $0x6a8] sm:$0xff] }
 0x47f   : > { %2983 = vmatpush1.bf16.msra.mxu1 %v2299_v23  ;;  %2943 = vmatprep.subr.bf16.mxu0 %v2180_v26  ;;  %v2363_v23 = vunpack.c.h.s8.bf16 %v1963_v5  ;;  %v2491_v26 = vunpack.c.h.s8.bf16 %v2027_v8  ;;  %v2500_v28 = vunpack.c.l.s8.bf16 %v2036_v22  ;;  %v2508_v37 = vunpack.c.h.s8.bf16 %v2036_v22 }
 0x480   : > { %2984 = vmatprep.subr.bf16.mxu1 %v2308_v24  ;;  %v1971_v24 = vld [vmem:[%s4412_s29 + $0x4a0] sm:$0xff] }
 0x482   : > { %2944 = vmatpush1.bf16.msra.mxu0 %v2179_v29  ;;  %v2035_v29 = vld [vmem:[%s4412_s29 + $0x6a0] sm:$0xff] }
 0x483   : > { %2985 = vmatpush1.bf16.msra.mxu1 %v2307_v46  ;;  %2945 = vmatprep.subr.bf16.mxu0 %v2188_v30  ;;  %v2371_v46 = vunpack.c.l.s8.bf16 %v1971_v24  ;;  %v2499_v30 = vunpack.c.l.s8.bf16 %v2035_v29 }
 0x484   : > { %2986 = vmatprep.subr.bf16.mxu1 %v2316_v12  ;;  %v2380_v12 = vunpack.c.h.s8.bf16 %v1972_v18 }
 0x486   : > { %2946 = vmatpush1.bf16.msra.mxu0 %v2187_v40  ;;  %v2044_v40 = vld [vmem:[%s4412_s29 + $0x6e8] sm:$0xff] }
 0x487   : > { %2987 = vmatpush1.bf16.msra.mxu1 %v2315_v41  ;;  %2947 = vmatprep.subr.bf16.mxu0 %v2196_v42  ;;  %v2379_v41 = vunpack.c.h.s8.bf16 %v1971_v24  ;;  %v2507_v42 = vunpack.c.h.s8.bf16 %v2035_v29  ;;  %v2524_v14 = vunpack.c.h.s8.bf16 %v2044_v40 }
 0x488   : > { %2988 = vmatprep.subr.bf16.mxu1 %v2324_v43  ;;  %v1979_v43 = vld [vmem:[%s4412_s29 + $0x4e0] sm:$0xff] }
 0x489   : > { %v2387_v10 = vunpack.c.l.s8.bf16 %v1979_v43  ;;  %v2395_v5 = vunpack.c.h.s8.bf16 %v1979_v43 }
 0x48a   : > { %2948 = vmatpush1.bf16.msra.mxu0 %v2195_v45  ;;  %v2516_v45 = vunpack.c.l.s8.bf16 %v2044_v40 }
 0x48b   : > { %2989 = vmatpush1.bf16.msra.mxu1 %v2323_v58  ;;  %2949 = vmatprep.subr.bf16.mxu0 %v2204_v15  ;;  %v2043_v58 = vld [vmem:[%s4412_s29 + $0x6e0] sm:$0xff] }
 0x48c   : > { %2990 = vmatprep.subr.bf16.mxu1 %v2332_v48 }
 0x48e   : > { %2950 = vmatpush1.bf16.msra.mxu0 %v2203_v60 }
 0x48f   : > { %2991 = vmatpush1.bf16.msra.mxu1 %v2331_v16  ;;  %3001 = vmatprep.subr.bf16.mxu0 %v2340_v51 }
 0x490   : > { %3042 = vmatprep.subr.bf16.mxu1 %v2468_v11 }
 0x491   : > { %2952 = vmatmul.mubr.bf16.vlgmr.msra.gmra.mrb[24].mxu0 %v4724_v32 }
 0x492   : > { %2993 = vmatmul.mubr.bf16.vlgmr.msra.gmra.mrb[24].mxu1 %v4728_v33  ;;  %3002 = vmatpush1.bf16.msra.mxu0 %v2339_v19 }
 0x493   : > { %3033 = vmatprep.mubr.bf16.mxu0 %v4836_v56  ;;  %3043 = vmatpush1.bf16.msra.mxu1 %v2467_v53 }
 0x494   : > { %3074 = vmatprep.mubr.bf16.mxu1 %v4838_v7  ;;  %3003 = vmatprep.subr.bf16.mxu0 %v2348_v0  ;;  %v2515_v0 = vunpack.c.l.s8.bf16 %v2043_v58 }
 0x495   : > { %3044 = vmatprep.subr.bf16.mxu1 %v2476_v50 }
 0x496   : > { %3004 = vmatpush1.bf16.msra.mxu0 %v2347_v17 }
 0x497   : > { %3045 = vmatpush1.bf16.msra.mxu1 %v2475_v61  ;;  %3005 = vmatprep.subr.bf16.mxu0 %v2356_v54  ;;  %v2052_v61 = vld [vmem:[%s4412_s29 + $0x728] sm:$0xff] }
 0x498   : > { %3046 = vmatprep.subr.bf16.mxu1 %v2484_v21  ;;  %v2523_v21 = vunpack.c.h.s8.bf16 %v2043_v58  ;;  %v2003_v58 = vld [vmem:[%s4412_s29 + $0x5a0] sm:$0xff] }
 0x49a   : > { %3006 = vmatpush1.bf16.msra.mxu0 %v2355_v9  ;;  %v1987_v9 = vld [vmem:[%s4412_s29 + $0x520] sm:$0xff] }
 0x49b   : > { %3047 = vmatpush1.bf16.msra.mxu1 %v2483_v3  ;;  %3007 = vmatprep.subr.bf16.mxu0 %v2364_v20  ;;  %v2532_v3 = vunpack.c.l.s8.bf16 %v2052_v61  ;;  %v2051_v20 = vld [vmem:[%s4412_s29 + $0x720] sm:$0xff]  ;;  %v2411_v24 = vunpack.c.h.s8.bf16 %v1987_v9 }
 0x49c   : > { %3048 = vmatprep.subr.bf16.mxu1 %v2492_v47  ;;  %v2403_v47 = vunpack.c.l.s8.bf16 %v1987_v9  ;;  %v2531_v18 = vunpack.c.l.s8.bf16 %v2051_v20 }
 0x49e   : > { %3008 = vmatpush1.bf16.msra.mxu0 %v2363_v23  ;;  %v2540_v23 = vunpack.c.h.s8.bf16 %v2052_v61  ;;  %v1894_v61 = vld [vmem:[%s4412_s29 + $0x238] sm:$0xff] }
 0x49f   : > { %3049 = vmatpush1.bf16.msra.mxu1 %v2491_v26  ;;  %3009 = vmatprep.subr.bf16.mxu0 %v2372_v27  ;;  %v1996_v26 = vld [vmem:[%s4412_s29 + $0x568] sm:$0xff]  ;;  %v2214_v9 = vunpack.c.l.s8.bf16 %v1894_v61 }
 0x4a0   : > { %3050 = vmatprep.subr.bf16.mxu1 %v2500_v28  ;;  %v2060_v27 = vld [vmem:[%s4412_s29 + $0x768] sm:$0xff]  ;;  %v2539_v28 = vunpack.c.h.s8.bf16 %v2051_v20  ;;  %v2420_v29 = vunpack.c.l.s8.bf16 %v1996_v26  ;;  %v2428_v40 = vunpack.c.h.s8.bf16 %v1996_v26  ;;  %v1902_v26 = vld [vmem:[%s4412_s29 + $0x278] sm:$0xff] }
 0x4a2   : > { %3010 = vmatpush1.bf16.msra.mxu0 %v2371_v46  ;;  %v1995_v46 = vld [vmem:[%s4412_s29 + $0x560] sm:$0xff] }
 0x4a3   : > { %3051 = vmatpush1.bf16.msra.mxu1 %v2499_v30  ;;  %3011 = vmatprep.subr.bf16.mxu0 %v2380_v12  ;;  %v2548_v30 = vunpack.c.l.s8.bf16 %v2060_v27  ;;  %v2059_v12 = vld [vmem:[%s4412_s29 + $0x760] sm:$0xff]  ;;  %v2427_v43 = vunpack.c.h.s8.bf16 %v1995_v46 }
 0x4a4   : > { %v2707_v44 = vpop.f32.mrb[12].mxu0  ;;  %3052 = vmatprep.subr.bf16.mxu1 %v2508_v37  ;;  %v2419_v37 = vunpack.c.l.s8.bf16 %v1995_v46  ;;  %v2547_v1 = vunpack.c.l.s8.bf16 %v2059_v12  ;;  %v2230_v46 = vunpack.c.l.s8.bf16 %v1902_v26 }
 0x4a5   : > { %v2708_v15 = vadd.f32 %v2707_v44, %v4934_v39  ;;  %v2748_v48 = vpop.f32.mrb[12].mxu1  ;;  %v2709_v55 = vpop.f32.mrb[13].mxu0  ;;  %v2555_v44 = vunpack.c.h.s8.bf16 %v2059_v12 }
 0x4a6   : > { %v2710_v60 = vadd.f32 %v2709_v55, %v4936_v57  ;;  %v2750_v16 = vpop.f32.mrb[13].mxu1  ;;  %3012 = vmatpush1.bf16.msra.mxu0 %v2379_v41  ;;  %v2711_v51 = vpop.f32.mrb[14].mxu0  ;;  %v1988_v57 = vld [vmem:[%s4412_s29 + $0x528] sm:$0xff]  ;;  %v2556_v41 = vunpack.c.h.s8.bf16 %v2060_v27  ;;  %v2435_v55 = vunpack.c.l.s8.bf16 %v2003_v58 }
 0x4a7   : > { %v2749_v11 = vadd.f32 %v2748_v48, %v2708_v15  ;;  %3053 = vmatpush1.bf16.msra.mxu1 %v2507_v42  ;;  %v2752_v19 = vpop.f32.mrb[14].mxu1  ;;  %v2712_v53 = vpop.f32.mrb[15].mxu0  ;;  %3013 = vmatprep.subr.bf16.mxu0 %v2388_v2  ;;  %v2404_v8 = vunpack.c.l.s8.bf16 %v1988_v57  ;;  %v2412_v22 = vunpack.c.h.s8.bf16 %v1988_v57  ;;  %v2004_v42 = vld [vmem:[%s4412_s29 + $0x5a8] sm:$0xff]  ;;  %v2067_v48 = vld [vmem:[%s4412_s29 + $0x7a0] sm:$0xff] }
 0x4a8   : > { %v2751_v39 = vadd.f32 %v2750_v16, %v2710_v60  ;;  %v2753_v50 = vpop.f32.mrb[15].mxu1  ;;  %3054 = vmatprep.subr.bf16.mxu1 %v2516_v45  ;;  %v2068_v2 = vld [vmem:[%s4412_s29 + $0x7a8] sm:$0xff]  ;;  %v2436_v45 = vunpack.c.l.s8.bf16 %v2004_v42  ;;  %v2444_v60 = vunpack.c.h.s8.bf16 %v2004_v42  ;;  %v2011_v53 = vld [vmem:[%s4412_s29 + $0x5e0] sm:$0xff] }
 0x4a9   : > { %v3247_v17 = vadd.f32 %v2749_v11, %v1807_v59  ;;  %v2564_v15 = vunpack.c.l.s8.bf16 %v2068_v2  ;;  %v2563_v59 = vunpack.c.l.s8.bf16 %v2067_v48  ;;  %v2572_v16 = vunpack.c.h.s8.bf16 %v2068_v2  ;;  %v2012_v51 = vld [vmem:[%s4412_s29 + $0x5e8] sm:$0xff] }
 0x4aa   : > { %v3248_v54 = vadd.f32 %v2751_v39, %v1808_v52  ;;  %3014 = vmatpush1.bf16.msra.mxu0 %v2387_v10  ;;  %v2076_v10 = vld [vmem:[%s4412_s29 + $0x7e8] sm:$0xff]  ;;  %v2443_v11 = vunpack.c.h.s8.bf16 %v2003_v58  ;;  %v2571_v52 = vunpack.c.h.s8.bf16 %v2067_v48  ;;  %v2452_v19 = vunpack.c.l.s8.bf16 %v2012_v51 }
 0x4ab   : > { %3255 = vst [vmem:[#allocation2] sm:$0xff] %v3247_v17  ;;  %3055 = vmatpush1.bf16.msra.mxu1 %v2515_v0  ;;  %3015 = vmatprep.subr.bf16.mxu0 %v2396_v49  ;;  %v2580_v0 = vunpack.c.l.s8.bf16 %v2076_v10  ;;  %v2075_v49 = vld [vmem:[%s4412_s29 + $0x7e0] sm:$0xff]  ;;  %v2451_v39 = vunpack.c.l.s8.bf16 %v2011_v53  ;;  %v2588_v57 = vunpack.c.h.s8.bf16 %v2076_v10  ;;  %v1830_v17 = vld [vmem:[%s4412_s29 + $0x38] sm:$0xff] }
 0x4ac   : > { %3256 = vst [vmem:[#allocation2 + $0x8] sm:$0xff] %v3248_v54  ;;  %3056 = vmatprep.subr.bf16.mxu1 %v2524_v14  ;;  %v2579_v50 = vunpack.c.l.s8.bf16 %v2075_v49  ;;  %v2460_v14 = vunpack.c.h.s8.bf16 %v2012_v51  ;;  %v2459_v54 = vunpack.c.h.s8.bf16 %v2011_v53  ;;  %v1917_v53 = vld [vmem:[%s4412_s29 + $0x2f0] sm:$0xff] }
 0x4ae   : > { %3016 = vmatpush1.bf16.msra.mxu0 %v2395_v5  ;;  %v2587_v5 = vunpack.c.h.s8.bf16 %v2075_v49 }
 0x4af   : > { %3057 = vmatpush1.bf16.msra.mxu1 %v2523_v21  ;;  %3017 = vmatprep.subr.bf16.mxu0 %v2404_v8  ;;  %v2086_v21 = vunpack.c.l.s8.bf16 %v1830_v17  ;;  %v1829_v8 = vld [vmem:[%s4412_s29 + $0x30] sm:$0xff] }
 0x4b0   : > { %3058 = vmatprep.subr.bf16.mxu1 %v2532_v3  ;;  %v1893_v3 = vld [vmem:[%s4412_s29 + $0x230] sm:$0xff]  ;;  %v2085_v20 = vunpack.c.l.s8.bf16 %v1829_v8  ;;  %v2093_v27 = vunpack.c.h.s8.bf16 %v1829_v8 }
 0x4b2   : > { %3018 = vmatpush1.bf16.msra.mxu0 %v2403_v47  ;;  %v2213_v47 = vunpack.c.l.s8.bf16 %v1893_v3 }
 0x4b3   : > { %3059 = vmatpush1.bf16.msra.mxu1 %v2531_v18  ;;  %3019 = vmatprep.subr.bf16.mxu0 %v2412_v22  ;;  %v2094_v18 = vunpack.c.h.s8.bf16 %v1830_v17  ;;  %v1838_v22 = vld [vmem:[%s4412_s29 + $0x78] sm:$0xff] }
 0x4b4   : > { %3060 = vmatprep.subr.bf16.mxu1 %v2540_v23  ;;  %v2222_v23 = vunpack.c.h.s8.bf16 %v1894_v61 }
 0x4b6   : > { %3020 = vmatpush1.bf16.msra.mxu0 %v2411_v24  ;;  %v2221_v24 = vunpack.c.h.s8.bf16 %v1893_v3  ;;  %v1862_v3 = vld [vmem:[%s4412_s29 + $0x138] sm:$0xff] }
 0x4b7   : > { %3061 = vmatpush1.bf16.msra.mxu1 %v2539_v28  ;;  %3021 = vmatprep.subr.bf16.mxu0 %v2420_v29  ;;  %v2102_v28 = vunpack.c.l.s8.bf16 %v1838_v22  ;;  %v1837_v29 = vld [vmem:[%s4412_s29 + $0x70] sm:$0xff] }
 0x4b8   : > { %3062 = vmatprep.subr.bf16.mxu1 %v2548_v30  ;;  %v1901_v30 = vld [vmem:[%s4412_s29 + $0x270] sm:$0xff]  ;;  %v2101_v12 = vunpack.c.l.s8.bf16 %v1837_v29  ;;  %v2109_v42 = vunpack.c.h.s8.bf16 %v1837_v29  ;;  %v2158_v29 = vunpack.c.h.s8.bf16 %v1862_v3 }
 0x4ba   : > { %3022 = vmatpush1.bf16.msra.mxu0 %v2419_v37  ;;  %v2229_v37 = vunpack.c.l.s8.bf16 %v1901_v30 }
 0x4bb   : > { %3063 = vmatpush1.bf16.msra.mxu1 %v2547_v1  ;;  %3023 = vmatprep.subr.bf16.mxu0 %v2428_v40  ;;  %v2238_v1 = vunpack.c.h.s8.bf16 %v1902_v26  ;;  %v1846_v40 = vld [vmem:[%s4412_s29 + $0xb8] sm:$0xff] }
 0x4bc   : > { %3064 = vmatprep.subr.bf16.mxu1 %v2556_v41  ;;  %v1910_v41 = vld [vmem:[%s4412_s29 + $0x2b8] sm:$0xff]  ;;  %v2118_v2 = vunpack.c.l.s8.bf16 %v1846_v40  ;;  %v2126_v48 = vunpack.c.h.s8.bf16 %v1846_v40  ;;  %v1869_v40 = vld [vmem:[%s4412_s29 + $0x170] sm:$0xff] }
 0x4be   : > { %3024 = vmatpush1.bf16.msra.mxu0 %v2427_v43  ;;  %v1845_v43 = vld [vmem:[%s4412_s29 + $0xb0] sm:$0xff] }
 0x4bf   : > { %3065 = vmatpush1.bf16.msra.mxu1 %v2555_v44  ;;  %3025 = vmatprep.subr.bf16.mxu0 %v2436_v45  ;;  %v2246_v44 = vunpack.c.l.s8.bf16 %v1910_v41  ;;  %v1909_v45 = vld [vmem:[%s4412_s29 + $0x2b0] sm:$0xff]  ;;  %v2117_v58 = vunpack.c.l.s8.bf16 %v1845_v43 }
 0x4c0   : > { %3066 = vmatprep.subr.bf16.mxu1 %v2564_v15  ;;  %v2245_v15 = vunpack.c.l.s8.bf16 %v1909_v45  ;;  %v2253_v51 = vunpack.c.h.s8.bf16 %v1909_v45  ;;  %v1878_v45 = vld [vmem:[%s4412_s29 + $0x1b8] sm:$0xff] }
 0x4c2   : > { %3026 = vmatpush1.bf16.msra.mxu0 %v2435_v55  ;;  %v2254_v55 = vunpack.c.h.s8.bf16 %v1910_v41 }
 0x4c3   : > { %3067 = vmatpush1.bf16.msra.mxu1 %v2563_v59  ;;  %3027 = vmatprep.subr.bf16.mxu0 %v2444_v60  ;;  %v1854_v59 = vld [vmem:[%s4412_s29 + $0xf8] sm:$0xff] }
 0x4c4   : > { %3068 = vmatprep.subr.bf16.mxu1 %v2572_v16  ;;  %v1918_v60 = vld [vmem:[%s4412_s29 + $0x2f8] sm:$0xff]  ;;  %v2125_v16 = vunpack.c.h.s8.bf16 %v1845_v43  ;;  %v2134_v10 = vunpack.c.l.s8.bf16 %v1854_v59 }
 0x4c6   : > { %3028 = vmatpush1.bf16.msra.mxu0 %v2443_v11  ;;  %v1853_v11 = vld [vmem:[%s4412_s29 + $0xf0] sm:$0xff] }
 0x4c7   : > { %3069 = vmatpush1.bf16.msra.mxu1 %v2571_v52  ;;  %3029 = vmatprep.subr.bf16.mxu0 %v2452_v19  ;;  %v2262_v19 = vunpack.c.l.s8.bf16 %v1918_v60 }
 0x4c8   : > { %3070 = vmatprep.subr.bf16.mxu1 %v2580_v0 }
 0x4ca   : > { %3030 = vmatpush1.bf16.msra.mxu0 %v2451_v39 }
 0x4cb   : > { %3071 = vmatpush1.bf16.msra.mxu1 %v2579_v50  ;;  %3031 = vmatprep.subr.bf16.mxu0 %v2460_v14 }
 0x4cc   : > { %3072 = vmatprep.subr.bf16.mxu1 %v2588_v57  ;;  %v2133_v57 = vunpack.c.l.s8.bf16 %v1853_v11 }
 0x4ce   : > { %3032 = vmatpush1.bf16.msra.mxu0 %v2459_v54 }
 0x4cf   : > { %3073 = vmatpush1.bf16.msra.mxu1 %v2587_v5  ;;  %3083 = vmatprep.subr.bf16.mxu0 %v2086_v21  ;;  %v2261_v5 = vunpack.c.l.s8.bf16 %v1917_v53  ;;  %v2142_v21 = vunpack.c.h.s8.bf16 %v1854_v59  ;;  %v1877_v59 = vld [vmem:[%s4412_s29 + $0x1b0] sm:$0xff] }
 0x4d0   : > { %3124 = vmatprep.subr.bf16.mxu1 %v2214_v9  ;;  %v2270_v9 = vunpack.c.h.s8.bf16 %v1918_v60 }
 0x4d1   : > { %3034 = vmatmul.mubr.bf16.vlgmr.msra.gmra.mrb[28].mxu0 %v4840_v63 }
 0x4d2   : > { %3075 = vmatmul.mubr.bf16.vlgmr.msra.gmra.mrb[28].mxu1 %v4843_v13  ;;  %3084 = vmatpush1.bf16.msra.mxu0 %v2085_v20  ;;  %v1926_v20 = vld [vmem:[%s4412_s29 + $0x338] sm:$0xff] }
 0x4d3   : > { %3115 = vmatprep.mubr.bf16.mxu0 %v4720_v25  ;;  %3125 = vmatpush1.bf16.msra.mxu1 %v2213_v47  ;;  %v2110_v25 = vunpack.c.h.s8.bf16 %v1838_v22  ;;  %v2141_v47 = vunpack.c.h.s8.bf16 %v1853_v11  ;;  %v2150_v22 = vunpack.c.l.s8.bf16 %v1862_v3  ;;  %v2278_v26 = vunpack.c.l.s8.bf16 %v1926_v20  ;;  %v2022_v3 = vld [vmem:[%s4412_s29 + $0x638] sm:$0xff] }
 0x4d4   : > { %3156 = vmatprep.mubr.bf16.mxu1 %v4722_v31  ;;  %3085 = vmatprep.subr.bf16.mxu0 %v2094_v18  ;;  %v2237_v31 = vunpack.c.h.s8.bf16 %v1901_v30  ;;  %v2269_v18 = vunpack.c.h.s8.bf16 %v1917_v53  ;;  %v1870_v30 = vld [vmem:[%s4412_s29 + $0x178] sm:$0xff]  ;;  %v2190_v11 = vunpack.c.h.s8.bf16 %v1878_v45 }
 0x4d5   : > { %3126 = vmatprep.subr.bf16.mxu1 %v2222_v23  ;;  %v1861_v23 = vld [vmem:[%s4412_s29 + $0x130] sm:$0xff]  ;;  %v2174_v43 = vunpack.c.h.s8.bf16 %v1870_v30  ;;  %v1950_v53 = vld [vmem:[%s4412_s29 + $0x3f8] sm:$0xff] }
 0x4d6   : > { %3086 = vmatpush1.bf16.msra.mxu0 %v2093_v27  ;;  %v1925_v27 = vld [vmem:[%s4412_s29 + $0x330] sm:$0xff] }
 0x4d7   : > { %3127 = vmatpush1.bf16.msra.mxu1 %v2221_v24  ;;  %3087 = vmatprep.subr.bf16.mxu0 %v2102_v28  ;;  %v2149_v24 = vunpack.c.l.s8.bf16 %v1861_v23  ;;  %v2277_v28 = vunpack.c.l.s8.bf16 %v1925_v27 }
 0x4d8   : > { %3128 = vmatprep.subr.bf16.mxu1 %v2230_v46  ;;  %v2286_v46 = vunpack.c.h.s8.bf16 %v1926_v20 }
 0x4da   : > { %3088 = vmatpush1.bf16.msra.mxu0 %v2101_v12  ;;  %v1934_v12 = vld [vmem:[%s4412_s29 + $0x378] sm:$0xff] }
 0x4db   : > { %3129 = vmatpush1.bf16.msra.mxu1 %v2229_v37  ;;  %3089 = vmatprep.subr.bf16.mxu0 %v2110_v25  ;;  %v2157_v37 = vunpack.c.h.s8.bf16 %v1861_v23  ;;  %v2285_v25 = vunpack.c.h.s8.bf16 %v1925_v27  ;;  %v2294_v41 = vunpack.c.l.s8.bf16 %v1934_v12  ;;  %v2470_v23 = vunpack.c.l.s8.bf16 %v2022_v3 }
 0x4dc   : > { %3130 = vmatprep.subr.bf16.mxu1 %v2238_v1  ;;  %v2166_v1 = vunpack.c.l.s8.bf16 %v1870_v30  ;;  %v2030_v30 = vld [vmem:[%s4412_s29 + $0x678] sm:$0xff] }
 0x4de   : > { %3090 = vmatpush1.bf16.msra.mxu0 %v2109_v42  ;;  %v1933_v42 = vld [vmem:[%s4412_s29 + $0x370] sm:$0xff] }
 0x4df   : > { %3131 = vmatpush1.bf16.msra.mxu1 %v2237_v31  ;;  %3091 = vmatprep.subr.bf16.mxu0 %v2118_v2  ;;  %v2165_v31 = vunpack.c.l.s8.bf16 %v1869_v40  ;;  %v2293_v2 = vunpack.c.l.s8.bf16 %v1933_v42 }
 0x4e0   : > { %3132 = vmatprep.subr.bf16.mxu1 %v2246_v44  ;;  %v2302_v44 = vunpack.c.h.s8.bf16 %v1934_v12 }
 0x4e2   : > { %3092 = vmatpush1.bf16.msra.mxu0 %v2117_v58  ;;  %v1942_v58 = vld [vmem:[%s4412_s29 + $0x3b8] sm:$0xff] }
 0x4e3   : > { %3133 = vmatpush1.bf16.msra.mxu1 %v2245_v15  ;;  %3093 = vmatprep.subr.bf16.mxu0 %v2126_v48  ;;  %v2173_v15 = vunpack.c.h.s8.bf16 %v1869_v40  ;;  %v2301_v48 = vunpack.c.h.s8.bf16 %v1933_v42  ;;  %v2310_v60 = vunpack.c.l.s8.bf16 %v1942_v58  ;;  %v2486_v40 = vunpack.c.l.s8.bf16 %v2030_v30 }
 0x4e4   : > { %v2789_v52 = vpop.f32.mrb[16].mxu0  ;;  %3134 = vmatprep.subr.bf16.mxu1 %v2254_v55  ;;  %v2182_v55 = vunpack.c.l.s8.bf16 %v1878_v45  ;;  %v2494_v42 = vunpack.c.h.s8.bf16 %v2030_v30  ;;  %v1973_v45 = vld [vmem:[%s4412_s29 + $0x4b0] sm:$0xff] }
 0x4e5   : > { %v2830_v0 = vpop.f32.mrb[16].mxu1  ;;  %v2791_v49 = vpop.f32.mrb[17].mxu0 }
 0x4e6   : > { %v5012_v39 = vadd.f32 %v2830_v0, %v2789_v52  ;;  %v2832_v50 = vpop.f32.mrb[17].mxu1  ;;  %v2793_v14 = vpop.f32.mrb[18].mxu0  ;;  %3094 = vmatpush1.bf16.msra.mxu0 %v2125_v16  ;;  %v1941_v16 = vld [vmem:[%s4412_s29 + $0x3b0] sm:$0xff]  ;;  %v2318_v52 = vunpack.c.h.s8.bf16 %v1942_v58  ;;  %v2189_v0 = vunpack.c.h.s8.bf16 %v1877_v59 }
 0x4e7   : > { %v5014_v17 = vadd.f32 %v2832_v50, %v2791_v49  ;;  %v2834_v61 = vpop.f32.mrb[18].mxu1  ;;  %3135 = vmatpush1.bf16.msra.mxu1 %v2253_v51  ;;  %v2794_v54 = vpop.f32.mrb[19].mxu0  ;;  %3095 = vmatprep.subr.bf16.mxu0 %v2134_v10  ;;  %v2181_v51 = vunpack.c.l.s8.bf16 %v1877_v59  ;;  %v2309_v10 = vunpack.c.l.s8.bf16 %v1941_v16  ;;  %v2317_v49 = vunpack.c.h.s8.bf16 %v1941_v16  ;;  %v1885_v14 = vld [vmem:[%s4412_s29 + $0x1f0] sm:$0xff]  ;;  %v1982_v16 = vld [vmem:[%s4412_s29 + $0x4f8] sm:$0xff] }
 0x4e8   : > { %v2835_v8 = vpop.f32.mrb[19].mxu1  ;;  %3136 = vmatprep.subr.bf16.mxu1 %v2262_v19  ;;  %v1886_v19 = vld [vmem:[%s4412_s29 + $0x1f8] sm:$0xff]  ;;  %v1949_v61 = vld [vmem:[%s4412_s29 + $0x3f0] sm:$0xff]  ;;  %v2197_v54 = vunpack.c.l.s8.bf16 %v1885_v14  ;;  %v2205_v20 = vunpack.c.h.s8.bf16 %v1885_v14 }
 0x4e9   : > { %v2198_v50 = vunpack.c.l.s8.bf16 %v1886_v19  ;;  %v2334_v8 = vunpack.c.h.s8.bf16 %v1950_v53 }
 0x4ea   : > { %3096 = vmatpush1.bf16.msra.mxu0 %v2133_v57  ;;  %v2326_v57 = vunpack.c.l.s8.bf16 %v1950_v53 }
 0x4eb   : > { %3137 = vmatpush1.bf16.msra.mxu1 %v2261_v5  ;;  %3097 = vmatprep.subr.bf16.mxu0 %v2142_v21  ;;  %v2325_v5 = vunpack.c.l.s8.bf16 %v1949_v61  ;;  %v2206_v21 = vunpack.c.h.s8.bf16 %v1886_v19  ;;  %v1981_v19 = vld [vmem:[%s4412_s29 + $0x4f0] sm:$0xff] }
 0x4ec   : > { %3138 = vmatprep.subr.bf16.mxu1 %v2270_v9  ;;  %v1958_v9 = vld [vmem:[%s4412_s29 + $0x438] sm:$0xff] }
 0x4ee   : > { %3098 = vmatpush1.bf16.msra.mxu0 %v2141_v47  ;;  %v2333_v47 = vunpack.c.h.s8.bf16 %v1949_v61  ;;  %v1809_v61 = vld [vmem:[#allocation2 + $0x10] sm:$0xff] }
 0x4ef   : > { %3139 = vmatpush1.bf16.msra.mxu1 %v2269_v18  ;;  %3099 = vmatprep.subr.bf16.mxu0 %v2150_v22  ;;  %v2342_v18 = vunpack.c.l.s8.bf16 %v1958_v9  ;;  %v1957_v22 = vld [vmem:[%s4412_s29 + $0x430] sm:$0xff] }
 0x4f0   : > { %3140 = vmatprep.subr.bf16.mxu1 %v2278_v26  ;;  %v2021_v26 = vld [vmem:[%s4412_s29 + $0x630] sm:$0xff]  ;;  %v2341_v27 = vunpack.c.l.s8.bf16 %v1957_v22  ;;  %v2349_v12 = vunpack.c.h.s8.bf16 %v1957_v22  ;;  %v2398_v22 = vunpack.c.h.s8.bf16 %v1982_v16 }
 0x4f2   : > { %3100 = vmatpush1.bf16.msra.mxu0 %v2149_v24  ;;  %v2469_v24 = vunpack.c.l.s8.bf16 %v2021_v26 }
 0x4f3   : > { %3141 = vmatpush1.bf16.msra.mxu1 %v2277_v28  ;;  %3101 = vmatprep.subr.bf16.mxu0 %v2158_v29  ;;  %v2350_v28 = vunpack.c.h.s8.bf16 %v1958_v9  ;;  %v1966_v29 = vld [vmem:[%s4412_s29 + $0x478] sm:$0xff] }
 0x4f4   : > { %3142 = vmatprep.subr.bf16.mxu1 %v2286_v46  ;;  %v2478_v46 = vunpack.c.h.s8.bf16 %v2022_v3  ;;  %v1810_v3 = vld [vmem:[#allocation2 + $0x18] sm:$0xff] }
 0x4f6   : > { %3102 = vmatpush1.bf16.msra.mxu0 %v2157_v37  ;;  %v2477_v37 = vunpack.c.h.s8.bf16 %v2021_v26 }
 0x4f7   : > { %3143 = vmatpush1.bf16.msra.mxu1 %v2285_v25  ;;  %3103 = vmatprep.subr.bf16.mxu0 %v2166_v1  ;;  %v2358_v25 = vunpack.c.l.s8.bf16 %v1966_v29  ;;  %v1965_v1 = vld [vmem:[%s4412_s29 + $0x470] sm:$0xff] }
 0x4f8   : > { %3144 = vmatprep.subr.bf16.mxu1 %v2294_v41  ;;  %v2029_v41 = vld [vmem:[%s4412_s29 + $0x670] sm:$0xff] }
 0x4fa   : > { %3104 = vmatpush1.bf16.msra.mxu0 %v2165_v31  ;;  %v1974_v31 = vld [vmem:[%s4412_s29 + $0x4b8] sm:$0xff] }
 0x4fb   : > { %3145 = vmatpush1.bf16.msra.mxu1 %v2293_v2  ;;  %3105 = vmatprep.subr.bf16.mxu0 %v2174_v43  ;;  %v2038_v2 = vld [vmem:[%s4412_s29 + $0x6b8] sm:$0xff]  ;;  %v2365_v43 = vunpack.c.h.s8.bf16 %v1965_v1  ;;  %v2382_v59 = vunpack.c.h.s8.bf16 %v1974_v31 }
 0x4fc   : > { %3146 = vmatprep.subr.bf16.mxu1 %v2302_v44  ;;  %v2374_v44 = vunpack.c.l.s8.bf16 %v1974_v31  ;;  %v2502_v58 = vunpack.c.l.s8.bf16 %v2038_v2 }
 0x4fe   : > { %3106 = vmatpush1.bf16.msra.mxu0 %v2173_v15  ;;  %v2037_v15 = vld [vmem:[%s4412_s29 + $0x6b0] sm:$0xff] }
 0x4ff   : > { %3147 = vmatpush1.bf16.msra.mxu1 %v2301_v48  ;;  %3107 = vmatprep.subr.bf16.mxu0 %v2182_v55  ;;  %v2373_v48 = vunpack.c.l.s8.bf16 %v1973_v45  ;;  %v2501_v55 = vunpack.c.l.s8.bf16 %v2037_v15 }
 0x500   : > { %3148 = vmatprep.subr.bf16.mxu1 %v2310_v60  ;;  %v2510_v60 = vunpack.c.h.s8.bf16 %v2038_v2 }
 0x502   : > { %3108 = vmatpush1.bf16.msra.mxu0 %v2181_v51  ;;  %v2046_v51 = vld [vmem:[%s4412_s29 + $0x6f8] sm:$0xff] }
 0x503   : > { %3149 = vmatpush1.bf16.msra.mxu1 %v2309_v10  ;;  %3109 = vmatprep.subr.bf16.mxu0 %v2190_v11  ;;  %v2381_v10 = vunpack.c.h.s8.bf16 %v1973_v45  ;;  %v2509_v11 = vunpack.c.h.s8.bf16 %v2037_v15  ;;  %v2526_v26 = vunpack.c.h.s8.bf16 %v2046_v51 }
 0x504   : > { %3150 = vmatprep.subr.bf16.mxu1 %v2318_v52  ;;  %v2390_v52 = vunpack.c.l.s8.bf16 %v1982_v16 }
 0x506   : > { %3110 = vmatpush1.bf16.msra.mxu0 %v2189_v0  ;;  %v2518_v0 = vunpack.c.l.s8.bf16 %v2046_v51 }
 0x507   : > { %3151 = vmatpush1.bf16.msra.mxu1 %v2317_v49  ;;  %3111 = vmatprep.subr.bf16.mxu0 %v2198_v50  ;;  %v2045_v49 = vld [vmem:[%s4412_s29 + $0x6f0] sm:$0xff] }
 0x508   : > { %3152 = vmatprep.subr.bf16.mxu1 %v2326_v57 }
 0x50a   : > { %3112 = vmatpush1.bf16.msra.mxu0 %v2197_v54 }
 0x50b   : > { %3153 = vmatpush1.bf16.msra.mxu1 %v2325_v5  ;;  %3113 = vmatprep.subr.bf16.mxu0 %v2206_v21 }
 0x50c   : > { %3154 = vmatprep.subr.bf16.mxu1 %v2334_v8  ;;  %v2389_v8 = vunpack.c.l.s8.bf16 %v1981_v19 }
 0x50e   : > { %3114 = vmatpush1.bf16.msra.mxu0 %v2205_v20 }
 0x50f   : > { %3155 = vmatpush1.bf16.msra.mxu1 %v2333_v47  ;;  %3165 = vmatprep.subr.bf16.mxu0 %v2342_v18  ;;  %v2517_v18 = vunpack.c.l.s8.bf16 %v2045_v49 }
 0x510   : > { %3206 = vmatprep.subr.bf16.mxu1 %v2470_v23 }
 0x511   : > { %3116 = vmatmul.mubr.bf16.vlgmr.msra.gmra.mrb[32].mxu0 %v4724_v32  ;;  %v2357_v32 = vunpack.c.l.s8.bf16 %v1965_v1 }
 0x512   : > { %3157 = vmatmul.mubr.bf16.vlgmr.msra.gmra.mrb[32].mxu1 %v4728_v33  ;;  %3166 = vmatpush1.bf16.msra.mxu0 %v2341_v27  ;;  %v2485_v33 = vunpack.c.l.s8.bf16 %v2029_v41 }
 0x513   : > { %3197 = vmatprep.mubr.bf16.mxu0 %v4836_v56  ;;  %3207 = vmatpush1.bf16.msra.mxu1 %v2469_v24  ;;  %v2366_v56 = vunpack.c.h.s8.bf16 %v1966_v29  ;;  %v2054_v24 = vld [vmem:[%s4412_s29 + $0x738] sm:$0xff]  ;;  %v2397_v29 = vunpack.c.h.s8.bf16 %v1981_v19 }
 0x514   : > { %3238 = vmatprep.mubr.bf16.mxu1 %v4838_v7  ;;  %3167 = vmatprep.subr.bf16.mxu0 %v2350_v28  ;;  %v2493_v7 = vunpack.c.h.s8.bf16 %v2029_v41 }
 0x515   : > { %3208 = vmatprep.subr.bf16.mxu1 %v2478_v46  ;;  %v2525_v46 = vunpack.c.h.s8.bf16 %v2045_v49 }
 0x516   : > { %3168 = vmatpush1.bf16.msra.mxu0 %v2349_v12  ;;  %v1989_v12 = vld [vmem:[%s4412_s29 + $0x530] sm:$0xff] }
 0x517   : > { %3209 = vmatpush1.bf16.msra.mxu1 %v2477_v37  ;;  %3169 = vmatprep.subr.bf16.mxu0 %v2358_v25  ;;  %v2534_v37 = vunpack.c.l.s8.bf16 %v2054_v24  ;;  %v2053_v25 = vld [vmem:[%s4412_s29 + $0x730] sm:$0xff]  ;;  %v2405_v1 = vunpack.c.l.s8.bf16 %v1989_v12 }
 0x518   : > { %3210 = vmatprep.subr.bf16.mxu1 %v2486_v40  ;;  %v2533_v40 = vunpack.c.l.s8.bf16 %v2053_v25  ;;  %v2541_v31 = vunpack.c.h.s8.bf16 %v2053_v25 }
 0x51a   : > { %3170 = vmatpush1.bf16.msra.mxu0 %v2357_v32  ;;  %v2542_v32 = vunpack.c.h.s8.bf16 %v2054_v24 }
 0x51b   : > { %3211 = vmatpush1.bf16.msra.mxu1 %v2485_v33  ;;  %3171 = vmatprep.subr.bf16.mxu0 %v2366_v56  ;;  %v1998_v33 = vld [vmem:[%s4412_s29 + $0x578] sm:$0xff] }
 0x51c   : > { %3212 = vmatprep.subr.bf16.mxu1 %v2494_v42  ;;  %v2062_v56 = vld [vmem:[%s4412_s29 + $0x778] sm:$0xff]  ;;  %v2413_v42 = vunpack.c.h.s8.bf16 %v1989_v12  ;;  %v2422_v2 = vunpack.c.l.s8.bf16 %v1998_v33  ;;  %v2430_v15 = vunpack.c.h.s8.bf16 %v1998_v33 }
 0x51e   : > { %3172 = vmatpush1.bf16.msra.mxu0 %v2365_v43  ;;  %v1997_v43 = vld [vmem:[%s4412_s29 + $0x570] sm:$0xff] }
 0x51f   : > { %3213 = vmatpush1.bf16.msra.mxu1 %v2493_v7  ;;  %3173 = vmatprep.subr.bf16.mxu0 %v2374_v44  ;;  %v2550_v7 = vunpack.c.l.s8.bf16 %v2062_v56  ;;  %v2061_v44 = vld [vmem:[%s4412_s29 + $0x770] sm:$0xff]  ;;  %v2421_v45 = vunpack.c.l.s8.bf16 %v1997_v43 }
 0x520   : > { %3214 = vmatprep.subr.bf16.mxu1 %v2502_v58  ;;  %v2549_v58 = vunpack.c.l.s8.bf16 %v2061_v44  ;;  %v2557_v16 = vunpack.c.h.s8.bf16 %v2061_v44 }
 0x522   : > { %3174 = vmatpush1.bf16.msra.mxu0 %v2373_v48  ;;  %v2558_v48 = vunpack.c.h.s8.bf16 %v2062_v56 }
 0x523   : > { %3215 = vmatpush1.bf16.msra.mxu1 %v2501_v55  ;;  %3175 = vmatprep.subr.bf16.mxu0 %v2382_v59  ;;  %v2006_v55 = vld [vmem:[%s4412_s29 + $0x5b8] sm:$0xff] }
 0x524   : > { %v2871_v53 = vpop.f32.mrb[20].mxu0  ;;  %3216 = vmatprep.subr.bf16.mxu1 %v2510_v60  ;;  %v2070_v59 = vld [vmem:[%s4412_s29 + $0x7b8] sm:$0xff]  ;;  %v2429_v60 = vunpack.c.h.s8.bf16 %v1997_v43  ;;  %v2438_v51 = vunpack.c.l.s8.bf16 %v2006_v55 }
 0x525   : > { %v2872_v50 = vadd.f32 %v2871_v53, %v5012_v39  ;;  %v2912_v14 = vpop.f32.mrb[20].mxu1  ;;  %v2873_v57 = vpop.f32.mrb[21].mxu0  ;;  %v2574_v49 = vunpack.c.h.s8.bf16 %v2070_v59 }
 0x526   : > { %v2874_v54 = vadd.f32 %v2873_v57, %v5014_v17  ;;  %v2914_v5 = vpop.f32.mrb[21].mxu1  ;;  %v2875_v21 = vpop.f32.mrb[22].mxu0  ;;  %3176 = vmatpush1.bf16.msra.mxu0 %v2381_v10  ;;  %v1990_v17 = vld [vmem:[%s4412_s29 + $0x538] sm:$0xff]  ;;  %v2005_v10 = vld [vmem:[%s4412_s29 + $0x5b0] sm:$0xff] }
 0x527   : > { %v2913_v9 = vadd.f32 %v2912_v14, %v2872_v50  ;;  %v2916_v20 = vpop.f32.mrb[22].mxu1  ;;  %3217 = vmatpush1.bf16.msra.mxu1 %v2509_v11  ;;  %v2876_v47 = vpop.f32.mrb[23].mxu0  ;;  %3177 = vmatprep.subr.bf16.mxu0 %v2390_v52  ;;  %v2406_v30 = vunpack.c.l.s8.bf16 %v1990_v17  ;;  %v2414_v41 = vunpack.c.h.s8.bf16 %v1990_v17  ;;  %v2566_v11 = vunpack.c.l.s8.bf16 %v2070_v59  ;;  %v2069_v52 = vld [vmem:[%s4412_s29 + $0x7b0] sm:$0xff]  ;;  %v2014_v50 = vld [vmem:[%s4412_s29 + $0x5f8] sm:$0xff] }
 0x528   : > { %v2915_v39 = vadd.f32 %v2914_v5, %v2874_v54  ;;  %v2917_v23 = vpop.f32.mrb[23].mxu1  ;;  %3218 = vmatprep.subr.bf16.mxu1 %v2518_v0  ;;  %v2437_v19 = vunpack.c.l.s8.bf16 %v2005_v10  ;;  %v2565_v53 = vunpack.c.l.s8.bf16 %v2069_v52  ;;  %v2446_v0 = vunpack.c.h.s8.bf16 %v2006_v55  ;;  %v2078_v14 = vld [vmem:[%s4412_s29 + $0x7f8] sm:$0xff]  ;;  %v2013_v5 = vld [vmem:[%s4412_s29 + $0x5f0] sm:$0xff] }
 0x529   : > { %v3249_v27 = vadd.f32 %v2913_v9, %v1809_v61  ;;  %v2445_v57 = vunpack.c.h.s8.bf16 %v2005_v10  ;;  %v2573_v61 = vunpack.c.h.s8.bf16 %v2069_v52  ;;  %v2454_v54 = vunpack.c.l.s8.bf16 %v2014_v50 }
 0x52a   : > { %v3250_v28 = vadd.f32 %v2915_v39, %v1810_v3  ;;  %3178 = vmatpush1.bf16.msra.mxu0 %v2389_v8  ;;  %v2582_v21 = vunpack.c.l.s8.bf16 %v2078_v14  ;;  %v2077_v8 = vld [vmem:[%s4412_s29 + $0x7f0] sm:$0xff]  ;;  %v2453_v9 = vunpack.c.l.s8.bf16 %v2013_v5  ;;  %v2462_v20 = vunpack.c.h.s8.bf16 %v2014_v50 }
 0x52b   : > { %3257 = vst [vmem:[#allocation2 + $0x10] sm:$0xff] %v3249_v27  ;;  %3219 = vmatpush1.bf16.msra.mxu1 %v2517_v18  ;;  %3179 = vmatprep.subr.bf16.mxu0 %v2398_v22  ;;  %v2581_v3 = vunpack.c.l.s8.bf16 %v2077_v8  ;;  %v2590_v47 = vunpack.c.h.s8.bf16 %v2078_v14  ;;  %v2461_v18 = vunpack.c.h.s8.bf16 %v2013_v5  ;;  %v2589_v22 = vunpack.c.h.s8.bf16 %v2077_v8 }
 0x52c   : > { %3258 = vst [vmem:[#allocation2 + $0x18] sm:$0xff] %v3250_v28  ;;  %3220 = vmatprep.subr.bf16.mxu1 %v2526_v26 }
 0x52e   : > { %3180 = vmatpush1.bf16.msra.mxu0 %v2397_v29 }
 0x52f   : > { %3221 = vmatpush1.bf16.msra.mxu1 %v2525_v46  ;;  %3181 = vmatprep.subr.bf16.mxu0 %v2406_v30 }
 0x530   : > { %3222 = vmatprep.subr.bf16.mxu1 %v2534_v37 }
 0x532   : > { %3182 = vmatpush1.bf16.msra.mxu0 %v2405_v1 }
 0x533   : > { %3223 = vmatpush1.bf16.msra.mxu1 %v2533_v40  ;;  %3183 = vmatprep.subr.bf16.mxu0 %v2414_v41  ;;  %v1811_v40 = vld [vmem:[#allocation2 + $0x20] sm:$0xff] }
 0x534   : > { %3224 = vmatprep.subr.bf16.mxu1 %v2542_v32 }
 0x536   : > { %3184 = vmatpush1.bf16.msra.mxu0 %v2413_v42 }
 0x537   : > { %3225 = vmatpush1.bf16.msra.mxu1 %v2541_v31  ;;  %3185 = vmatprep.subr.bf16.mxu0 %v2422_v2 }
 0x538   : > { %3226 = vmatprep.subr.bf16.mxu1 %v2550_v7 }
 0x53a   : > { %3186 = vmatpush1.bf16.msra.mxu0 %v2421_v45 }
 0x53b   : > { %3227 = vmatpush1.bf16.msra.mxu1 %v2549_v58  ;;  %3187 = vmatprep.subr.bf16.mxu0 %v2430_v15 }
 0x53c   : > { %3228 = vmatprep.subr.bf16.mxu1 %v2558_v48 }
 0x53e   : > { %3188 = vmatpush1.bf16.msra.mxu0 %v2429_v60 }
 0x53f   : > { %3229 = vmatpush1.bf16.msra.mxu1 %v2557_v16  ;;  %3189 = vmatprep.subr.bf16.mxu0 %v2438_v51 }
 0x540   : > { %3230 = vmatprep.subr.bf16.mxu1 %v2566_v11 }
 0x542   : > { %3190 = vmatpush1.bf16.msra.mxu0 %v2437_v19 }
 0x543   : > { %3231 = vmatpush1.bf16.msra.mxu1 %v2565_v53  ;;  %3191 = vmatprep.subr.bf16.mxu0 %v2446_v0  ;;  %v1813_v53 = vld [vmem:[#allocation2 + $0x30] sm:$0xff] }
 0x544   : > { %3232 = vmatprep.subr.bf16.mxu1 %v2574_v49 }
 0x546   : > { %3192 = vmatpush1.bf16.msra.mxu0 %v2445_v57  ;;  %v1814_v57 = vld [vmem:[#allocation2 + $0x38] sm:$0xff] }
 0x547   : > { %3233 = vmatpush1.bf16.msra.mxu1 %v2573_v61  ;;  %3193 = vmatprep.subr.bf16.mxu0 %v2454_v54 }
 0x548   : > { %3234 = vmatprep.subr.bf16.mxu1 %v2582_v21 }
 0x54a   : > { %3194 = vmatpush1.bf16.msra.mxu0 %v2453_v9 }
 0x54b   : > { %3235 = vmatpush1.bf16.msra.mxu1 %v2581_v3  ;;  %3195 = vmatprep.subr.bf16.mxu0 %v2462_v20  ;;  %v3272_v3 = vld [vmem:[#allocation12 + $0x82] ss:$4 sm:$0xff] (!%p3787_p3) }
 0x54c   : > { %3236 = vmatprep.subr.bf16.mxu1 %v2590_v47  ;;  %v3273_v20 = vld [vmem:[#allocation2] sm:$0xff] (!%p3787_p3)  ;;  %v3274_v47 = vld [vmem:[#allocation2 + $0x8] sm:$0xff] (!%p3787_p3) }
 0x54e   : > { %3196 = vmatpush1.bf16.msra.mxu0 %v2461_v18  ;;  %v3275_v18 = vld [vmem:[#allocation2 + $0x10] sm:$0xff] (!%p3787_p3) }
 0x54f   : > { %3237 = vmatpush1.bf16.msra.mxu1 %v2589_v22  ;;  %v3285_v22 = vrot.slane (!%p3787_p3), %v3272_v3, %v4666_v34 }
 0x551   : > { %3198 = vmatmul.mubr.bf16.vlgmr.msra.gmra.mrb[36].mxu0 %v4840_v63 }
 0x552   : > { %3239 = vmatmul.mubr.bf16.vlgmr.msra.gmra.mrb[36].mxu1 %v4843_v13  ;;  %v1812_v13 = vld [vmem:[#allocation2 + $0x28] sm:$0xff] }
 0x564   : > { %v2953_v39 = vpop.f32.mrb[24].mxu0 }
 0x565   : > { %v2994_v23 = vpop.f32.mrb[24].mxu1  ;;  %v2955_v26 = vpop.f32.mrb[25].mxu0 }
 0x566   : > { %v2995_v17 = vadd.f32 %v2994_v23, %v2953_v39  ;;  %v2996_v27 = vpop.f32.mrb[25].mxu1  ;;  %v2957_v24 = vpop.f32.mrb[26].mxu0  ;;  %v3289_v39 = vrot.slane (!%p3787_p3), %v3272_v3, %v4669_v35  ;;  %v3293_v23 = vrot.slane (!%p3787_p3), %v3272_v3, %v4628_v4 }
 0x567   : > { %v2997_v28 = vadd.f32 %v2996_v27, %v2955_v26  ;;  %v2998_v29 = vpop.f32.mrb[26].mxu1  ;;  %v2958_v46 = vpop.f32.mrb[27].mxu0  ;;  %v5077_v26 = vsub.s32 (!%p3787_p3), 3, %v4625_v62 }
 0x568   : > { %v2999_v30 = vpop.f32.mrb[27].mxu1  ;;  %v3305_v29 = vrot.slane (!%p3787_p3), %v3272_v3, %v4677_v38  ;;  %v3309_v46 = vrot.slane (!%p3787_p3), %v3272_v3, %v4639_v6 }
 0x569   : > { %v5083_v30 = vsub.s32 (!%p3787_p3), 7, %v4625_v62 }
 0x5a4   : > { %v3035_v12 = vpop.f32.mrb[28].mxu0 }
 0x5a5   : > { %v3036_v37 = vadd.f32 %v3035_v12, %v2995_v17  ;;  %v3076_v25 = vpop.f32.mrb[28].mxu1  ;;  %v3037_v1 = vpop.f32.mrb[29].mxu0  ;;  %v3276_v17 = vld [vmem:[#allocation2 + $0x18] sm:$0xff] (!%p3787_p3) }
 0x5a6   : > { %v3038_v41 = vadd.f32 %v3037_v1, %v2997_v28  ;;  %v3078_v32 = vpop.f32.mrb[29].mxu1  ;;  %v3039_v63 = vpop.f32.mrb[30].mxu0  ;;  %v3301_v28 = vrot.slane (!%p3787_p3), %v3272_v3, %v4672_v36  ;;  %v5086_v1 = vmul.f32 (!%p3787_p3), %v3285_v22, %v3273_v20 }
 0x5a7   : > { %v3077_v33 = vadd.f32 %v3076_v25, %v3036_v37  ;;  %v3080_v56 = vpop.f32.mrb[30].mxu1  ;;  %v3040_v42 = vpop.f32.mrb[31].mxu0  ;;  %v3297_v25 = vrot.slane (!%p3787_p3), %v3272_v3, %v5077_v26 }
 0x5a8   : > { %v3079_v31 = vadd.f32 %v3078_v32, %v3038_v41  ;;  %v3081_v2 = vpop.f32.mrb[31].mxu1  ;;  %v5090_v41 = vmul.f32 (!%p3787_p3), %v3293_v23, %v3275_v18  ;;  %v3313_v32 = vrot.slane (!%p3787_p3), %v3272_v3, %v5083_v30  ;;  %v3330_v56 = vrot.slane (!%p3787_p3), %v5086_v1, 4 }
 0x5a9   : > { %v3251_v43 = vadd.f32 %v3077_v33, %v1811_v40  ;;  %v5088_v40 = vmul.f32 (!%p3787_p3), %v3289_v39, %v3274_v47  ;;  %v5099_v62 = vmul.f32 (!%p3787_p3), %v3297_v25, %v3276_v17 }
 0x5aa   : > { %v3252_v7 = vadd.f32 %v3079_v31, %v1812_v13  ;;  %v3342_v31 = vrot.slane (!%p3787_p3), %v5090_v41, 4 }
 0x5ab   : > { %3259 = vst [vmem:[#allocation2 + $0x20] sm:$0xff] %v3251_v43  ;;  %v3336_v42 = vrot.slane (!%p3787_p3), %v5088_v40, 4 }
 0x5ac   : > { %3260 = vst [vmem:[#allocation2 + $0x28] sm:$0xff] %v3252_v7 }
 0x5b2   : > { %v3277_v27 = vld [vmem:[#allocation2 + $0x20] sm:$0xff] (!%p3787_p3) }
 0x5b3   : > { %v3278_v24 = vld [vmem:[#allocation2 + $0x28] sm:$0xff] (!%p3787_p3)  ;;  %v5093_v63 = vmul.f32 (!%p3787_p3), %v3301_v28, %v3277_v27 }
 0x5b4   : > { %v5095_v33 = vmul.f32 (!%p3787_p3), %v3305_v29, %v3278_v24 }
 0x5b5   : > { %v3354_v43 = vrot.slane (!%p3787_p3), %v5093_v63, 4 }
 0x5b6   : > { %v3360_v7 = vrot.slane (!%p3787_p3), %v5095_v33, 4 }
 0x5e4   : > { %v3117_v44 = vpop.f32.mrb[32].mxu0 }
 0x5e5   : > { %v3158_v45 = vpop.f32.mrb[32].mxu1  ;;  %v3119_v58 = vpop.f32.mrb[33].mxu0 }
 0x5e6   : > { %v3159_v15 = vadd.f32 %v3158_v45, %v3117_v44  ;;  %v3160_v48 = vpop.f32.mrb[33].mxu1  ;;  %v3121_v55 = vpop.f32.mrb[34].mxu0  ;;  %v3331_v45 = vadd.f32 (!%p3787_p3), %v3330_v56, %v5086_v1 }
 0x5e7   : > { %v3161_v59 = vadd.f32 %v3160_v48, %v3119_v58  ;;  %v3162_v60 = vpop.f32.mrb[34].mxu1  ;;  %v3122_v16 = vpop.f32.mrb[35].mxu0  ;;  %v3337_v58 = vadd.f32 (!%p3787_p3), %v3336_v42, %v5088_v40  ;;  %v3348_v48 = vrot.slane (!%p3787_p3), %v5099_v62, 4  ;;  %v3355_v55 = vadd.f32 (!%p3787_p3), %v3354_v43, %v5093_v63 }
 0x5e8   : > { %v3163_v51 = vpop.f32.mrb[35].mxu1 }
 0x5e9   : > { %v3332_v51 = vrot.slane (!%p3787_p3), %v3331_v45, 2 }
 0x624   : > { %v3199_v10 = vpop.f32.mrb[36].mxu0 }
 0x625   : > { %v3200_v11 = vadd.f32 %v3199_v10, %v3159_v15  ;;  %v3240_v52 = vpop.f32.mrb[36].mxu1  ;;  %v3201_v19 = vpop.f32.mrb[37].mxu0  ;;  %v3343_v15 = vadd.f32 (!%p3787_p3), %v3342_v31, %v5090_v41  ;;  %v3338_v10 = vrot.slane (!%p3787_p3), %v3337_v58, 2 }
 0x626   : > { %v3202_v0 = vadd.f32 %v3201_v19, %v3161_v59  ;;  %v3242_v49 = vpop.f32.mrb[37].mxu1  ;;  %v3203_v50 = vpop.f32.mrb[38].mxu0  ;;  %3266 = sbr.rel (%p3787_p3) target bundleno = 1816 (0x718), region = 68  ;;  %v3361_v59 = vadd.f32 (!%p3787_p3), %v3360_v7, %v5095_v33  ;;  %v3356_v19 = vrot.slane (!%p3787_p3), %v3355_v55, 2 }
 0x627   : > { %v3241_v14 = vadd.f32 %v3240_v52, %v3200_v11  ;;  %v3244_v61 = vpop.f32.mrb[38].mxu1  ;;  %v3204_v54 = vpop.f32.mrb[39].mxu0  ;;  %v3344_v11 = vrot.slane (!%p3787_p3), %v3343_v15, 2  ;;  %v3349_v52 = vadd.f32 (!%p3787_p3), %v3348_v48, %v5099_v62  ;;  %v3333_v50 = vadd.f32 (!%p3787_p3), %v3332_v51, %v3331_v45 }
 0x628   : > { %v3243_v5 = vadd.f32 %v3242_v49, %v3202_v0  ;;  %v3245_v21 = vpop.f32.mrb[39].mxu1  ;;  %v3357_v54 = vadd.f32 (!%p3787_p3), %v3356_v19, %v3355_v55 }
 0x629   : > { %v3253_v8 = vadd.f32 %v3241_v14, %v1813_v53  ;;  %v3362_v53 = vrot.slane (!%p3787_p3), %v3361_v59, 2  ;;  %v3339_v14 = vadd.f32 (!%p3787_p3), %v3338_v10, %v3337_v58  ;;  %v3350_v61 = vrot.slane (!%p3787_p3), %v3349_v52, 2 }
 0x62a   : > { %v3254_v9 = vadd.f32 %v3243_v5, %v1814_v57  ;;  %v3345_v57 = vadd.f32 (!%p3787_p3), %v3344_v11, %v3343_v15  ;;  %v3358_v18 = vrot.slane (!%p3787_p3), %v3357_v54, 1 }
 0x62b   : > { %3261 = vst [vmem:[#allocation2 + $0x30] sm:$0xff] %v3253_v8  ;;  %v3363_v5 = vadd.f32 (!%p3787_p3), %v3362_v53, %v3361_v59  ;;  %v3340_v3 = vrot.slane (!%p3787_p3), %v3339_v14, 1  ;;  %v3351_v47 = vadd.f32 (!%p3787_p3), %v3350_v61, %v3349_v52 }
 0x62c   : > { %3262 = vst [vmem:[#allocation2 + $0x38] sm:$0xff] %v3254_v9  ;;  %v3334_v9 = vrot.slane (!%p3787_p3), %v3333_v50, 1  ;;  %v3346_v20 = vrot.slane (!%p3787_p3), %v3345_v57, 1  ;;  %v3359_v29 = vadd.f32 (!%p3787_p3), %v3358_v18, %v3357_v54 }
 0x62d   : > { %v3364_v22 = vrot.slane %v3363_v5, 1  ;;  %v3341_v27 = vadd.f32 %v3340_v3, %v3339_v14  ;;  %v3352_v28 = vrot.slane %v3351_v47, 1 }
 0x62e   : > { %v3335_v17 = vadd.f32 %v3334_v9, %v3333_v50  ;;  %v3347_v24 = vadd.f32 %v3346_v20, %v3345_v57  ;;  %v3382_v43 = vmul.f32 0.125, %v3359_v29 }
 0x62f   : > { %v3353_v25 = vadd.f32 %v3352_v28, %v3351_v47  ;;  %v3379_v56 = vmul.f32 0.125, %v3341_v27 }
 0x630   : > { %v3380_v42 = vmul.f32 0.125, %v3347_v24  ;;  %v5129_v59 = vsub.f32 %v5093_v63, %v3382_v43 }
 0x631   : > { %v3381_v45 = vmul.f32 0.125, %v3353_v25  ;;  %v5123_v15 = vsub.f32 %v5088_v40, %v3379_v56 }
 0x632   : > { %v3279_v12 = vld [vmem:[#allocation2 + $0x30] sm:$0xff]  ;;  %v5126_v48 = vsub.f32 %v5090_v41, %v3380_v42 }
 0x633   : > { %v3280_v37 = vld [vmem:[#allocation2 + $0x38] sm:$0xff]  ;;  %v5097_v13 = vmul.f32 %v3309_v46, %v3279_v12  ;;  %v3365_v46 = vadd.f32 %v3364_v22, %v3363_v5  ;;  %v5138_v51 = vsub.f32 %v5099_v62, %v3381_v45  ;;  %v3395_v40 = vmul.f32 %v5123_v15, %v5123_v15 }
 0x634   : > { %v5104_v2 = vmul.f32 %v3313_v32, %v3280_v37  ;;  %v3378_v32 = vmul.f32 0.125, %v3335_v17  ;;  %v3396_v41 = vmul.f32 %v5126_v48, %v5126_v48 }
 0x635   : > { %v3366_v44 = vrot.slane %v5097_v13, 4  ;;  %v3383_v7 = vmul.f32 0.125, %v3365_v46  ;;  %v3397_v10 = vmul.f32 %v5138_v51, %v5138_v51  ;;  %v3408_v52 = vrot.slane %v3395_v40, 4 }
 0x636   : > { %v3372_v16 = vrot.slane %v5104_v2, 4  ;;  %v5120_v58 = vsub.f32 %v5086_v1, %v3378_v32  ;;  %v3414_v19 = vrot.slane %v3396_v41, 4 }
 0x637   : > { %v3367_v60 = vadd.f32 %v3366_v44, %v5097_v13  ;;  %v3409_v14 = vadd.f32 %v3408_v52, %v3395_v40  ;;  %v3420_v61 = vrot.slane %v3397_v10, 4 }
 0x638   : > { %v3373_v49 = vadd.f32 %v3372_v16, %v5104_v2  ;;  %v3394_v1 = vmul.f32 %v5120_v58, %v5120_v58  ;;  %v3415_v57 = vadd.f32 %v3414_v19, %v3396_v41 }
 0x639   : > { %v3368_v0 = vrot.slane %v3367_v60, 2  ;;  %v3410_v3 = vrot.slane %v3409_v14, 2  ;;  %v3421_v47 = vadd.f32 %v3420_v61, %v3397_v10 }
 0x63a   : > { %v3374_v8 = vrot.slane %v3373_v49, 2  ;;  %v3402_v11 = vrot.slane %v3394_v1, 4  ;;  %v3416_v20 = vrot.slane %v3415_v57, 2 }
 0x63b   : > { %v3369_v21 = vadd.f32 %v3368_v0, %v3367_v60  ;;  %v5132_v60 = vsub.f32 %v5095_v33, %v3383_v7  ;;  %v3398_v33 = vmul.f32 %v5129_v59, %v5129_v59  ;;  %v3411_v27 = vadd.f32 %v3410_v3, %v3409_v14 }
 0x63c   : > { %v3375_v23 = vadd.f32 %v3374_v8, %v3373_v49  ;;  %v3403_v50 = vadd.f32 %v3402_v11, %v3394_v1  ;;  %v3417_v24 = vadd.f32 %v3416_v20, %v3415_v57  ;;  %v3422_v28 = vrot.slane %v3421_v47, 2  ;;  %v3268_v20 = vld [vmem:[#allocation12 + $0x80] ss:$4 sm:$0xff] }
 0x63d   : > { %v3370_v39 = vrot.slane %v3369_v21, 1  ;;  %v3412_v32 = vrot.slane %v3411_v27, 1 }
 0x63e   : > { %v3376_v37 = vrot.slane %v3375_v23, 1  ;;  %v3404_v9 = vrot.slane %v3403_v50, 2  ;;  %v3418_v56 = vrot.slane %v3417_v24, 1  ;;  %v3423_v42 = vadd.f32 %v3422_v28, %v3421_v47  ;;  %v3270_v47 = vld [vmem:[#allocation12 + $0x81] ss:$4 sm:$0xff] }
 0x63f   : > { %v3371_v12 = vadd.f32 %v3370_v39, %v3369_v21  ;;  %v3502_v28 = vrot.slane %v3268_v20, %v4672_v36 }
 0x640   : > { %v3377_v31 = vadd.f32 %v3376_v37, %v3375_v23  ;;  %v3405_v17 = vadd.f32 %v3404_v9, %v3403_v50  ;;  %v3419_v1 = vadd.f32 %v3418_v56, %v3417_v24  ;;  %v3424_v40 = vrot.slane %v3423_v42, 1 }
 0x641   : > { %v3384_v44 = vmul.f32 0.125, %v3371_v12  ;;  %v3498_v24 = vrot.slane %v3268_v20, %v5077_v26 }
 0x642   : > { %v3385_v55 = vmul.f32 0.125, %v3377_v31  ;;  %v3406_v25 = vrot.slane %v3405_v17, 1  ;;  %v3425_v10 = vadd.f32 %v3424_v40, %v3423_v42  ;;  %v3452_v19 = vmul.f32 0.125, %v3419_v1 }
 0x643   : > { %v5135_v16 = vsub.f32 %v5097_v13, %v3384_v44  ;;  %v3399_v13 = vmul.f32 %v5132_v60, %v5132_v60  ;;  %v3555_v40 = vrot.slane %v3270_v47, %v4677_v38 }
 0x644   : > { %v5147_v63 = vsub.f32 %v5104_v2, %v3385_v55  ;;  %v3426_v2 = vrot.slane %v3398_v33, 4  ;;  %v3407_v45 = vadd.f32 %v3406_v25, %v3405_v17  ;;  %v3413_v55 = vadd.f32 %v3412_v32, %v3411_v27 }
 0x645   : > { %v3400_v62 = vmul.f32 %v5135_v16, %v5135_v16  ;;  %v3432_v0 = vrot.slane %v3399_v13, 4  ;;  %v3510_v25 = vrot.slane %v3268_v20, %v4639_v6  ;;  %v3539_v32 = vrot.slane %v3270_v47, %v4669_v35 }
 0x646   : > { %v3401_v53 = vmul.f32 %v5147_v63, %v5147_v63  ;;  %v3427_v54 = vadd.f32 %v3426_v2, %v3398_v33  ;;  %v3450_v11 = vmul.f32 0.125, %v3407_v45  ;;  %v3451_v52 = vmul.f32 0.125, %v3413_v55 }
 0x647   : > { %v3438_v49 = vrot.slane %v3400_v62, 4  ;;  %v3433_v5 = vadd.f32 %v3432_v0, %v3399_v13  ;;  %v3551_v45 = vrot.slane %v3270_v47, %v4672_v36  ;;  %v3563_v36 = vrot.slane %v3270_v47, %v5083_v30 }
 0x648   : > { %v3444_v8 = vrot.slane %v3401_v53, 4  ;;  %v3428_v18 = vrot.slane %v3427_v54, 2  ;;  %v3458_v14 = vadd.f32 1e-05, %v3450_v11  ;;  %v3459_v57 = vadd.f32 1e-05, %v3451_v52 }
 0x649   : > { %v3439_v21 = vadd.f32 %v3438_v49, %v3400_v62  ;;  %v3434_v22 = vrot.slane %v3433_v5, 2  ;;  %v3453_v49 = vmul.f32 0.125, %v3425_v10 }
 0x64a   : > { %v3445_v23 = vadd.f32 %v3444_v8, %v3401_v53  ;;  %v3429_v29 = vadd.f32 %v3428_v18, %v3427_v54  ;;  %v3460_v54 = vadd.f32 1e-05, %v3452_v19  ;;  %3913 = vrsqrt.f32 %v3458_v14  ;;  %v3604_v14 = vld [vmem:[#allocation3] sm:$0xff] }
 0x64b   : > { %v3440_v39 = vrot.slane %v3439_v21, 2  ;;  %v3435_v46 = vadd.f32 %v3434_v22, %v3433_v5  ;;  %v3461_v5 = vadd.f32 1e-05, %v3453_v49  ;;  %3915 = vrsqrt.f32 %v3459_v57 }
 0x64c   : > { %v3446_v37 = vrot.slane %v3445_v23, 2  ;;  %v3430_v31 = vrot.slane %v3429_v29, 1  ;;  %3917 = vrsqrt.f32 %v3460_v54  ;;  %v3486_v18 = vrot.slane %v3268_v20, %v4666_v34 }
 0x64d   : > { %v3441_v12 = vadd.f32 %v3440_v39, %v3439_v21  ;;  %v3436_v43 = vrot.slane %v3435_v46, 1  ;;  %3919 = vrsqrt.f32 %v3461_v5  ;;  %v3490_v39 = vrot.slane %v3268_v20, %v4669_v35  ;;  %v3605_v5 = vld [vmem:[#allocation3 + $0x8] sm:$0xff] }
 0x64e   : > { %v3447_v44 = vadd.f32 %v3446_v37, %v3445_v23  ;;  %v3431_v41 = vadd.f32 %v3430_v31, %v3429_v29  ;;  %v3494_v23 = vrot.slane %v3268_v20, %v4628_v4  ;;  %v3535_v29 = vrot.slane %v3270_v47, %v4666_v34 }
 0x64f   : > { %v3442_v7 = vrot.slane %v3441_v12, 1  ;;  %v3437_v33 = vadd.f32 %v3436_v43, %v3435_v46  ;;  %v3506_v37 = vrot.slane %v3268_v20, %v4677_v38  ;;  %v3543_v43 = vrot.slane %v3270_v47, %v4628_v4 }
 0x650   : > { %v3448_v62 = vrot.slane %v3447_v44, 1  ;;  %v3454_v2 = vmul.f32 0.125, %v3431_v41  ;;  %v3559_v4 = vrot.slane %v3270_v47, %v4639_v6 }
 0x651   : > { %v3443_v13 = vadd.f32 %v3442_v7, %v3441_v12  ;;  %v3455_v0 = vmul.f32 0.125, %v3437_v33 }
 0x652   : > { %v3449_v53 = vadd.f32 %v3448_v62, %v3447_v44  ;;  %v3462_v21 = vadd.f32 1e-05, %v3454_v2 }
 0x653   : > { %v3456_v50 = vmul.f32 0.125, %v3443_v13  ;;  %v3463_v8 = vadd.f32 1e-05, %v3455_v0 }
 0x654   : > { %v3457_v61 = vmul.f32 0.125, %v3449_v53  ;;  %3921 = vrsqrt.f32 %v3462_v21  ;;  %v3914_v22 = vpop.eup %3913  ;;  %v3606_v21 = vld [vmem:[#allocation3 + $0x10] sm:$0xff] }
 0x655   : > { %v3464_v9 = vadd.f32 1e-05, %v3456_v50  ;;  %3923 = vrsqrt.f32 %v3463_v8  ;;  %v3916_v17 = vpop.eup %3915  ;;  %v3474_v27 = vmul.f32 %v3914_v22, %v5120_v58  ;;  %v3514_v58 = vrot.slane %v3268_v20, %v5083_v30  ;;  %v3607_v8 = vld [vmem:[#allocation3 + $0x18] sm:$0xff] }
 0x656   : > { %v3465_v3 = vadd.f32 1e-05, %v3457_v61  ;;  %v3918_v46 = vpop.eup %3917  ;;  %v3475_v12 = vmul.f32 %v3916_v17, %v5123_v15  ;;  %v3547_v15 = vrot.slane %v3270_v47, %v5077_v26 }
 0x657   : > { %3925 = vrsqrt.f32 %v3464_v9  ;;  %v3920_v56 = vpop.eup %3919  ;;  %v3476_v42 = vmul.f32 %v3918_v46, %v5126_v48  ;;  %v3523_v31 = vmul.f32 %v3486_v18, %v3474_v27  ;;  %v3608_v18 = vld [vmem:[#allocation3 + $0x20] sm:$0xff] }
 0x658   : > { %3927 = vrsqrt.f32 %v3465_v3  ;;  %v3477_v34 = vmul.f32 %v3920_v56, %v5138_v51  ;;  %v3524_v44 = vmul.f32 %v3490_v39, %v3475_v12 }
 0x659   : > { %v3525_v35 = vmul.f32 %v3494_v23, %v3476_v42  ;;  %v3572_v48 = vadd.f32 %v3535_v29, %v3523_v31 }
 0x65a   : > { %v3526_v13 = vmul.f32 %v3498_v24, %v3477_v34  ;;  %v3573_v62 = vadd.f32 %v3539_v32, %v3524_v44  ;;  %v3610_v32 = vld [vmem:[#allocation3 + $0x30] sm:$0xff] }
 0x65b   : > { %v3574_v11 = vadd.f32 %v3543_v43, %v3525_v35  ;;  %vm3580_vm0 = vcmp.ge.f32.partialorder %v3572_v48, 0.0  ;;  %v3611_v43 = vld [vmem:[#allocation3 + $0x38] sm:$0xff] }
 0x65c   : > { %v3575_v19 = vadd.f32 %v3547_v15, %v3526_v13  ;;  %vm3581_vm1 = vcmp.ge.f32.partialorder %v3573_v62, 0.0  ;;  %v3589_v6 = vmul.f32 0.01, %v3573_v62 }
 0x65d   : > { %vm3582_vm2 = vcmp.ge.f32.partialorder %v3574_v11, 0.0 }
 0x65e   : > { %v3922_v7 = vpop.eup %3921  ;;  %vm3583_vm3 = vcmp.ge.f32.partialorder %v3575_v19, 0.0  ;;  %v3591_v50 = vmul.f32 0.01, %v3575_v19  ;;  %v3597_v54 = vsel %vm3581_vm1, %v3573_v62, %v3589_v6 }
 0x65f   : > { %v3924_v55 = vpop.eup %3923  ;;  %v3478_v1 = vmul.f32 %v3922_v7, %v5129_v59  ;;  %v3613_v39 = vmax.f32 %v3597_v54, %v3605_v5 }
 0x660   : > { %v3479_v33 = vmul.f32 %v3924_v55, %v5132_v60  ;;  %v3588_v60 = vmul.f32 0.01, %v3572_v48  ;;  %v3599_v3 = vsel %vm3583_vm3, %v3575_v19, %v3591_v50 }
 0x661   : > { %v3926_v41 = vpop.eup %3925  ;;  %v3527_v26 = vmul.f32 %v3502_v28, %v3478_v1  ;;  %v3615_v17 = vmax.f32 %v3599_v3, %v3607_v8  ;;  %v3609_v28 = vld [vmem:[#allocation3 + $0x28] sm:$0xff]  ;;  %v3621_v12 = vmul.f32 %v3613_v39, %v3613_v39 }
 0x662   : > { %v3928_v51 = vpop.eup %3927  ;;  %v3480_v10 = vmul.f32 %v3926_v41, %v5135_v16  ;;  %v3528_v52 = vmul.f32 %v3506_v37, %v3479_v33  ;;  %v3590_v16 = vmul.f32 0.01, %v3574_v11  ;;  %v3596_v61 = vsel %vm3580_vm0, %v3572_v48, %v3588_v60 }
 0x663   : > { %v3481_v59 = vmul.f32 %v3928_v51, %v5147_v63  ;;  %v3576_v53 = vadd.f32 %v3551_v45, %v3527_v26  ;;  %v3612_v22 = vmax.f32 %v3596_v61, %v3604_v14  ;;  %v3623_v42 = vmul.f32 %v3615_v17, %v3615_v17 }
 0x664   : > { %v3529_v38 = vmul.f32 %v3510_v25, %v3480_v10  ;;  %v3577_v0 = vadd.f32 %v3555_v40, %v3528_v52  ;;  %v3598_v9 = vsel %vm3582_vm2, %v3574_v11, %v3590_v16 }
 0x665   : > { %v3530_v2 = vmul.f32 %v3514_v58, %v3481_v59  ;;  %vm3584_vm4 = vcmp.ge.f32.partialorder %v3576_v53, 0.0  ;;  %v3592_v30 = vmul.f32 0.01, %v3576_v53  ;;  %v3614_v23 = vmax.f32 %v3598_v9, %v3606_v21 }
 0x666   : > { %v3578_v49 = vadd.f32 %v3559_v4, %v3529_v38  ;;  %v3593_v63 = vmul.f32 0.01, %v3577_v0  ;;  %vm3585_vm5 = vcmp.ge.f32.partialorder %v3577_v0, 0.0  ;;  %v3620_v46 = vmul.f32 %v3612_v22, %v3612_v22 }
 0x667   : > { %v3579_v57 = vadd.f32 %v3563_v36, %v3530_v2  ;;  %v3600_v47 = vsel %vm3584_vm4, %v3576_v53, %v3592_v30  ;;  %v3622_v37 = vmul.f32 %v3614_v23, %v3614_v23 }
 0x668   : > { %v3594_v20 = vmul.f32 0.01, %v3578_v49  ;;  %vm3586_vm6 = vcmp.ge.f32.partialorder %v3578_v49, 0.0  ;;  %v3601_v24 = vsel %vm3585_vm5, %v3577_v0, %v3593_v63  ;;  %v3616_v29 = vmax.f32 %v3600_v47, %v3608_v18 }
 0x669   : > { %vm3587_vm7 = vcmp.ge.f32.partialorder %v3579_v57, 0.0  ;;  %v3595_v27 = vmul.f32 0.01, %v3579_v57  ;;  %v3617_v56 = vmax.f32 %v3601_v24, %v3609_v28  ;;  %v3628_v58 = vadd.f32 %v3621_v12, %v3620_v46 }
 0x66a   : > { %v3602_v25 = vsel %vm3586_vm6, %v3578_v49, %v3594_v20  ;;  %v3624_v34 = vmul.f32 %v3616_v29, %v3616_v29 }
 0x66b   : > { %v3603_v31 = vsel %vm3587_vm7, %v3579_v57, %v3595_v27  ;;  %v3618_v7 = vmax.f32 %v3602_v25, %v3610_v32  ;;  %v3629_v44 = vadd.f32 %v3628_v58, %v3622_v37  ;;  %v3625_v45 = vmul.f32 %v3617_v56, %v3617_v56 }
 0x66c   : > { %v3619_v15 = vmax.f32 %v3603_v31, %v3611_v43 }
 0x66d   : > { %v3630_v55 = vadd.f32 %v3629_v44, %v3623_v42  ;;  %v3626_v1 = vmul.f32 %v3618_v7, %v3618_v7 }
 0x66e   : > { %v3627_v40 = vmul.f32 %v3619_v15, %v3619_v15 }
 0x66f   : > { %v3631_v35 = vadd.f32 %v3630_v55, %v3624_v34 }
 0x671   : > { %v3632_v48 = vadd.f32 %v3631_v35, %v3625_v45 }
 0x673   : > { %v3633_v41 = vadd.f32 %v3632_v48, %v3626_v1 }
 0x675   : > { %v3634_v33 = vadd.f32 %v3633_v41, %v3627_v40 }
 0x677   : > { %3635 = vadd.xlane.f32.xlu0 %v3634_v33 }
 0x704   : > { %v3636_v13 = vpop.xlane.xlu0 %3635 }
 0x705   : > { %v3637_v4 = vadd.f32 1e-12, %v3636_v13 }
 0x707   : > { %3929 = vrsqrt.f32 %v3637_v4 }
 0x711   : > { %v3930_v62 = vpop.eup %3929 }
 0x712   : > { %v3639_v51 = vmul.f32 %v3930_v62, %v3612_v22  ;;  %v3640_v10 = vmul.f32 %v3930_v62, %v3613_v39  ;;  %v3641_v26 = vmul.f32 %v3930_v62, %v3614_v23  ;;  %v3642_v36 = vmul.f32 %v3930_v62, %v3615_v17 }
 0x713   : > { %v3643_v11 = vmul.f32 %v3930_v62, %v3616_v29  ;;  %v3644_v59 = vmul.f32 %v3930_v62, %v3617_v56  ;;  %v3645_v52 = vmul.f32 %v3930_v62, %v3618_v7  ;;  %v3646_v19 = vmul.f32 %v3930_v62, %v3619_v15 }
 0x714   : > { %3647 = vst [vmem:[#allocation13] sm:$0xff] %v3639_v51  ;;  %3648 = vst [vmem:[#allocation13 + $0x8] sm:$0xff] %v3640_v10 }
 0x715   : > { %3649 = vst [vmem:[#allocation13 + $0x10] sm:$0xff] %v3641_v26  ;;  %3650 = vst [vmem:[#allocation13 + $0x18] sm:$0xff] %v3642_v36 }
 0x716   : > { %3651 = vst [vmem:[#allocation13 + $0x20] sm:$0xff] %v3643_v11  ;;  %3652 = vst [vmem:[#allocation13 + $0x28] sm:$0xff] %v3644_v59 }
 0x717   : > { %3653 = vst [vmem:[#allocation13 + $0x30] sm:$0xff] %v3645_v52  ;;  %3654 = vst [vmem:[#allocation13 + $0x38] sm:$0xff] %v3646_v19 }
 0x718 PF: > { %p3839_p4 = scmp.eq.s32.totalorder %s4208_s22, 3  ;;  %s4158_s11 = smov [#allocation13]  }
 0x719   : > { %s3662_s14 = sshll.u32 %s4158_s11, 4  ;;  %s3663_s14 = int_to_ptr.vmem [resolvable:$true] %s3662_s14 }
 0x71a   : > { %s4075_s7 = scalar_lea.vmem %s3663_s14, 1024  ;;  %p4082_p6 = scmp.lt.s32.totalorder %s3663_s14, %s3663_s14 }
 0x71b   : > { %p4076_p2 = scmp.ne.s32.totalorder %s3663_s14, %s4075_s7  ;;  %p4083_p7 = scmp.lt.s32.totalorder %s4075_s7, %s4075_s7 }
 0x71d   : > { %p4077_p0 = pnand %p4076_p2, %p3839_p4  ;;  %p4084_p12 = por %p4083_p7, %p4082_p6 }
 0x71f   : > { %p4078_p9 = pneg %p4077_p0 }
 0x721   : > { %p4085_p11 = pnand %p4084_p12, %p4078_p9 }
 0x723   : > { %4088 = shalt.err (!%p4085_p11)
}
 0x724   : > { %s4089_s12 = scalar_lea.hbm %s5227_s5, 1024 }
 0x725   : > { %p4090_p13 = scmp.ne.s32.totalorder %s5227_s5, %s4089_s12  ;;  %p4095_p10 = scmp.lt.u32.totalorder %s4089_s12, %s5227_s5 }
 0x727   : > { %p4091_p5 = pnand %p4090_p13, %p3839_p4 }
 0x729   : > { %p4092_p8 = pneg %p4091_p5 }
 0x72b   : > { %p4097_p1 = pnand %p4095_p10, %p4092_p8 }
 0x72d   : > { %4100 = shalt.err (!%p4097_p1)
}
 0x72e   : > { %3812 = dma.vmem_to_hbm [thread:$0]  (%p3839_p4), %s3663_s14, 1024, %s5227_s5, [#allocation6]  }
 0x72f   : > { %4130 = dma.done.wait (%p3839_p4), [#allocation6], 1024  }
 0x730   : > { %4132 = vsyncadd (%p3839_p4), [#allocation6], 4294966272 }
 0x731 PF: > { %s5261_s10 = sld [smem:[#allocation18_spill]]  ;;  %p18_p3 = scmp.ge.s32.totalorder %s4211_s23, 6  }
 0x732   : > { %s5262_s18 = smov %s4139_s19  ;;  %s5263_s19 = smov %s4143_s20 }
 0x733   : > { %s5265_s21 = smov %s4211_s23  ;;  %20 = sbr.rel (!%p18_p3) target bundleno = 9 (0x9), region = 116 }
 0x737   : > { %s5264_s20 = smov %s5261_s10 }
 0x73a   :  { %3675 = vsyncpa [#allocation5], 1 }
 0x73b   :  { %3677 = vsyncpa [#allocation5 + $0x1], 1 }
 0x73c   :  { %3678 = vsyncpa [#allocation8], 1 }
 0x73d   :  { %3680 = vsyncpa [#allocation8 + $0x1], 1 }
 0x73e   :  { %3681 = vsyncpa [#allocation11], 1 }
 0x73f   :  { %3682 = vsyncpa [#allocation6], 1 }
 0x740   :  { %3684 = vsyncpa [#allocation6 + $0x1], 1 }

</bundles_post_ra>
